<compile_context>
chip_gen: v7x
topology: tpu7x:2x2x1
jax: 0.10.0
libtpu: 0.0.40
codegen_flags: <defaults>
</compile_context>

<pallas_src>
import functools

import numpy as np
import jax
import jax.numpy as jnp
from jax.experimental import pallas as pl
from jax.experimental.pallas import tpu as pltpu


# ----------------------------- static helpers -----------------------------

def _build_shift_masks(h, w):
    """(9, 1, H*W) f32 validity masks for the 9 taps of a SAME 3x3 conv."""
    hw = h * w
    pos = np.arange(hw)
    row, col = pos // w, pos % w
    masks = np.zeros((9, 1, hw), np.float32)
    k = 0
    for oh in (-1, 0, 1):
        for ow in (-1, 0, 1):
            valid = ((row + oh >= 0) & (row + oh < h) &
                     (col + ow >= 0) & (col + ow < w))
            masks[k, 0, :] = valid.astype(np.float32)
            k += 1
    return jnp.asarray(masks)


def _tap_shifts(h, w):
    """Python-int lane-roll amounts per tap for the flattened (C, H*W) layout."""
    hw = h * w
    shifts = []
    for oh in (-1, 0, 1):
        for ow in (-1, 0, 1):
            delta = oh * w + ow
            shifts.append((-delta) % hw)      # out[p] = in[p + delta] (masked)
    return shifts


def timestep_embedding(t, dim):
    half = dim // 2
    freqs = jnp.exp(-jnp.log(10000.0) * jnp.arange(half, dtype=jnp.float32) / half)
    args = t.astype(jnp.float32)[:, None] * freqs[None, :]
    return jnp.concatenate([jnp.sin(args), jnp.cos(args)], axis=-1)   # (B, dim)


# ----------------------------- fused Pallas kernel -----------------------------

def _make_fused_kernel(h, w, gen_c, hidden):
    hw = h * w
    shifts = _tap_shifts(h, w)

    def _shifted(a, k, masks_ref):
        """Spatially shifted (zero-padded) copy of a (C, H*W) activation, bf16."""
        s = shifts[k]
        r = a if s == 0 else pltpu.roll(a, s, 1)
        return (r * masks_ref[k]).astype(jnp.bfloat16)     # mask: (1, H*W)

    def kernel(coefs_ref,                                   # SMEM (B, 2) f32
               cond_ref, x_ref, noise_ref, temb_ref,        # per-sample inputs
               enc_w_ref, enc_b_ref, temb_w_ref, temb_b_ref,
               w1x_ref, w1c_ref, b1_ref, w2_ref, b2_ref, masks_ref,
               o_ref):
        b = pl.program_id(0)

        # 1) ConditionalEncoder: flatten(permuted cond) @ enc_w + b -> (1, H*W)
        cond_img = (jnp.dot(cond_ref[0].astype(jnp.bfloat16), enc_w_ref[...],
                            preferred_element_type=jnp.float32)
                    + enc_b_ref[...])                                  # (1, HW)

        # 2) q-sample: x_t = sqrt(a_bar[t]) * x0 + sqrt(1 - a_bar[t]) * eps
        ca = coefs_ref[b, 0]
        cb = coefs_ref[b, 1]
        x0 = x_ref[0]                                                  # (gen_c, HW)
        eps = noise_ref[0]                                             # (gen_c, HW)
        xt = ca * x0 + cb * eps

        # 3) timestep-embedding projection -> (hidden, 1) column
        temb_h = (jnp.dot(temb_w_ref[...], temb_ref[0],
                          preferred_element_type=jnp.float32)
                  + temb_b_ref[...])                                   # (hidden, 1)

        # 4) conv1 (3x3 SAME) over [x_t ; cond] as 9 shifted matmuls,
        #    + broadcast time embedding, SiLU.
        acc1 = jnp.zeros((hidden, hw), jnp.float32)
        for k in range(9):
            sx = _shifted(xt, k, masks_ref)                            # (gen_c, HW)
            sc = _shifted(cond_img, k, masks_ref)                      # (1, HW)
            acc1 = (acc1
                    + jnp.dot(w1x_ref[k], sx, preferred_element_type=jnp.float32)
                    + jnp.dot(w1c_ref[k], sc, preferred_element_type=jnp.float32))
        h1 = acc1 + b1_ref[...] + temb_h                               # (hidden, HW)
        h1 = h1 * jax.nn.sigmoid(h1)                                   # SiLU

        # 5) conv2 (3x3 SAME): hidden -> gen_c (prediction never leaves VMEM)
        acc2 = jnp.zeros((gen_c, hw), jnp.float32)
        for k in range(9):
            sh = _shifted(h1, k, masks_ref)                            # (hidden, HW)
            acc2 = acc2 + jnp.dot(w2_ref[k], sh,
                                  preferred_element_type=jnp.float32)
        pred = acc2 + b2_ref[...]                                      # (gen_c, HW)

        # 6) per-sample sum of squared error vs. the true noise (NCHW order)
        d = pred - eps
        sse = jnp.sum(d * d)
        o_ref[...] = jnp.broadcast_to(sse, o_ref.shape)                # lane-dense

    return kernel


# ----------------------------- module wrapper -----------------------------

class EncodedConditionalDiffusionPallas:
    """External interface matches PyTorch: x is NCHW, condition is (B, C', H', W')."""

    def __init__(self,
                 input_output_shape=(2, 16, 16),
                 condition_in_shape=(16, 20, 10),
                 num_timesteps=1000,
                 hidden=32,
                 temb_dim=32):
        self.input_output_shape = input_output_shape
        self.condition_in_shape = condition_in_shape
        self.condition_out_shape = (1, *input_output_shape[1:])
        self.condition_permute_shape = (2, 0, 1)
        self.train_timesteps = num_timesteps
        self.sample_timesteps = num_timesteps // 5
        self.hidden = hidden
        self.temb_dim = temb_dim

        gen_c, h, w = input_output_shape
        hw = h * w
        cf = int(np.prod(condition_in_shape))
        self.cond_flat_dim = cf

        key = jax.random.PRNGKey(42)
        ks = jax.random.split(key, 6)

        def init(k, shape, fan_in, dtype=jnp.float32):
            arr = jax.random.normal(k, shape, jnp.float32) / np.sqrt(float(fan_in))
            return arr.astype(dtype)

        self.params = {
            # ConditionalEncoder linear: flatten(permuted cond) -> (1, H, W)
            "enc_w": init(ks[0], (cf, hw), cf, jnp.bfloat16),
            "enc_b": jnp.zeros((1, hw), jnp.float32),
            # timestep-embedding projection (stored transposed: (hidden, temb_dim))
            "temb_w": init(ks[1], (hidden, temb_dim), temb_dim),
            "temb_b": jnp.zeros((hidden, 1), jnp.float32),
            # denoiser conv1 (3x3, gen_c+1 -> hidden) split per input-channel group
            "w1x": init(ks[2], (9, hidden, gen_c), 9 * (gen_c + 1), jnp.bfloat16),
            "w1c": init(ks[3], (9, hidden, 1), 9 * (gen_c + 1), jnp.bfloat16),
            "b1": jnp.zeros((hidden, 1), jnp.float32),
            # denoiser conv2 (3x3, hidden -> gen_c)
            "w2": init(ks[4], (9, gen_c, hidden), 9 * hidden, jnp.bfloat16),
            "b2": jnp.zeros((gen_c, 1), jnp.float32),
        }

        # Linear beta schedule.
        betas = jnp.linspace(1e-4, 0.02, num_timesteps, dtype=jnp.float32)
        alphas_cumprod = jnp.cumprod(1.0 - betas)
        self.sqrt_ab = jnp.sqrt(alphas_cumprod)
        self.sqrt_1m_ab = jnp.sqrt(1.0 - alphas_cumprod)

        self.shift_masks = _build_shift_masks(h, w)          # (9, 1, H*W) f32

    # ---- build the single fused pallas_call for batch size B (trace-time) ----
    def _build_fused_call(self, batch):
        gen_c, h, w = self.input_output_shape
        hw = h * w
        hidden, temb_dim, cf = self.hidden, self.temb_dim, self.cond_flat_dim

        kernel = _make_fused_kernel(h, w, gen_c, hidden)

        def full2(shape_):
            return pl.BlockSpec(shape_, lambda b: (0, 0))

        def full3(shape_):
            return pl.BlockSpec(shape_, lambda b: (0, 0, 0))

        in_specs = [
            pl.BlockSpec(memory_space=pltpu.MemorySpace.SMEM),       # coefs (B,2)
            pl.BlockSpec((1, 1, cf), lambda b: (b, 0, 0)),           # cond flat
            pl.BlockSpec((1, gen_c, hw), lambda b: (b, 0, 0)),       # x  (NCHW flat)
            pl.BlockSpec((1, gen_c, hw), lambda b: (b, 0, 0)),       # noise
            pl.BlockSpec((1, temb_dim, 1), lambda b: (b, 0, 0)),     # temb column
            full2((cf, hw)),                                          # enc_w (bf16)
            full2((1, hw)),                                           # enc_b
            full2((hidden, temb_dim)),                                # temb_w
            full2((hidden, 1)),                                       # temb_b
            full3((9, hidden, gen_c)),                                # w1x (bf16)
            full3((9, hidden, 1)),                                    # w1c (bf16)
            full2((hidden, 1)),                                       # b1
            full3((9, gen_c, hidden)),                                # w2 (bf16)
            full2((gen_c, 1)),                                        # b2
            full3((9, 1, hw)),                                        # tap masks
        ]
        out_specs = pl.BlockSpec((1, 1, 128), lambda b: (b, 0, 0))

        return pl.pallas_call(
            kernel,
            grid=(batch,),
            in_specs=in_specs,
            out_specs=out_specs,
            out_shape=jax.ShapeDtypeStruct((batch, 1, 128), jnp.float32),
            compiler_params=pltpu.CompilerParams(
                dimension_semantics=("parallel",)),          # uses both TCs on v7x
        )

    @functools.partial(jax.jit, static_argnums=0)
    def forward(self, x, condition, key):
        """x: (B, gen_c, H, W) NCHW; condition: (B, *condition_in_shape).

        Returns the scalar diffusion-training (MSE) loss.
        """
        b = x.shape[0]
        gen_c, h, w = self.input_output_shape
        hw = h * w
        p = self.params

        # ConditionalEncoder preprocessing: per-sample permute (2,0,1), flatten.
        cond_p = jnp.transpose(condition, (0, 3, 1, 2))
        cond_flat = cond_p.reshape(b, 1, -1).astype(jnp.float32)      # (B,1,CF)

        # Diffusion-step sampling (host/XLA side RNG; tiny tensors).
        kt, kn = jax.random.split(key)
        t = jax.random.randint(kt, (b,), 0, self.train_timesteps)
        noise = jax.random.normal(kn, x.shape, jnp.float32)
        coefs = jnp.stack([self.sqrt_ab[t], self.sqrt_1m_ab[t]], axis=1)  # (B,2)

        temb = timestep_embedding(t, self.temb_dim)[:, :, None]       # (B,TD,1)

        x3 = x.reshape(b, gen_c, hw).astype(jnp.float32)              # (B,C,HW)
        n3 = noise.reshape(b, gen_c, hw)

        fused = self._build_fused_call(b)
        out = fused(coefs, cond_flat, x3, n3, temb,
                    p["enc_w"], p["enc_b"], p["temb_w"], p["temb_b"],
                    p["w1x"], p["w1c"], p["b1"], p["w2"], p["b2"],
                    self.shift_masks)                                  # (B,1,128)

        return jnp.sum(out[:, 0, 0]) / float(b * gen_c * hw)


if __name__ == "__main__":
    B = 2
    model = EncodedConditionalDiffusionPallas(
        input_output_shape=(2, 16, 16),
        condition_in_shape=(16, 20, 10),
        num_timesteps=1000,
    )

    key = jax.random.PRNGKey(0)
    kx, kc, kfwd = jax.random.split(key, 3)
    x = jax.random.normal(kx, (B, *model.input_output_shape), jnp.float32)
    condition = jax.random.normal(kc, (B, *model.condition_in_shape), jnp.float32)

    loss = model.forward(x, condition, kfwd)
    jax.block_until_ready(loss)
    assert loss.shape == () and jnp.isfinite(loss)
    print("KERNEL_OK")
</pallas_src>

<mosaic_0001>
module attributes {stable_mosaic.version = 11 : i64} {
  func.func @kernel(%arg0: i32, %arg1: memref<2x2xf32, #tpu.memory_space<smem>>, %arg2: memref<1x1x3200xf32, #tpu.memory_space<vmem>>, %arg3: memref<1x2x256xf32, #tpu.memory_space<vmem>>, %arg4: memref<1x2x256xf32, #tpu.memory_space<vmem>>, %arg5: memref<1x32x1xf32, #tpu.memory_space<vmem>>, %arg6: memref<3200x256xbf16, #tpu.memory_space<vmem>>, %arg7: memref<1x256xf32, #tpu.memory_space<vmem>>, %arg8: memref<32x32xf32, #tpu.memory_space<vmem>>, %arg9: memref<32x1xf32, #tpu.memory_space<vmem>>, %arg10: memref<9x32x2xbf16, #tpu.memory_space<vmem>>, %arg11: memref<9x32x1xbf16, #tpu.memory_space<vmem>>, %arg12: memref<32x1xf32, #tpu.memory_space<vmem>>, %arg13: memref<9x2x32xbf16, #tpu.memory_space<vmem>>, %arg14: memref<2x1xf32, #tpu.memory_space<vmem>>, %arg15: memref<9x1x256xf32, #tpu.memory_space<vmem>>, %arg16: memref<1x1x128xf32, #tpu.memory_space<vmem>>) attributes {dimension_semantics = [#tpu.dimension_semantics<parallel>], iteration_bounds = array<i64: 2>, scalar_prefetch = 0 : i64, scratch_operands = 0 : i64, tpu.core_type = #tpu.core_type<tc>, window_params = [{transform_indices = @transform_0, window_bounds = array<i64: 2, 2>}, {transform_indices = @transform_1, window_bounds = array<i64: 1, 1, 3200>}, {transform_indices = @transform_2, window_bounds = array<i64: 1, 2, 256>}, {transform_indices = @transform_3, window_bounds = array<i64: 1, 2, 256>}, {transform_indices = @transform_4, window_bounds = array<i64: 1, 32, 1>}, {pipeline_mode = #tpu.pipeline_mode<synchronous>, transform_indices = @transform_5, window_bounds = array<i64: 3200, 256>}, {pipeline_mode = #tpu.pipeline_mode<synchronous>, transform_indices = @transform_6, window_bounds = array<i64: 1, 256>}, {pipeline_mode = #tpu.pipeline_mode<synchronous>, transform_indices = @transform_7, window_bounds = array<i64: 32, 32>}, {pipeline_mode = #tpu.pipeline_mode<synchronous>, transform_indices = @transform_8, window_bounds = array<i64: 32, 1>}, {pipeline_mode = #tpu.pipeline_mode<synchronous>, transform_indices = @transform_9, window_bounds = array<i64: 9, 32, 2>}, {pipeline_mode = #tpu.pipeline_mode<synchronous>, transform_indices = @transform_10, window_bounds = array<i64: 9, 32, 1>}, {pipeline_mode = #tpu.pipeline_mode<synchronous>, transform_indices = @transform_11, window_bounds = array<i64: 32, 1>}, {pipeline_mode = #tpu.pipeline_mode<synchronous>, transform_indices = @transform_12, window_bounds = array<i64: 9, 2, 32>}, {pipeline_mode = #tpu.pipeline_mode<synchronous>, transform_indices = @transform_13, window_bounds = array<i64: 2, 1>}, {pipeline_mode = #tpu.pipeline_mode<synchronous>, transform_indices = @transform_14, window_bounds = array<i64: 9, 1, 256>}, {transform_indices = @transform_15, window_bounds = array<i64: 1, 1, 128>}]} {
    %c0 = arith.constant 0 : index
    %c0_0 = arith.constant 0 : index
    %c0_1 = arith.constant 0 : index
    %0 = vector.load %arg2[%c0, %c0_0, %c0_1] : memref<1x1x3200xf32, #tpu.memory_space<vmem>>, vector<1x1x3200xf32>
    %1 = vector.shape_cast %0 : vector<1x1x3200xf32> to vector<1x3200xf32>
    %2 = arith.truncf %1 : vector<1x3200xf32> to vector<1x3200xbf16>
    %c0_2 = arith.constant 0 : index
    %c0_3 = arith.constant 0 : index
    %3 = vector.load %arg6[%c0_2, %c0_3] : memref<3200x256xbf16, #tpu.memory_space<vmem>>, vector<3200x256xbf16>
    %cst = arith.constant dense<0.000000e+00> : vector<1x256xf32>
    %4 = tpu.matmul %2, %3, %cst {dimension_numbers = #tpu.dot_dimension_numbers<[1], [0], [0], [1], [0, 0, 1, 1], [], []>} : vector<1x3200xbf16>, vector<3200x256xbf16>, vector<1x256xf32> -> vector<1x256xf32>
    %c0_4 = arith.constant 0 : index
    %c0_5 = arith.constant 0 : index
    %5 = vector.load %arg7[%c0_4, %c0_5] : memref<1x256xf32, #tpu.memory_space<vmem>>, vector<1x256xf32>
    %6 = arith.addf %4, %5 : vector<1x256xf32>
    %7 = arith.index_cast %arg0 : i32 to index
    %c0_6 = arith.constant 0 : index
    %8 = memref.load %arg1[%7, %c0_6] : memref<2x2xf32, #tpu.memory_space<smem>>
    %9 = arith.index_cast %arg0 : i32 to index
    %c1 = arith.constant 1 : index
    %10 = memref.load %arg1[%9, %c1] : memref<2x2xf32, #tpu.memory_space<smem>>
    %c0_7 = arith.constant 0 : index
    %c0_8 = arith.constant 0 : index
    %c0_9 = arith.constant 0 : index
    %11 = vector.load %arg3[%c0_7, %c0_8, %c0_9] : memref<1x2x256xf32, #tpu.memory_space<vmem>>, vector<1x2x256xf32>
    %12 = vector.shape_cast %11 : vector<1x2x256xf32> to vector<2x256xf32>
    %c0_10 = arith.constant 0 : index
    %c0_11 = arith.constant 0 : index
    %c0_12 = arith.constant 0 : index
    %13 = vector.load %arg4[%c0_10, %c0_11, %c0_12] : memref<1x2x256xf32, #tpu.memory_space<vmem>>, vector<1x2x256xf32>
    %14 = vector.shape_cast %13 : vector<1x2x256xf32> to vector<2x256xf32>
    %15 = vector.broadcast %8 : f32 to vector<2x256xf32>
    %16 = arith.mulf %15, %12 : vector<2x256xf32>
    %17 = vector.broadcast %10 : f32 to vector<2x256xf32>
    %18 = arith.mulf %17, %14 : vector<2x256xf32>
    %19 = arith.addf %16, %18 : vector<2x256xf32>
    %c0_13 = arith.constant 0 : index
    %c0_14 = arith.constant 0 : index
    %20 = vector.load %arg8[%c0_13, %c0_14] : memref<32x32xf32, #tpu.memory_space<vmem>>, vector<32x32xf32>
    %c0_15 = arith.constant 0 : index
    %c0_16 = arith.constant 0 : index
    %c0_17 = arith.constant 0 : index
    %21 = vector.load %arg5[%c0_15, %c0_16, %c0_17] : memref<1x32x1xf32, #tpu.memory_space<vmem>>, vector<1x32x1xf32>
    %22 = vector.shape_cast %21 : vector<1x32x1xf32> to vector<32x1xf32>
    %cst_18 = arith.constant dense<0.000000e+00> : vector<32x1xf32>
    %23 = tpu.matmul %20, %22, %cst_18 {dimension_numbers = #tpu.dot_dimension_numbers<[1], [0], [0], [1], [0, 0, 1, 1], [], []>} : vector<32x32xf32>, vector<32x1xf32>, vector<32x1xf32> -> vector<32x1xf32>
    %c0_19 = arith.constant 0 : index
    %c0_20 = arith.constant 0 : index
    %24 = vector.load %arg9[%c0_19, %c0_20] : memref<32x1xf32, #tpu.memory_space<vmem>>, vector<32x1xf32>
    %25 = arith.addf %23, %24 : vector<32x1xf32>
    %cst_21 = arith.constant 0.000000e+00 : f32
    %26 = vector.broadcast %cst_21 : f32 to vector<32x256xf32>
    %c17_i32 = arith.constant 17 : i32
    %27 = tpu.dynamic_rotate %19 by %c17_i32 dim 1 : vector<2x256xf32>, i32 -> vector<2x256xf32>
    %c0_22 = arith.constant 0 : index
    %c0_23 = arith.constant 0 : index
    %c0_24 = arith.constant 0 : index
    %28 = vector.load %arg15[%c0_22, %c0_23, %c0_24] : memref<9x1x256xf32, #tpu.memory_space<vmem>>, vector<1x1x256xf32>
    %29 = vector.shape_cast %28 : vector<1x1x256xf32> to vector<1x256xf32>
    %30 = vector.broadcast %29 : vector<1x256xf32> to vector<2x256xf32>
    %31 = arith.mulf %27, %30 : vector<2x256xf32>
    %32 = arith.truncf %31 : vector<2x256xf32> to vector<2x256xbf16>
    %c17_i32_25 = arith.constant 17 : i32
    %33 = tpu.dynamic_rotate %6 by %c17_i32_25 dim 1 : vector<1x256xf32>, i32 -> vector<1x256xf32>
    %c0_26 = arith.constant 0 : index
    %c0_27 = arith.constant 0 : index
    %c0_28 = arith.constant 0 : index
    %34 = vector.load %arg15[%c0_26, %c0_27, %c0_28] : memref<9x1x256xf32, #tpu.memory_space<vmem>>, vector<1x1x256xf32>
    %35 = vector.shape_cast %34 : vector<1x1x256xf32> to vector<1x256xf32>
    %36 = arith.mulf %33, %35 : vector<1x256xf32>
    %37 = arith.truncf %36 : vector<1x256xf32> to vector<1x256xbf16>
    %c0_29 = arith.constant 0 : index
    %c0_30 = arith.constant 0 : index
    %c0_31 = arith.constant 0 : index
    %38 = vector.load %arg10[%c0_29, %c0_30, %c0_31] : memref<9x32x2xbf16, #tpu.memory_space<vmem>>, vector<1x32x2xbf16>
    %39 = vector.shape_cast %38 : vector<1x32x2xbf16> to vector<32x2xbf16>
    %cst_32 = arith.constant dense<0.000000e+00> : vector<32x256xf32>
    %40 = tpu.matmul %39, %32, %cst_32 {dimension_numbers = #tpu.dot_dimension_numbers<[1], [0], [0], [1], [0, 0, 1, 1], [], []>} : vector<32x2xbf16>, vector<2x256xbf16>, vector<32x256xf32> -> vector<32x256xf32>
    %41 = arith.addf %26, %40 : vector<32x256xf32>
    %c0_33 = arith.constant 0 : index
    %c0_34 = arith.constant 0 : index
    %c0_35 = arith.constant 0 : index
    %42 = vector.load %arg11[%c0_33, %c0_34, %c0_35] : memref<9x32x1xbf16, #tpu.memory_space<vmem>>, vector<1x32x1xbf16>
    %43 = vector.shape_cast %42 : vector<1x32x1xbf16> to vector<32x1xbf16>
    %cst_36 = arith.constant dense<0.000000e+00> : vector<32x256xf32>
    %44 = tpu.matmul %43, %37, %cst_36 {dimension_numbers = #tpu.dot_dimension_numbers<[1], [0], [0], [1], [0, 0, 1, 1], [], []>} : vector<32x1xbf16>, vector<1x256xbf16>, vector<32x256xf32> -> vector<32x256xf32>
    %45 = arith.addf %41, %44 : vector<32x256xf32>
    %c16_i32 = arith.constant 16 : i32
    %46 = tpu.dynamic_rotate %19 by %c16_i32 dim 1 : vector<2x256xf32>, i32 -> vector<2x256xf32>
    %c1_37 = arith.constant 1 : index
    %c0_38 = arith.constant 0 : index
    %c0_39 = arith.constant 0 : index
    %47 = vector.load %arg15[%c1_37, %c0_38, %c0_39] : memref<9x1x256xf32, #tpu.memory_space<vmem>>, vector<1x1x256xf32>
    %48 = vector.shape_cast %47 : vector<1x1x256xf32> to vector<1x256xf32>
    %49 = vector.broadcast %48 : vector<1x256xf32> to vector<2x256xf32>
    %50 = arith.mulf %46, %49 : vector<2x256xf32>
    %51 = arith.truncf %50 : vector<2x256xf32> to vector<2x256xbf16>
    %c16_i32_40 = arith.constant 16 : i32
    %52 = tpu.dynamic_rotate %6 by %c16_i32_40 dim 1 : vector<1x256xf32>, i32 -> vector<1x256xf32>
    %c1_41 = arith.constant 1 : index
    %c0_42 = arith.constant 0 : index
    %c0_43 = arith.constant 0 : index
    %53 = vector.load %arg15[%c1_41, %c0_42, %c0_43] : memref<9x1x256xf32, #tpu.memory_space<vmem>>, vector<1x1x256xf32>
    %54 = vector.shape_cast %53 : vector<1x1x256xf32> to vector<1x256xf32>
    %55 = arith.mulf %52, %54 : vector<1x256xf32>
    %56 = arith.truncf %55 : vector<1x256xf32> to vector<1x256xbf16>
    %c1_44 = arith.constant 1 : index
    %c0_45 = arith.constant 0 : index
    %c0_46 = arith.constant 0 : index
    %57 = vector.load %arg10[%c1_44, %c0_45, %c0_46] : memref<9x32x2xbf16, #tpu.memory_space<vmem>>, vector<1x32x2xbf16>
    %58 = vector.shape_cast %57 : vector<1x32x2xbf16> to vector<32x2xbf16>
    %cst_47 = arith.constant dense<0.000000e+00> : vector<32x256xf32>
    %59 = tpu.matmul %58, %51, %cst_47 {dimension_numbers = #tpu.dot_dimension_numbers<[1], [0], [0], [1], [0, 0, 1, 1], [], []>} : vector<32x2xbf16>, vector<2x256xbf16>, vector<32x256xf32> -> vector<32x256xf32>
    %60 = arith.addf %45, %59 : vector<32x256xf32>
    %c1_48 = arith.constant 1 : index
    %c0_49 = arith.constant 0 : index
    %c0_50 = arith.constant 0 : index
    %61 = vector.load %arg11[%c1_48, %c0_49, %c0_50] : memref<9x32x1xbf16, #tpu.memory_space<vmem>>, vector<1x32x1xbf16>
    %62 = vector.shape_cast %61 : vector<1x32x1xbf16> to vector<32x1xbf16>
    %cst_51 = arith.constant dense<0.000000e+00> : vector<32x256xf32>
    %63 = tpu.matmul %62, %56, %cst_51 {dimension_numbers = #tpu.dot_dimension_numbers<[1], [0], [0], [1], [0, 0, 1, 1], [], []>} : vector<32x1xbf16>, vector<1x256xbf16>, vector<32x256xf32> -> vector<32x256xf32>
    %64 = arith.addf %60, %63 : vector<32x256xf32>
    %c15_i32 = arith.constant 15 : i32
    %65 = tpu.dynamic_rotate %19 by %c15_i32 dim 1 : vector<2x256xf32>, i32 -> vector<2x256xf32>
    %c2 = arith.constant 2 : index
    %c0_52 = arith.constant 0 : index
    %c0_53 = arith.constant 0 : index
    %66 = vector.load %arg15[%c2, %c0_52, %c0_53] : memref<9x1x256xf32, #tpu.memory_space<vmem>>, vector<1x1x256xf32>
    %67 = vector.shape_cast %66 : vector<1x1x256xf32> to vector<1x256xf32>
    %68 = vector.broadcast %67 : vector<1x256xf32> to vector<2x256xf32>
    %69 = arith.mulf %65, %68 : vector<2x256xf32>
    %70 = arith.truncf %69 : vector<2x256xf32> to vector<2x256xbf16>
    %c15_i32_54 = arith.constant 15 : i32
    %71 = tpu.dynamic_rotate %6 by %c15_i32_54 dim 1 : vector<1x256xf32>, i32 -> vector<1x256xf32>
    %c2_55 = arith.constant 2 : index
    %c0_56 = arith.constant 0 : index
    %c0_57 = arith.constant 0 : index
    %72 = vector.load %arg15[%c2_55, %c0_56, %c0_57] : memref<9x1x256xf32, #tpu.memory_space<vmem>>, vector<1x1x256xf32>
    %73 = vector.shape_cast %72 : vector<1x1x256xf32> to vector<1x256xf32>
    %74 = arith.mulf %71, %73 : vector<1x256xf32>
    %75 = arith.truncf %74 : vector<1x256xf32> to vector<1x256xbf16>
    %c2_58 = arith.constant 2 : index
    %c0_59 = arith.constant 0 : index
    %c0_60 = arith.constant 0 : index
    %76 = vector.load %arg10[%c2_58, %c0_59, %c0_60] : memref<9x32x2xbf16, #tpu.memory_space<vmem>>, vector<1x32x2xbf16>
    %77 = vector.shape_cast %76 : vector<1x32x2xbf16> to vector<32x2xbf16>
    %cst_61 = arith.constant dense<0.000000e+00> : vector<32x256xf32>
    %78 = tpu.matmul %77, %70, %cst_61 {dimension_numbers = #tpu.dot_dimension_numbers<[1], [0], [0], [1], [0, 0, 1, 1], [], []>} : vector<32x2xbf16>, vector<2x256xbf16>, vector<32x256xf32> -> vector<32x256xf32>
    %79 = arith.addf %64, %78 : vector<32x256xf32>
    %c2_62 = arith.constant 2 : index
    %c0_63 = arith.constant 0 : index
    %c0_64 = arith.constant 0 : index
    %80 = vector.load %arg11[%c2_62, %c0_63, %c0_64] : memref<9x32x1xbf16, #tpu.memory_space<vmem>>, vector<1x32x1xbf16>
    %81 = vector.shape_cast %80 : vector<1x32x1xbf16> to vector<32x1xbf16>
    %cst_65 = arith.constant dense<0.000000e+00> : vector<32x256xf32>
    %82 = tpu.matmul %81, %75, %cst_65 {dimension_numbers = #tpu.dot_dimension_numbers<[1], [0], [0], [1], [0, 0, 1, 1], [], []>} : vector<32x1xbf16>, vector<1x256xbf16>, vector<32x256xf32> -> vector<32x256xf32>
    %83 = arith.addf %79, %82 : vector<32x256xf32>
    %c1_i32 = arith.constant 1 : i32
    %84 = tpu.dynamic_rotate %19 by %c1_i32 dim 1 : vector<2x256xf32>, i32 -> vector<2x256xf32>
    %c3 = arith.constant 3 : index
    %c0_66 = arith.constant 0 : index
    %c0_67 = arith.constant 0 : index
    %85 = vector.load %arg15[%c3, %c0_66, %c0_67] : memref<9x1x256xf32, #tpu.memory_space<vmem>>, vector<1x1x256xf32>
    %86 = vector.shape_cast %85 : vector<1x1x256xf32> to vector<1x256xf32>
    %87 = vector.broadcast %86 : vector<1x256xf32> to vector<2x256xf32>
    %88 = arith.mulf %84, %87 : vector<2x256xf32>
    %89 = arith.truncf %88 : vector<2x256xf32> to vector<2x256xbf16>
    %c1_i32_68 = arith.constant 1 : i32
    %90 = tpu.dynamic_rotate %6 by %c1_i32_68 dim 1 : vector<1x256xf32>, i32 -> vector<1x256xf32>
    %c3_69 = arith.constant 3 : index
    %c0_70 = arith.constant 0 : index
    %c0_71 = arith.constant 0 : index
    %91 = vector.load %arg15[%c3_69, %c0_70, %c0_71] : memref<9x1x256xf32, #tpu.memory_space<vmem>>, vector<1x1x256xf32>
    %92 = vector.shape_cast %91 : vector<1x1x256xf32> to vector<1x256xf32>
    %93 = arith.mulf %90, %92 : vector<1x256xf32>
    %94 = arith.truncf %93 : vector<1x256xf32> to vector<1x256xbf16>
    %c3_72 = arith.constant 3 : index
    %c0_73 = arith.constant 0 : index
    %c0_74 = arith.constant 0 : index
    %95 = vector.load %arg10[%c3_72, %c0_73, %c0_74] : memref<9x32x2xbf16, #tpu.memory_space<vmem>>, vector<1x32x2xbf16>
    %96 = vector.shape_cast %95 : vector<1x32x2xbf16> to vector<32x2xbf16>
    %cst_75 = arith.constant dense<0.000000e+00> : vector<32x256xf32>
    %97 = tpu.matmul %96, %89, %cst_75 {dimension_numbers = #tpu.dot_dimension_numbers<[1], [0], [0], [1], [0, 0, 1, 1], [], []>} : vector<32x2xbf16>, vector<2x256xbf16>, vector<32x256xf32> -> vector<32x256xf32>
    %98 = arith.addf %83, %97 : vector<32x256xf32>
    %c3_76 = arith.constant 3 : index
    %c0_77 = arith.constant 0 : index
    %c0_78 = arith.constant 0 : index
    %99 = vector.load %arg11[%c3_76, %c0_77, %c0_78] : memref<9x32x1xbf16, #tpu.memory_space<vmem>>, vector<1x32x1xbf16>
    %100 = vector.shape_cast %99 : vector<1x32x1xbf16> to vector<32x1xbf16>
    %cst_79 = arith.constant dense<0.000000e+00> : vector<32x256xf32>
    %101 = tpu.matmul %100, %94, %cst_79 {dimension_numbers = #tpu.dot_dimension_numbers<[1], [0], [0], [1], [0, 0, 1, 1], [], []>} : vector<32x1xbf16>, vector<1x256xbf16>, vector<32x256xf32> -> vector<32x256xf32>
    %102 = arith.addf %98, %101 : vector<32x256xf32>
    %c4 = arith.constant 4 : index
    %c0_80 = arith.constant 0 : index
    %c0_81 = arith.constant 0 : index
    %103 = vector.load %arg15[%c4, %c0_80, %c0_81] : memref<9x1x256xf32, #tpu.memory_space<vmem>>, vector<1x1x256xf32>
    %104 = vector.shape_cast %103 : vector<1x1x256xf32> to vector<1x256xf32>
    %105 = vector.broadcast %104 : vector<1x256xf32> to vector<2x256xf32>
    %106 = arith.mulf %19, %105 : vector<2x256xf32>
    %107 = arith.truncf %106 : vector<2x256xf32> to vector<2x256xbf16>
    %c4_82 = arith.constant 4 : index
    %c0_83 = arith.constant 0 : index
    %c0_84 = arith.constant 0 : index
    %108 = vector.load %arg15[%c4_82, %c0_83, %c0_84] : memref<9x1x256xf32, #tpu.memory_space<vmem>>, vector<1x1x256xf32>
    %109 = vector.shape_cast %108 : vector<1x1x256xf32> to vector<1x256xf32>
    %110 = arith.mulf %6, %109 : vector<1x256xf32>
    %111 = arith.truncf %110 : vector<1x256xf32> to vector<1x256xbf16>
    %c4_85 = arith.constant 4 : index
    %c0_86 = arith.constant 0 : index
    %c0_87 = arith.constant 0 : index
    %112 = vector.load %arg10[%c4_85, %c0_86, %c0_87] : memref<9x32x2xbf16, #tpu.memory_space<vmem>>, vector<1x32x2xbf16>
    %113 = vector.shape_cast %112 : vector<1x32x2xbf16> to vector<32x2xbf16>
    %cst_88 = arith.constant dense<0.000000e+00> : vector<32x256xf32>
    %114 = tpu.matmul %113, %107, %cst_88 {dimension_numbers = #tpu.dot_dimension_numbers<[1], [0], [0], [1], [0, 0, 1, 1], [], []>} : vector<32x2xbf16>, vector<2x256xbf16>, vector<32x256xf32> -> vector<32x256xf32>
    %115 = arith.addf %102, %114 : vector<32x256xf32>
    %c4_89 = arith.constant 4 : index
    %c0_90 = arith.constant 0 : index
    %c0_91 = arith.constant 0 : index
    %116 = vector.load %arg11[%c4_89, %c0_90, %c0_91] : memref<9x32x1xbf16, #tpu.memory_space<vmem>>, vector<1x32x1xbf16>
    %117 = vector.shape_cast %116 : vector<1x32x1xbf16> to vector<32x1xbf16>
    %cst_92 = arith.constant dense<0.000000e+00> : vector<32x256xf32>
    %118 = tpu.matmul %117, %111, %cst_92 {dimension_numbers = #tpu.dot_dimension_numbers<[1], [0], [0], [1], [0, 0, 1, 1], [], []>} : vector<32x1xbf16>, vector<1x256xbf16>, vector<32x256xf32> -> vector<32x256xf32>
    %119 = arith.addf %115, %118 : vector<32x256xf32>
    %c255_i32 = arith.constant 255 : i32
    %120 = tpu.dynamic_rotate %19 by %c255_i32 dim 1 : vector<2x256xf32>, i32 -> vector<2x256xf32>
    %c5 = arith.constant 5 : index
    %c0_93 = arith.constant 0 : index
    %c0_94 = arith.constant 0 : index
    %121 = vector.load %arg15[%c5, %c0_93, %c0_94] : memref<9x1x256xf32, #tpu.memory_space<vmem>>, vector<1x1x256xf32>
    %122 = vector.shape_cast %121 : vector<1x1x256xf32> to vector<1x256xf32>
    %123 = vector.broadcast %122 : vector<1x256xf32> to vector<2x256xf32>
    %124 = arith.mulf %120, %123 : vector<2x256xf32>
    %125 = arith.truncf %124 : vector<2x256xf32> to vector<2x256xbf16>
    %c255_i32_95 = arith.constant 255 : i32
    %126 = tpu.dynamic_rotate %6 by %c255_i32_95 dim 1 : vector<1x256xf32>, i32 -> vector<1x256xf32>
    %c5_96 = arith.constant 5 : index
    %c0_97 = arith.constant 0 : index
    %c0_98 = arith.constant 0 : index
    %127 = vector.load %arg15[%c5_96, %c0_97, %c0_98] : memref<9x1x256xf32, #tpu.memory_space<vmem>>, vector<1x1x256xf32>
    %128 = vector.shape_cast %127 : vector<1x1x256xf32> to vector<1x256xf32>
    %129 = arith.mulf %126, %128 : vector<1x256xf32>
    %130 = arith.truncf %129 : vector<1x256xf32> to vector<1x256xbf16>
    %c5_99 = arith.constant 5 : index
    %c0_100 = arith.constant 0 : index
    %c0_101 = arith.constant 0 : index
    %131 = vector.load %arg10[%c5_99, %c0_100, %c0_101] : memref<9x32x2xbf16, #tpu.memory_space<vmem>>, vector<1x32x2xbf16>
    %132 = vector.shape_cast %131 : vector<1x32x2xbf16> to vector<32x2xbf16>
    %cst_102 = arith.constant dense<0.000000e+00> : vector<32x256xf32>
    %133 = tpu.matmul %132, %125, %cst_102 {dimension_numbers = #tpu.dot_dimension_numbers<[1], [0], [0], [1], [0, 0, 1, 1], [], []>} : vector<32x2xbf16>, vector<2x256xbf16>, vector<32x256xf32> -> vector<32x256xf32>
    %134 = arith.addf %119, %133 : vector<32x256xf32>
    %c5_103 = arith.constant 5 : index
    %c0_104 = arith.constant 0 : index
    %c0_105 = arith.constant 0 : index
    %135 = vector.load %arg11[%c5_103, %c0_104, %c0_105] : memref<9x32x1xbf16, #tpu.memory_space<vmem>>, vector<1x32x1xbf16>
    %136 = vector.shape_cast %135 : vector<1x32x1xbf16> to vector<32x1xbf16>
    %cst_106 = arith.constant dense<0.000000e+00> : vector<32x256xf32>
    %137 = tpu.matmul %136, %130, %cst_106 {dimension_numbers = #tpu.dot_dimension_numbers<[1], [0], [0], [1], [0, 0, 1, 1], [], []>} : vector<32x1xbf16>, vector<1x256xbf16>, vector<32x256xf32> -> vector<32x256xf32>
    %138 = arith.addf %134, %137 : vector<32x256xf32>
    %c241_i32 = arith.constant 241 : i32
    %139 = tpu.dynamic_rotate %19 by %c241_i32 dim 1 : vector<2x256xf32>, i32 -> vector<2x256xf32>
    %c6 = arith.constant 6 : index
    %c0_107 = arith.constant 0 : index
    %c0_108 = arith.constant 0 : index
    %140 = vector.load %arg15[%c6, %c0_107, %c0_108] : memref<9x1x256xf32, #tpu.memory_space<vmem>>, vector<1x1x256xf32>
    %141 = vector.shape_cast %140 : vector<1x1x256xf32> to vector<1x256xf32>
    %142 = vector.broadcast %141 : vector<1x256xf32> to vector<2x256xf32>
    %143 = arith.mulf %139, %142 : vector<2x256xf32>
    %144 = arith.truncf %143 : vector<2x256xf32> to vector<2x256xbf16>
    %c241_i32_109 = arith.constant 241 : i32
    %145 = tpu.dynamic_rotate %6 by %c241_i32_109 dim 1 : vector<1x256xf32>, i32 -> vector<1x256xf32>
    %c6_110 = arith.constant 6 : index
    %c0_111 = arith.constant 0 : index
    %c0_112 = arith.constant 0 : index
    %146 = vector.load %arg15[%c6_110, %c0_111, %c0_112] : memref<9x1x256xf32, #tpu.memory_space<vmem>>, vector<1x1x256xf32>
    %147 = vector.shape_cast %146 : vector<1x1x256xf32> to vector<1x256xf32>
    %148 = arith.mulf %145, %147 : vector<1x256xf32>
    %149 = arith.truncf %148 : vector<1x256xf32> to vector<1x256xbf16>
    %c6_113 = arith.constant 6 : index
    %c0_114 = arith.constant 0 : index
    %c0_115 = arith.constant 0 : index
    %150 = vector.load %arg10[%c6_113, %c0_114, %c0_115] : memref<9x32x2xbf16, #tpu.memory_space<vmem>>, vector<1x32x2xbf16>
    %151 = vector.shape_cast %150 : vector<1x32x2xbf16> to vector<32x2xbf16>
    %cst_116 = arith.constant dense<0.000000e+00> : vector<32x256xf32>
    %152 = tpu.matmul %151, %144, %cst_116 {dimension_numbers = #tpu.dot_dimension_numbers<[1], [0], [0], [1], [0, 0, 1, 1], [], []>} : vector<32x2xbf16>, vector<2x256xbf16>, vector<32x256xf32> -> vector<32x256xf32>
    %153 = arith.addf %138, %152 : vector<32x256xf32>
    %c6_117 = arith.constant 6 : index
    %c0_118 = arith.constant 0 : index
    %c0_119 = arith.constant 0 : index
    %154 = vector.load %arg11[%c6_117, %c0_118, %c0_119] : memref<9x32x1xbf16, #tpu.memory_space<vmem>>, vector<1x32x1xbf16>
    %155 = vector.shape_cast %154 : vector<1x32x1xbf16> to vector<32x1xbf16>
    %cst_120 = arith.constant dense<0.000000e+00> : vector<32x256xf32>
    %156 = tpu.matmul %155, %149, %cst_120 {dimension_numbers = #tpu.dot_dimension_numbers<[1], [0], [0], [1], [0, 0, 1, 1], [], []>} : vector<32x1xbf16>, vector<1x256xbf16>, vector<32x256xf32> -> vector<32x256xf32>
    %157 = arith.addf %153, %156 : vector<32x256xf32>
    %c240_i32 = arith.constant 240 : i32
    %158 = tpu.dynamic_rotate %19 by %c240_i32 dim 1 : vector<2x256xf32>, i32 -> vector<2x256xf32>
    %c7 = arith.constant 7 : index
    %c0_121 = arith.constant 0 : index
    %c0_122 = arith.constant 0 : index
    %159 = vector.load %arg15[%c7, %c0_121, %c0_122] : memref<9x1x256xf32, #tpu.memory_space<vmem>>, vector<1x1x256xf32>
    %160 = vector.shape_cast %159 : vector<1x1x256xf32> to vector<1x256xf32>
    %161 = vector.broadcast %160 : vector<1x256xf32> to vector<2x256xf32>
    %162 = arith.mulf %158, %161 : vector<2x256xf32>
    %163 = arith.truncf %162 : vector<2x256xf32> to vector<2x256xbf16>
    %c240_i32_123 = arith.constant 240 : i32
    %164 = tpu.dynamic_rotate %6 by %c240_i32_123 dim 1 : vector<1x256xf32>, i32 -> vector<1x256xf32>
    %c7_124 = arith.constant 7 : index
    %c0_125 = arith.constant 0 : index
    %c0_126 = arith.constant 0 : index
    %165 = vector.load %arg15[%c7_124, %c0_125, %c0_126] : memref<9x1x256xf32, #tpu.memory_space<vmem>>, vector<1x1x256xf32>
    %166 = vector.shape_cast %165 : vector<1x1x256xf32> to vector<1x256xf32>
    %167 = arith.mulf %164, %166 : vector<1x256xf32>
    %168 = arith.truncf %167 : vector<1x256xf32> to vector<1x256xbf16>
    %c7_127 = arith.constant 7 : index
    %c0_128 = arith.constant 0 : index
    %c0_129 = arith.constant 0 : index
    %169 = vector.load %arg10[%c7_127, %c0_128, %c0_129] : memref<9x32x2xbf16, #tpu.memory_space<vmem>>, vector<1x32x2xbf16>
    %170 = vector.shape_cast %169 : vector<1x32x2xbf16> to vector<32x2xbf16>
    %cst_130 = arith.constant dense<0.000000e+00> : vector<32x256xf32>
    %171 = tpu.matmul %170, %163, %cst_130 {dimension_numbers = #tpu.dot_dimension_numbers<[1], [0], [0], [1], [0, 0, 1, 1], [], []>} : vector<32x2xbf16>, vector<2x256xbf16>, vector<32x256xf32> -> vector<32x256xf32>
    %172 = arith.addf %157, %171 : vector<32x256xf32>
    %c7_131 = arith.constant 7 : index
    %c0_132 = arith.constant 0 : index
    %c0_133 = arith.constant 0 : index
    %173 = vector.load %arg11[%c7_131, %c0_132, %c0_133] : memref<9x32x1xbf16, #tpu.memory_space<vmem>>, vector<1x32x1xbf16>
    %174 = vector.shape_cast %173 : vector<1x32x1xbf16> to vector<32x1xbf16>
    %cst_134 = arith.constant dense<0.000000e+00> : vector<32x256xf32>
    %175 = tpu.matmul %174, %168, %cst_134 {dimension_numbers = #tpu.dot_dimension_numbers<[1], [0], [0], [1], [0, 0, 1, 1], [], []>} : vector<32x1xbf16>, vector<1x256xbf16>, vector<32x256xf32> -> vector<32x256xf32>
    %176 = arith.addf %172, %175 : vector<32x256xf32>
    %c239_i32 = arith.constant 239 : i32
    %177 = tpu.dynamic_rotate %19 by %c239_i32 dim 1 : vector<2x256xf32>, i32 -> vector<2x256xf32>
    %c8 = arith.constant 8 : index
    %c0_135 = arith.constant 0 : index
    %c0_136 = arith.constant 0 : index
    %178 = vector.load %arg15[%c8, %c0_135, %c0_136] : memref<9x1x256xf32, #tpu.memory_space<vmem>>, vector<1x1x256xf32>
    %179 = vector.shape_cast %178 : vector<1x1x256xf32> to vector<1x256xf32>
    %180 = vector.broadcast %179 : vector<1x256xf32> to vector<2x256xf32>
    %181 = arith.mulf %177, %180 : vector<2x256xf32>
    %182 = arith.truncf %181 : vector<2x256xf32> to vector<2x256xbf16>
    %c239_i32_137 = arith.constant 239 : i32
    %183 = tpu.dynamic_rotate %6 by %c239_i32_137 dim 1 : vector<1x256xf32>, i32 -> vector<1x256xf32>
    %c8_138 = arith.constant 8 : index
    %c0_139 = arith.constant 0 : index
    %c0_140 = arith.constant 0 : index
    %184 = vector.load %arg15[%c8_138, %c0_139, %c0_140] : memref<9x1x256xf32, #tpu.memory_space<vmem>>, vector<1x1x256xf32>
    %185 = vector.shape_cast %184 : vector<1x1x256xf32> to vector<1x256xf32>
    %186 = arith.mulf %183, %185 : vector<1x256xf32>
    %187 = arith.truncf %186 : vector<1x256xf32> to vector<1x256xbf16>
    %c8_141 = arith.constant 8 : index
    %c0_142 = arith.constant 0 : index
    %c0_143 = arith.constant 0 : index
    %188 = vector.load %arg10[%c8_141, %c0_142, %c0_143] : memref<9x32x2xbf16, #tpu.memory_space<vmem>>, vector<1x32x2xbf16>
    %189 = vector.shape_cast %188 : vector<1x32x2xbf16> to vector<32x2xbf16>
    %cst_144 = arith.constant dense<0.000000e+00> : vector<32x256xf32>
    %190 = tpu.matmul %189, %182, %cst_144 {dimension_numbers = #tpu.dot_dimension_numbers<[1], [0], [0], [1], [0, 0, 1, 1], [], []>} : vector<32x2xbf16>, vector<2x256xbf16>, vector<32x256xf32> -> vector<32x256xf32>
    %191 = arith.addf %176, %190 : vector<32x256xf32>
    %c8_145 = arith.constant 8 : index
    %c0_146 = arith.constant 0 : index
    %c0_147 = arith.constant 0 : index
    %192 = vector.load %arg11[%c8_145, %c0_146, %c0_147] : memref<9x32x1xbf16, #tpu.memory_space<vmem>>, vector<1x32x1xbf16>
    %193 = vector.shape_cast %192 : vector<1x32x1xbf16> to vector<32x1xbf16>
    %cst_148 = arith.constant dense<0.000000e+00> : vector<32x256xf32>
    %194 = tpu.matmul %193, %187, %cst_148 {dimension_numbers = #tpu.dot_dimension_numbers<[1], [0], [0], [1], [0, 0, 1, 1], [], []>} : vector<32x1xbf16>, vector<1x256xbf16>, vector<32x256xf32> -> vector<32x256xf32>
    %195 = arith.addf %191, %194 : vector<32x256xf32>
    %c0_149 = arith.constant 0 : index
    %c0_150 = arith.constant 0 : index
    %196 = vector.load %arg12[%c0_149, %c0_150] : memref<32x1xf32, #tpu.memory_space<vmem>>, vector<32x1xf32>
    %197 = vector.broadcast %196 : vector<32x1xf32> to vector<32x256xf32>
    %198 = arith.addf %195, %197 : vector<32x256xf32>
    %199 = vector.broadcast %25 : vector<32x1xf32> to vector<32x256xf32>
    %200 = arith.addf %198, %199 : vector<32x256xf32>
    %201 = arith.negf %200 : vector<32x256xf32>
    %202 = math.exp %201 : vector<32x256xf32>
    %cst_151 = arith.constant 1.000000e+00 : f32
    %203 = vector.broadcast %cst_151 : f32 to vector<32x256xf32>
    %204 = arith.addf %203, %202 : vector<32x256xf32>
    %205 = arith.divf %203, %204 : vector<32x256xf32>
    %206 = arith.mulf %200, %205 : vector<32x256xf32>
    %cst_152 = arith.constant 0.000000e+00 : f32
    %207 = vector.broadcast %cst_152 : f32 to vector<2x256xf32>
    %c17_i32_153 = arith.constant 17 : i32
    %208 = tpu.dynamic_rotate %206 by %c17_i32_153 dim 1 : vector<32x256xf32>, i32 -> vector<32x256xf32>
    %c0_154 = arith.constant 0 : index
    %c0_155 = arith.constant 0 : index
    %c0_156 = arith.constant 0 : index
    %209 = vector.load %arg15[%c0_154, %c0_155, %c0_156] : memref<9x1x256xf32, #tpu.memory_space<vmem>>, vector<1x1x256xf32>
    %210 = vector.shape_cast %209 : vector<1x1x256xf32> to vector<1x256xf32>
    %211 = vector.broadcast %210 : vector<1x256xf32> to vector<32x256xf32>
    %212 = arith.mulf %208, %211 : vector<32x256xf32>
    %213 = arith.truncf %212 : vector<32x256xf32> to vector<32x256xbf16>
    %c0_157 = arith.constant 0 : index
    %c0_158 = arith.constant 0 : index
    %c0_159 = arith.constant 0 : index
    %214 = vector.load %arg13[%c0_157, %c0_158, %c0_159] : memref<9x2x32xbf16, #tpu.memory_space<vmem>>, vector<1x2x32xbf16>
    %215 = vector.shape_cast %214 : vector<1x2x32xbf16> to vector<2x32xbf16>
    %cst_160 = arith.constant dense<0.000000e+00> : vector<2x256xf32>
    %216 = tpu.matmul %215, %213, %cst_160 {dimension_numbers = #tpu.dot_dimension_numbers<[1], [0], [0], [1], [0, 0, 1, 1], [], []>} : vector<2x32xbf16>, vector<32x256xbf16>, vector<2x256xf32> -> vector<2x256xf32>
    %217 = arith.addf %207, %216 : vector<2x256xf32>
    %c16_i32_161 = arith.constant 16 : i32
    %218 = tpu.dynamic_rotate %206 by %c16_i32_161 dim 1 : vector<32x256xf32>, i32 -> vector<32x256xf32>
    %c1_162 = arith.constant 1 : index
    %c0_163 = arith.constant 0 : index
    %c0_164 = arith.constant 0 : index
    %219 = vector.load %arg15[%c1_162, %c0_163, %c0_164] : memref<9x1x256xf32, #tpu.memory_space<vmem>>, vector<1x1x256xf32>
    %220 = vector.shape_cast %219 : vector<1x1x256xf32> to vector<1x256xf32>
    %221 = vector.broadcast %220 : vector<1x256xf32> to vector<32x256xf32>
    %222 = arith.mulf %218, %221 : vector<32x256xf32>
    %223 = arith.truncf %222 : vector<32x256xf32> to vector<32x256xbf16>
    %c1_165 = arith.constant 1 : index
    %c0_166 = arith.constant 0 : index
    %c0_167 = arith.constant 0 : index
    %224 = vector.load %arg13[%c1_165, %c0_166, %c0_167] : memref<9x2x32xbf16, #tpu.memory_space<vmem>>, vector<1x2x32xbf16>
    %225 = vector.shape_cast %224 : vector<1x2x32xbf16> to vector<2x32xbf16>
    %cst_168 = arith.constant dense<0.000000e+00> : vector<2x256xf32>
    %226 = tpu.matmul %225, %223, %cst_168 {dimension_numbers = #tpu.dot_dimension_numbers<[1], [0], [0], [1], [0, 0, 1, 1], [], []>} : vector<2x32xbf16>, vector<32x256xbf16>, vector<2x256xf32> -> vector<2x256xf32>
    %227 = arith.addf %217, %226 : vector<2x256xf32>
    %c15_i32_169 = arith.constant 15 : i32
    %228 = tpu.dynamic_rotate %206 by %c15_i32_169 dim 1 : vector<32x256xf32>, i32 -> vector<32x256xf32>
    %c2_170 = arith.constant 2 : index
    %c0_171 = arith.constant 0 : index
    %c0_172 = arith.constant 0 : index
    %229 = vector.load %arg15[%c2_170, %c0_171, %c0_172] : memref<9x1x256xf32, #tpu.memory_space<vmem>>, vector<1x1x256xf32>
    %230 = vector.shape_cast %229 : vector<1x1x256xf32> to vector<1x256xf32>
    %231 = vector.broadcast %230 : vector<1x256xf32> to vector<32x256xf32>
    %232 = arith.mulf %228, %231 : vector<32x256xf32>
    %233 = arith.truncf %232 : vector<32x256xf32> to vector<32x256xbf16>
    %c2_173 = arith.constant 2 : index
    %c0_174 = arith.constant 0 : index
    %c0_175 = arith.constant 0 : index
    %234 = vector.load %arg13[%c2_173, %c0_174, %c0_175] : memref<9x2x32xbf16, #tpu.memory_space<vmem>>, vector<1x2x32xbf16>
    %235 = vector.shape_cast %234 : vector<1x2x32xbf16> to vector<2x32xbf16>
    %cst_176 = arith.constant dense<0.000000e+00> : vector<2x256xf32>
    %236 = tpu.matmul %235, %233, %cst_176 {dimension_numbers = #tpu.dot_dimension_numbers<[1], [0], [0], [1], [0, 0, 1, 1], [], []>} : vector<2x32xbf16>, vector<32x256xbf16>, vector<2x256xf32> -> vector<2x256xf32>
    %237 = arith.addf %227, %236 : vector<2x256xf32>
    %c1_i32_177 = arith.constant 1 : i32
    %238 = tpu.dynamic_rotate %206 by %c1_i32_177 dim 1 : vector<32x256xf32>, i32 -> vector<32x256xf32>
    %c3_178 = arith.constant 3 : index
    %c0_179 = arith.constant 0 : index
    %c0_180 = arith.constant 0 : index
    %239 = vector.load %arg15[%c3_178, %c0_179, %c0_180] : memref<9x1x256xf32, #tpu.memory_space<vmem>>, vector<1x1x256xf32>
    %240 = vector.shape_cast %239 : vector<1x1x256xf32> to vector<1x256xf32>
    %241 = vector.broadcast %240 : vector<1x256xf32> to vector<32x256xf32>
    %242 = arith.mulf %238, %241 : vector<32x256xf32>
    %243 = arith.truncf %242 : vector<32x256xf32> to vector<32x256xbf16>
    %c3_181 = arith.constant 3 : index
    %c0_182 = arith.constant 0 : index
    %c0_183 = arith.constant 0 : index
    %244 = vector.load %arg13[%c3_181, %c0_182, %c0_183] : memref<9x2x32xbf16, #tpu.memory_space<vmem>>, vector<1x2x32xbf16>
    %245 = vector.shape_cast %244 : vector<1x2x32xbf16> to vector<2x32xbf16>
    %cst_184 = arith.constant dense<0.000000e+00> : vector<2x256xf32>
    %246 = tpu.matmul %245, %243, %cst_184 {dimension_numbers = #tpu.dot_dimension_numbers<[1], [0], [0], [1], [0, 0, 1, 1], [], []>} : vector<2x32xbf16>, vector<32x256xbf16>, vector<2x256xf32> -> vector<2x256xf32>
    %247 = arith.addf %237, %246 : vector<2x256xf32>
    %c4_185 = arith.constant 4 : index
    %c0_186 = arith.constant 0 : index
    %c0_187 = arith.constant 0 : index
    %248 = vector.load %arg15[%c4_185, %c0_186, %c0_187] : memref<9x1x256xf32, #tpu.memory_space<vmem>>, vector<1x1x256xf32>
    %249 = vector.shape_cast %248 : vector<1x1x256xf32> to vector<1x256xf32>
    %250 = vector.broadcast %249 : vector<1x256xf32> to vector<32x256xf32>
    %251 = arith.mulf %206, %250 : vector<32x256xf32>
    %252 = arith.truncf %251 : vector<32x256xf32> to vector<32x256xbf16>
    %c4_188 = arith.constant 4 : index
    %c0_189 = arith.constant 0 : index
    %c0_190 = arith.constant 0 : index
    %253 = vector.load %arg13[%c4_188, %c0_189, %c0_190] : memref<9x2x32xbf16, #tpu.memory_space<vmem>>, vector<1x2x32xbf16>
    %254 = vector.shape_cast %253 : vector<1x2x32xbf16> to vector<2x32xbf16>
    %cst_191 = arith.constant dense<0.000000e+00> : vector<2x256xf32>
    %255 = tpu.matmul %254, %252, %cst_191 {dimension_numbers = #tpu.dot_dimension_numbers<[1], [0], [0], [1], [0, 0, 1, 1], [], []>} : vector<2x32xbf16>, vector<32x256xbf16>, vector<2x256xf32> -> vector<2x256xf32>
    %256 = arith.addf %247, %255 : vector<2x256xf32>
    %c255_i32_192 = arith.constant 255 : i32
    %257 = tpu.dynamic_rotate %206 by %c255_i32_192 dim 1 : vector<32x256xf32>, i32 -> vector<32x256xf32>
    %c5_193 = arith.constant 5 : index
    %c0_194 = arith.constant 0 : index
    %c0_195 = arith.constant 0 : index
    %258 = vector.load %arg15[%c5_193, %c0_194, %c0_195] : memref<9x1x256xf32, #tpu.memory_space<vmem>>, vector<1x1x256xf32>
    %259 = vector.shape_cast %258 : vector<1x1x256xf32> to vector<1x256xf32>
    %260 = vector.broadcast %259 : vector<1x256xf32> to vector<32x256xf32>
    %261 = arith.mulf %257, %260 : vector<32x256xf32>
    %262 = arith.truncf %261 : vector<32x256xf32> to vector<32x256xbf16>
    %c5_196 = arith.constant 5 : index
    %c0_197 = arith.constant 0 : index
    %c0_198 = arith.constant 0 : index
    %263 = vector.load %arg13[%c5_196, %c0_197, %c0_198] : memref<9x2x32xbf16, #tpu.memory_space<vmem>>, vector<1x2x32xbf16>
    %264 = vector.shape_cast %263 : vector<1x2x32xbf16> to vector<2x32xbf16>
    %cst_199 = arith.constant dense<0.000000e+00> : vector<2x256xf32>
    %265 = tpu.matmul %264, %262, %cst_199 {dimension_numbers = #tpu.dot_dimension_numbers<[1], [0], [0], [1], [0, 0, 1, 1], [], []>} : vector<2x32xbf16>, vector<32x256xbf16>, vector<2x256xf32> -> vector<2x256xf32>
    %266 = arith.addf %256, %265 : vector<2x256xf32>
    %c241_i32_200 = arith.constant 241 : i32
    %267 = tpu.dynamic_rotate %206 by %c241_i32_200 dim 1 : vector<32x256xf32>, i32 -> vector<32x256xf32>
    %c6_201 = arith.constant 6 : index
    %c0_202 = arith.constant 0 : index
    %c0_203 = arith.constant 0 : index
    %268 = vector.load %arg15[%c6_201, %c0_202, %c0_203] : memref<9x1x256xf32, #tpu.memory_space<vmem>>, vector<1x1x256xf32>
    %269 = vector.shape_cast %268 : vector<1x1x256xf32> to vector<1x256xf32>
    %270 = vector.broadcast %269 : vector<1x256xf32> to vector<32x256xf32>
    %271 = arith.mulf %267, %270 : vector<32x256xf32>
    %272 = arith.truncf %271 : vector<32x256xf32> to vector<32x256xbf16>
    %c6_204 = arith.constant 6 : index
    %c0_205 = arith.constant 0 : index
    %c0_206 = arith.constant 0 : index
    %273 = vector.load %arg13[%c6_204, %c0_205, %c0_206] : memref<9x2x32xbf16, #tpu.memory_space<vmem>>, vector<1x2x32xbf16>
    %274 = vector.shape_cast %273 : vector<1x2x32xbf16> to vector<2x32xbf16>
    %cst_207 = arith.constant dense<0.000000e+00> : vector<2x256xf32>
    %275 = tpu.matmul %274, %272, %cst_207 {dimension_numbers = #tpu.dot_dimension_numbers<[1], [0], [0], [1], [0, 0, 1, 1], [], []>} : vector<2x32xbf16>, vector<32x256xbf16>, vector<2x256xf32> -> vector<2x256xf32>
    %276 = arith.addf %266, %275 : vector<2x256xf32>
    %c240_i32_208 = arith.constant 240 : i32
    %277 = tpu.dynamic_rotate %206 by %c240_i32_208 dim 1 : vector<32x256xf32>, i32 -> vector<32x256xf32>
    %c7_209 = arith.constant 7 : index
    %c0_210 = arith.constant 0 : index
    %c0_211 = arith.constant 0 : index
    %278 = vector.load %arg15[%c7_209, %c0_210, %c0_211] : memref<9x1x256xf32, #tpu.memory_space<vmem>>, vector<1x1x256xf32>
    %279 = vector.shape_cast %278 : vector<1x1x256xf32> to vector<1x256xf32>
    %280 = vector.broadcast %279 : vector<1x256xf32> to vector<32x256xf32>
    %281 = arith.mulf %277, %280 : vector<32x256xf32>
    %282 = arith.truncf %281 : vector<32x256xf32> to vector<32x256xbf16>
    %c7_212 = arith.constant 7 : index
    %c0_213 = arith.constant 0 : index
    %c0_214 = arith.constant 0 : index
    %283 = vector.load %arg13[%c7_212, %c0_213, %c0_214] : memref<9x2x32xbf16, #tpu.memory_space<vmem>>, vector<1x2x32xbf16>
    %284 = vector.shape_cast %283 : vector<1x2x32xbf16> to vector<2x32xbf16>
    %cst_215 = arith.constant dense<0.000000e+00> : vector<2x256xf32>
    %285 = tpu.matmul %284, %282, %cst_215 {dimension_numbers = #tpu.dot_dimension_numbers<[1], [0], [0], [1], [0, 0, 1, 1], [], []>} : vector<2x32xbf16>, vector<32x256xbf16>, vector<2x256xf32> -> vector<2x256xf32>
    %286 = arith.addf %276, %285 : vector<2x256xf32>
    %c239_i32_216 = arith.constant 239 : i32
    %287 = tpu.dynamic_rotate %206 by %c239_i32_216 dim 1 : vector<32x256xf32>, i32 -> vector<32x256xf32>
    %c8_217 = arith.constant 8 : index
    %c0_218 = arith.constant 0 : index
    %c0_219 = arith.constant 0 : index
    %288 = vector.load %arg15[%c8_217, %c0_218, %c0_219] : memref<9x1x256xf32, #tpu.memory_space<vmem>>, vector<1x1x256xf32>
    %289 = vector.shape_cast %288 : vector<1x1x256xf32> to vector<1x256xf32>
    %290 = vector.broadcast %289 : vector<1x256xf32> to vector<32x256xf32>
    %291 = arith.mulf %287, %290 : vector<32x256xf32>
    %292 = arith.truncf %291 : vector<32x256xf32> to vector<32x256xbf16>
    %c8_220 = arith.constant 8 : index
    %c0_221 = arith.constant 0 : index
    %c0_222 = arith.constant 0 : index
    %293 = vector.load %arg13[%c8_220, %c0_221, %c0_222] : memref<9x2x32xbf16, #tpu.memory_space<vmem>>, vector<1x2x32xbf16>
    %294 = vector.shape_cast %293 : vector<1x2x32xbf16> to vector<2x32xbf16>
    %cst_223 = arith.constant dense<0.000000e+00> : vector<2x256xf32>
    %295 = tpu.matmul %294, %292, %cst_223 {dimension_numbers = #tpu.dot_dimension_numbers<[1], [0], [0], [1], [0, 0, 1, 1], [], []>} : vector<2x32xbf16>, vector<32x256xbf16>, vector<2x256xf32> -> vector<2x256xf32>
    %296 = arith.addf %286, %295 : vector<2x256xf32>
    %c0_224 = arith.constant 0 : index
    %c0_225 = arith.constant 0 : index
    %297 = vector.load %arg14[%c0_224, %c0_225] : memref<2x1xf32, #tpu.memory_space<vmem>>, vector<2x1xf32>
    %298 = vector.broadcast %297 : vector<2x1xf32> to vector<2x256xf32>
    %299 = arith.addf %296, %298 : vector<2x256xf32>
    %300 = arith.subf %299, %14 : vector<2x256xf32>
    %301 = arith.mulf %300, %300 : vector<2x256xf32>
    %302 = vector.shape_cast %301 : vector<2x256xf32> to vector<1x2x256xf32>
    %cst_226 = arith.constant dense<0.000000e+00> : vector<1xf32>
    %303 = vector.multi_reduction <add>, %302, %cst_226 [1, 2] : vector<1x2x256xf32> to vector<1xf32>
    %304 = vector.shape_cast %303 : vector<1xf32> to vector<1x1x1xf32>
    %305 = vector.extract %304[0, 0, 0] : f32 from vector<1x1x1xf32>
    %306 = vector.broadcast %305 : f32 to vector<1x1x128xf32>
    %c0_227 = arith.constant 0 : index
    %c0_228 = arith.constant 0 : index
    %c0_229 = arith.constant 0 : index
    %307 = vector.load %arg16[%c0_227, %c0_228, %c0_229] : memref<1x1x128xf32, #tpu.memory_space<vmem>>, vector<1x1x128xf32>
    tpu.vector_store %arg16[%c0_227, %c0_228, %c0_229], %306 {strides = array<i32>} : memref<1x1x128xf32, #tpu.memory_space<vmem>>, vector<1x1x128xf32>,
    return
  }
  func.func @transform_0(%arg0: i32) -> (i32, i32) {
    %c0_i32 = arith.constant 0 : i32
    %c0_i32_0 = arith.constant 0 : i32
    %c0_i32_1 = arith.constant 0 : i32
    return %c0_i32, %c0_i32_0 : i32, i32
  }
  func.func @transform_1(%arg0: i32) -> (i32, i32, i32) {
    %c0_i32 = arith.constant 0 : i32
    %c0_i32_0 = arith.constant 0 : i32
    %c0_i32_1 = arith.constant 0 : i32
    return %arg0, %c0_i32, %c0_i32_0 : i32, i32, i32
  }
  func.func @transform_2(%arg0: i32) -> (i32, i32, i32) {
    %c0_i32 = arith.constant 0 : i32
    %c0_i32_0 = arith.constant 0 : i32
    %c0_i32_1 = arith.constant 0 : i32
    return %arg0, %c0_i32, %c0_i32_0 : i32, i32, i32
  }
  func.func @transform_3(%arg0: i32) -> (i32, i32, i32) {
    %c0_i32 = arith.constant 0 : i32
    %c0_i32_0 = arith.constant 0 : i32
    %c0_i32_1 = arith.constant 0 : i32
    return %arg0, %c0_i32, %c0_i32_0 : i32, i32, i32
  }
  func.func @transform_4(%arg0: i32) -> (i32, i32, i32) {
    %c0_i32 = arith.constant 0 : i32
    %c0_i32_0 = arith.constant 0 : i32
    %c0_i32_1 = arith.constant 0 : i32
    return %arg0, %c0_i32, %c0_i32_0 : i32, i32, i32
  }
  func.func @transform_5(%arg0: i32) -> (i32, i32) {
    %c0_i32 = arith.constant 0 : i32
    %c0_i32_0 = arith.constant 0 : i32
    %c0_i32_1 = arith.constant 0 : i32
    return %c0_i32, %c0_i32_0 : i32, i32
  }
  func.func @transform_6(%arg0: i32) -> (i32, i32) {
    %c0_i32 = arith.constant 0 : i32
    %c0_i32_0 = arith.constant 0 : i32
    %c0_i32_1 = arith.constant 0 : i32
    return %c0_i32, %c0_i32_0 : i32, i32
  }
  func.func @transform_7(%arg0: i32) -> (i32, i32) {
    %c0_i32 = arith.constant 0 : i32
    %c0_i32_0 = arith.constant 0 : i32
    %c0_i32_1 = arith.constant 0 : i32
    return %c0_i32, %c0_i32_0 : i32, i32
  }
  func.func @transform_8(%arg0: i32) -> (i32, i32) {
    %c0_i32 = arith.constant 0 : i32
    %c0_i32_0 = arith.constant 0 : i32
    %c0_i32_1 = arith.constant 0 : i32
    return %c0_i32, %c0_i32_0 : i32, i32
  }
  func.func @transform_9(%arg0: i32) -> (i32, i32, i32) {
    %c0_i32 = arith.constant 0 : i32
    %c0_i32_0 = arith.constant 0 : i32
    %c0_i32_1 = arith.constant 0 : i32
    %c0_i32_2 = arith.constant 0 : i32
    return %c0_i32, %c0_i32_0, %c0_i32_1 : i32, i32, i32
  }
  func.func @transform_10(%arg0: i32) -> (i32, i32, i32) {
    %c0_i32 = arith.constant 0 : i32
    %c0_i32_0 = arith.constant 0 : i32
    %c0_i32_1 = arith.constant 0 : i32
    %c0_i32_2 = arith.constant 0 : i32
    return %c0_i32, %c0_i32_0, %c0_i32_1 : i32, i32, i32
  }
  func.func @transform_11(%arg0: i32) -> (i32, i32) {
    %c0_i32 = arith.constant 0 : i32
    %c0_i32_0 = arith.constant 0 : i32
    %c0_i32_1 = arith.constant 0 : i32
    return %c0_i32, %c0_i32_0 : i32, i32
  }
  func.func @transform_12(%arg0: i32) -> (i32, i32, i32) {
    %c0_i32 = arith.constant 0 : i32
    %c0_i32_0 = arith.constant 0 : i32
    %c0_i32_1 = arith.constant 0 : i32
    %c0_i32_2 = arith.constant 0 : i32
    return %c0_i32, %c0_i32_0, %c0_i32_1 : i32, i32, i32
  }
  func.func @transform_13(%arg0: i32) -> (i32, i32) {
    %c0_i32 = arith.constant 0 : i32
    %c0_i32_0 = arith.constant 0 : i32
    %c0_i32_1 = arith.constant 0 : i32
    return %c0_i32, %c0_i32_0 : i32, i32
  }
  func.func @transform_14(%arg0: i32) -> (i32, i32, i32) {
    %c0_i32 = arith.constant 0 : i32
    %c0_i32_0 = arith.constant 0 : i32
    %c0_i32_1 = arith.constant 0 : i32
    %c0_i32_2 = arith.constant 0 : i32
    return %c0_i32, %c0_i32_0, %c0_i32_1 : i32, i32, i32
  }
  func.func @transform_15(%arg0: i32) -> (i32, i32, i32) {
    %c0_i32 = arith.constant 0 : i32
    %c0_i32_0 = arith.constant 0 : i32
    %c0_i32_1 = arith.constant 0 : i32
    return %arg0, %c0_i32, %c0_i32_0 : i32, i32, i32
  }
}

</mosaic_0001>

<bundles_post_ra>
// kernel: forward.1
= control target key start
LH: loop header
LB: loop body
LE: loop exit
PB: predicated region body
PF: predicated region fallthrough
CT: control target
= control target key end

     0   :  { %s10735_s0 = inlined_call_operand.vmem [shape: f32[2,2], index: 0, kind: input, shape index: {}]   ;;  %s10736_s1 = inlined_call_operand.vmem [shape: f32[2,1,3200], index: 1, kind: input, shape index: {}]   ;;  %s10737_s2 = inlined_call_operand.vmem [shape: f32[2,2,256], index: 2, kind: input, shape index: {}]   ;;  %s10738_s3 = inlined_call_operand.vmem [shape: f32[2,2,256], index: 3, kind: input, shape index: {}]   ;;  %s10739_s4 = inlined_call_operand.vmem [shape: f32[2,32,1], index: 4, kind: input, shape index: {}]   ;;  %s10740_s5 = inlined_call_operand.vmem [shape: bf16[3200,256], index: 5, kind: input, shape index: {}]   ;;  %s10741_s6 = inlined_call_operand.vmem [shape: f32[1,256], index: 6, kind: input, shape index: {}]   ;;  %s10742_s7 = inlined_call_operand.vmem [shape: f32[32,32], index: 7, kind: input, shape index: {}]   ;;  %s10743_s8 = inlined_call_operand.vmem [shape: f32[32,1], index: 8, kind: input, shape index: {}, may-alias: {8,11}]   ;;  %s10744_s9 = inlined_call_operand.vmem [shape: bf16[9,32,2], index: 9, kind: input, shape index: {}]   ;;  %s10745_s10 = inlined_call_operand.vmem [shape: bf16[9,32,1], index: 10, kind: input, shape index: {}]   ;;  %s10746_s11 = inlined_call_operand.vmem [shape: f32[32,1], index: 11, kind: input, shape index: {}, may-alias: {8,11}]   ;;  %s10747_s12 = inlined_call_operand.vmem [shape: bf16[9,2,32], index: 12, kind: input, shape index: {}]   ;;  %s10748_s13 = inlined_call_operand.vmem [shape: f32[2,1], index: 13, kind: input, shape index: {}]   ;;  %s10749_s14 = inlined_call_operand.vmem [shape: f32[9,1,256], index: 14, kind: input, shape index: {}]   ;;  %s10750_s15 = inlined_call_operand.vmem [shape: f32[2,1,128], index: 15, kind: output, shape index: {}]  }
   0x1   :  { %10769 = sst [smem:[#allocation10_spill]] %s10735_s0 }
   0x2   :  { %20 = vsyncpa [#allocation3], 0  ;;  %s8296_s18 = smov 0  }
   0x3 LB: > { %s8302_s19 = sadd.s32 4294967295, %s8203_s18   ;;  %p6660_p0 = scmp.ge.s32.totalorder %s8203_s18, 1  ;;  %s8203_s18 = sphi %s8296_s18, %s26_s18  }
   0x4   : > { %p392_p1 = scmp.lt.s32.totalorder %s8203_s18, 3  ;;  %s10770_s0 = sld [smem:[#allocation10_spill]] }
   0x5   : > { %p7483_p3 = scmp.eq.s32.totalorder %s8302_s19, 0 }
   0x6   : > { %p8309_p2 = pnand %p6660_p0, %p392_p1 }
   0x8   : > { %p7479_p4 = pneg %p8309_p2 }
   0xa   : > { %s405_s22 = sshll.u32 %s10770_s0, 4  ;;  %p7480_p5 = pnand %p7483_p3, %p7479_p4  ;;  %s406_s22 = int_to_ptr.vmem [resolvable:$true] %s405_s22 }
   0xb   : > { %s8178_s24 = scalar_lea.vmem %s406_s22, 32  ;;  %p8186_p10 = scmp.lt.s32.totalorder %s406_s22, %s406_s22 }
   0xc   : > { %p8179_p6 = scmp.ne.s32.totalorder %s406_s22, %s8178_s24  ;;  %p8180_p7 = pneg %p7480_p5 }
   0xd   : > { %p8187_p11 = scmp.lt.s32.totalorder %s8178_s24, %s8178_s24 }
   0xe   : > { %p8181_p8 = pnand %p8180_p7, %p8179_p6 }
   0xf   : > { %p8188_p12 = por %p8187_p11, %p8186_p10 }
  0x10   : > { %p8182_p9 = pneg %p8181_p8 }
  0x12   : > { %p8189_p13 = pnand %p8188_p12, %p8182_p9 }
  0x14   : > { %8192 = shalt.err (!%p8189_p13)
}
  0x15   : > { %s8205_s25 = smov [#allocation2]   ;;  %479 = sbr.rel (%p8309_p2) target bundleno = 2150 (0x866), region = 80 }
  0x16   : > { %7482 = dma.vmem_to_smem (!%p7480_p5), %s406_s22, 32, %s8205_s25, [#allocation3]  }
  0x1c   : > { %8198 = dma.done.wait (%p7483_p3), [#allocation3], 32  }
  0x1d   : > { %8200 = vsyncadd (%p7483_p3), [#allocation3], 4294967264 }
  0x1e   : > { %485 = sfence }
  0x1f   : > { %v7506_v0 = vld [vmem:[%s10740_s5 + $0x304] ss:$8 sps:$4 sm:$0xff]   ;;  %v7508_v1 = vld [vmem:[%s10740_s5 + $0x300] ss:$8 sps:$4 sm:$0xff]   ;;  %v7509_v2 = vld [vmem:[%s10740_s5 + $0x314] ss:$8 sps:$4 sm:$0xff]   ;;  %v571_v7 = vlaneseq }
  0x20   : > { %3256 = vmatprep.subr.bf16.mxu0 %v7506_v0  ;;  %v7511_v3 = vld [vmem:[%s10740_s5 + $0x310] ss:$8 sps:$4 sm:$0xff]   ;;  %v7512_v4 = vld [vmem:[%s10740_s5 + $0x324] ss:$8 sps:$4 sm:$0xff]   ;;  %p540_p0 = scmp.lt.s32.totalorder %s8302_s19, 1  ;;  %s8208_s21 = smov 17  }
  0x21   : > { %3257 = vmatpush1.bf16.msra.mxu0 %v7508_v1  ;;  %v7514_v5 = vld [vmem:[%s10740_s5 + $0x320] ss:$8 sps:$4 sm:$0xff]   ;;  %v7515_v6 = vld [vmem:[%s10740_s5 + $0x334] ss:$8 sps:$4 sm:$0xff]   ;;  %v7517_v8 = vld [vmem:[%s10740_s5 + $0x330] ss:$8 sps:$4 sm:$0xff]  }
  0x22   : > { %3258 = vmatprep.subr.bf16.mxu0 %v7509_v2  ;;  %s8347_s27 = scalar_select %p540_p0, %s8302_s19, 1  ;;  %v7518_v9 = vld [vmem:[%s10740_s5 + $0x344] ss:$8 sps:$4 sm:$0xff]   ;;  %v8357_v10 = vshrl.u32 %v571_v7, 7  ;;  %v7520_v11 = vld [vmem:[%s10740_s5 + $0x340] ss:$8 sps:$4 sm:$0xff]  }
  0x23   : > { %v7521_v12 = vld [vmem:[%s10740_s5 + $0x354] ss:$8 sps:$4 sm:$0xff]   ;;  %v7523_v14 = vld [vmem:[%s10740_s5 + $0x350] ss:$8 sps:$4 sm:$0xff]   ;;  %v7524_v15 = vld [vmem:[%s10740_s5 + $0x364] ss:$8 sps:$4 sm:$0xff]  }
  0x24   : > { %s7472_s17 = smul.u32 25, %s8347_s27  ;;  %v8371_v13 = vsub.s32 7, %v8357_v10  ;;  %v7526_v18 = vld [vmem:[%s10740_s5 + $0x360] ss:$8 sps:$4 sm:$0xff]   ;;  %v7527_v19 = vld [vmem:[%s10740_s5 + $0x374] ss:$8 sps:$4 sm:$0xff]  }
  0x25   : > { %3259 = vmatpush1.bf16.msra.mxu0 %v7511_v3  ;;  %v7529_v21 = vld [vmem:[%s10740_s5 + $0x370] ss:$8 sps:$4 sm:$0xff]   ;;  %v7530_v22 = vld [vmem:[%s10740_s5 + $0x384] ss:$8 sps:$4 sm:$0xff]   ;;  %v7532_v23 = vld [vmem:[%s10740_s5 + $0x380] ss:$8 sps:$4 sm:$0xff]  }
  0x26   : > { %3260 = vmatprep.subr.bf16.mxu0 %v7512_v4  ;;  %s8368_s26 = scalar_lea.vmem %s10736_s1, %s7472_s17  ;;  %v7533_v24 = vld [vmem:[%s10740_s5 + $0x394] ss:$8 sps:$4 sm:$0xff]   ;;  %v7535_v25 = vld [vmem:[%s10740_s5 + $0x390] ss:$8 sps:$4 sm:$0xff]   ;;  %v7536_v26 = vld [vmem:[%s10740_s5 + $0x3a4] ss:$8 sps:$4 sm:$0xff]  }
  0x27   : > { %v8380_v16 = vld [vmem:[%s8368_s26] sm:$0xff]  ;;  %v7539_v28 = vld [vmem:[%s10740_s5 + $0x3b4] ss:$8 sps:$4 sm:$0xff]   ;;  %v7541_v29 = vld [vmem:[%s10740_s5 + $0x3b0] ss:$8 sps:$4 sm:$0xff]   ;;  %v8433_v35 = vsub.s32 6, %v8357_v10 }
  0x28   : > { %v602_v17 = vrot.slane %v8380_v16, %v8371_v13  ;;  %v7538_v27 = vld [vmem:[%s10740_s5 + $0x3a0] ss:$8 sps:$4 sm:$0xff]   ;;  %v7542_v30 = vld [vmem:[%s10740_s5 + $0x3c4] ss:$8 sps:$4 sm:$0xff]   ;;  %v7545_v32 = vld [vmem:[%s10740_s5 + $0x3d4] ss:$8 sps:$4 sm:$0xff]  }
  0x29   : > { %3261 = vmatpush1.bf16.msra.mxu0 %v7514_v5  ;;  %v7544_v31 = vld [vmem:[%s10740_s5 + $0x3c0] ss:$8 sps:$4 sm:$0xff]   ;;  %v7547_v33 = vld [vmem:[%s10740_s5 + $0x3d0] ss:$8 sps:$4 sm:$0xff]   ;;  %v7548_v34 = vld [vmem:[%s10740_s5 + $0x3e4] ss:$8 sps:$4 sm:$0xff]   ;;  %v598_v40 = vrot.slane %v8380_v16, %v8433_v35 }
  0x2a   : > { %3262 = vmatprep.subr.bf16.mxu0 %v7515_v6  ;;  %v703_v20 = vpack.c.bf16 %v602_v17, %v602_v17  ;;  %v7550_v36 = vld [vmem:[%s10740_s5 + $0x3e0] ss:$8 sps:$4 sm:$0xff]   ;;  %v7551_v37 = vld [vmem:[%s10740_s5 + $0x3f4] ss:$8 sps:$4 sm:$0xff]   ;;  %v8442_v38 = vsub.s32 1, %v8357_v10  ;;  %s7072_s17 = sshll.u32 %s8302_s19, 7 }
  0x2b   : > { %v8445_v39 = vld [vmem:[%s8368_s26 + $0x8] sm:$0xff]  ;;  %v7553_v41 = vld [vmem:[%s10740_s5 + $0x3f0] ss:$8 sps:$4 sm:$0xff]   ;;  %v702_v44 = vpack.c.bf16 %v598_v40, %v598_v40  ;;  %v7559_v47 = vld [vmem:[%s10740_s5 + $0x414] ss:$8 sps:$4 sm:$0xff]   ;;  %s3668_s19 = sadd.s32 1, %s7072_s17 }
  0x2c   : > { %3288 = vmatprep.mubr.bf16.mxu0 %v703_v20  ;;  %v610_v42 = vrot.slane %v8445_v39, %v8442_v38  ;;  %v7556_v43 = vld [vmem:[%s10740_s5 + $0x404] ss:$8 sps:$4 sm:$0xff]   ;;  %v7554_v45 = vld [vmem:[%s10740_s5 + $0x400] ss:$8 sps:$4 sm:$0xff]   ;;  %v7557_v48 = vld [vmem:[%s10740_s5 + $0x410] ss:$8 sps:$4 sm:$0xff]  }
  0x2d   : > { %3263 = vmatpush1.bf16.msra.mxu0 %v7517_v8  ;;  %v7562_v49 = vld [vmem:[%s10740_s5 + $0x424] ss:$8 sps:$4 sm:$0xff]   ;;  %v7560_v50 = vld [vmem:[%s10740_s5 + $0x420] ss:$8 sps:$4 sm:$0xff]   ;;  %v7565_v51 = vld [vmem:[%s10740_s5 + $0x434] ss:$8 sps:$4 sm:$0xff]  }
  0x2e   : > { %3264 = vmatprep.subr.bf16.mxu0 %v7518_v9  ;;  %v705_v46 = vpack.c.bf16 %v610_v42, %v610_v42  ;;  %v7563_v52 = vld [vmem:[%s10740_s5 + $0x430] ss:$8 sps:$4 sm:$0xff]   ;;  %v7568_v53 = vld [vmem:[%s10740_s5 + $0x444] ss:$8 sps:$4 sm:$0xff]   ;;  %v7566_v54 = vld [vmem:[%s10740_s5 + $0x440] ss:$8 sps:$4 sm:$0xff]  }
  0x2f   : > { %v7571_v55 = vld [vmem:[%s10740_s5 + $0x454] ss:$8 sps:$4 sm:$0xff]   ;;  %v7569_v56 = vld [vmem:[%s10740_s5 + $0x450] ss:$8 sps:$4 sm:$0xff]   ;;  %v7574_v57 = vld [vmem:[%s10740_s5 + $0x464] ss:$8 sps:$4 sm:$0xff]  }
  0x30   : > { %v7572_v58 = vld [vmem:[%s10740_s5 + $0x460] ss:$8 sps:$4 sm:$0xff]   ;;  %v7577_v59 = vld [vmem:[%s10740_s5 + $0x474] ss:$8 sps:$4 sm:$0xff]   ;;  %v7575_v60 = vld [vmem:[%s10740_s5 + $0x470] ss:$8 sps:$4 sm:$0xff]  }
  0x31   : > { %3265 = vmatpush1.bf16.msra.mxu0 %v7520_v11  ;;  %v7580_v61 = vld [vmem:[%s10740_s5 + $0x484] ss:$8 sps:$4 sm:$0xff]   ;;  %v7578_v62 = vld [vmem:[%s10740_s5 + $0x480] ss:$8 sps:$4 sm:$0xff]   ;;  %v7583_v63 = vld [vmem:[%s10740_s5 + $0x494] ss:$8 sps:$4 sm:$0xff]  }
  0x32   : > { %3266 = vmatprep.subr.bf16.mxu0 %v7521_v12  ;;  %v7674_v0 = vld [vmem:[%s10740_s5 + $0x4] ss:$8 sps:$4 sm:$0xff]   ;;  %v7679_v1 = vld [vmem:[%s10740_s5] ss:$8 sps:$4 sm:$0xff]   ;;  %v7581_v2 = vld [vmem:[%s10740_s5 + $0x490] ss:$8 sps:$4 sm:$0xff]  }
  0x33   : > { %3133 = vmatprep.subr.bf16.mxu1 %v7674_v0  ;;  %v7586_v3 = vld [vmem:[%s10740_s5 + $0x4a4] ss:$8 sps:$4 sm:$0xff]   ;;  %v7680_v4 = vld [vmem:[%s10740_s5 + $0x14] ss:$8 sps:$4 sm:$0xff]   ;;  %v7685_v5 = vld [vmem:[%s10740_s5 + $0x10] ss:$8 sps:$4 sm:$0xff]  }
  0x34   : > { %3134 = vmatpush1.bf16.msra.mxu1 %v7679_v1  ;;  %v7584_v6 = vld [vmem:[%s10740_s5 + $0x4a0] ss:$8 sps:$4 sm:$0xff]   ;;  %v7589_v8 = vld [vmem:[%s10740_s5 + $0x4b4] ss:$8 sps:$4 sm:$0xff]   ;;  %v7686_v9 = vld [vmem:[%s10740_s5 + $0x24] ss:$8 sps:$4 sm:$0xff]  }
  0x35   : > { %3267 = vmatpush1.bf16.msra.mxu0 %v7523_v14  ;;  %3135 = vmatprep.subr.bf16.mxu1 %v7680_v4  ;;  %v7691_v11 = vld [vmem:[%s10740_s5 + $0x20] ss:$8 sps:$4 sm:$0xff]   ;;  %v7587_v12 = vld [vmem:[%s10740_s5 + $0x4b0] ss:$8 sps:$4 sm:$0xff]   ;;  %v7592_v14 = vld [vmem:[%s10740_s5 + $0x4c4] ss:$8 sps:$4 sm:$0xff]  }
  0x36   : > { %3268 = vmatprep.subr.bf16.mxu0 %v7524_v15  ;;  %v7692_v15 = vld [vmem:[%s10740_s5 + $0x34] ss:$8 sps:$4 sm:$0xff]   ;;  %v7697_v17 = vld [vmem:[%s10740_s5 + $0x30] ss:$8 sps:$4 sm:$0xff]   ;;  %v7698_v20 = vld [vmem:[%s10740_s5 + $0x44] ss:$8 sps:$4 sm:$0xff]  }
  0x37   : > { %v7721_v40 = vld [vmem:[%s10740_s5 + $0x70] ss:$8 sps:$4 sm:$0xff]   ;;  %v7602_v42 = vld [vmem:[%s10740_s5 + $0x500] ss:$8 sps:$4 sm:$0xff]   ;;  %v7622_v0 = vld [vmem:[%s10740_s5 + $0x564] ss:$8 sps:$4 sm:$0xff]  }
  0x38   : > { %3136 = vmatpush1.bf16.msra.mxu1 %v7685_v5  ;;  %v7752_v1 = vld [vmem:[%s10740_s5 + $0xd4] ss:$8 sps:$4 sm:$0xff]   ;;  %v7758_v5 = vld [vmem:[%s10740_s5 + $0xe4] ss:$8 sps:$4 sm:$0xff]   ;;  %s9402_s28 = sld [smem:[#allocation2 + %s7072_s17]]  ;;  %s7257_s17 = sshll.u32 %s8347_s27, 2 }
  0x39   : > { %3269 = vmatpush1.bf16.msra.mxu0 %v7526_v18  ;;  %3137 = vmatprep.subr.bf16.mxu1 %v7686_v9  ;;  %v7590_v18 = vld [vmem:[%s10740_s5 + $0x4c0] ss:$8 sps:$4 sm:$0xff]   ;;  %v7625_v4 = vld [vmem:[%s10740_s5 + $0x574] ss:$8 sps:$4 sm:$0xff]   ;;  %v7628_v9 = vld [vmem:[%s10740_s5 + $0x584] ss:$8 sps:$4 sm:$0xff]   ;;  %s548_s16 = scalar_lea.vmem %s10737_s2, %s7257_s17  ;;  %s9427_s22 = scalar_lea.vmem %s10738_s3, %s7257_s17 }
  0x3a   : > { %3270 = vmatprep.subr.bf16.mxu0 %v7527_v19  ;;  %v7595_v19 = vld [vmem:[%s10740_s5 + $0x4d4] ss:$8 sps:$4 sm:$0xff]   ;;  %s9404_s29 = sld [smem:[#allocation2 + %s3668_s19]]  ;;  %s8210_s25 = smov 15   ;;  %vm3858_vm1 = vcmask 1040384   ;;  %vm3851_vm3 = vcmask 7168  }
  0x3b   : > { %s8211_s30 = smov 1   ;;  %s8212_s17 = smov 127   ;;  %vm3689_vm4 = vcmask 261120   ;;  %vm3930_vm5 = vcmask 15360   ;;  %vm6548_vm12 = vcmask 1041408  }
  0x3c   : > { %3138 = vmatpush1.bf16.msra.mxu1 %v7691_v11  ;;  %v7764_v11 = vld [vmem:[%s10740_s5 + $0xf4] ss:$8 sps:$4 sm:$0xff]   ;;  %s10755_s20 = smov 113   ;;  %s10753_s0 = smov 112  }
  0x3d   : > { %3271 = vmatpush1.bf16.msra.mxu0 %v7529_v21  ;;  %3139 = vmatprep.subr.bf16.mxu1 %v7692_v15  ;;  %v7703_v21 = vld [vmem:[%s10740_s5 + $0x40] ss:$8 sps:$4 sm:$0xff]   ;;  %s10751_s23 = smov 111   ;;  %s7259_s19 = sshll.u32 %s8347_s27, 5 }
  0x3e   : > { %3272 = vmatprep.subr.bf16.mxu0 %v7530_v22  ;;  %v7593_v22 = vld [vmem:[%s10740_s5 + $0x4d0] ss:$8 sps:$4 sm:$0xff]   ;;  %v7626_v15 = vld [vmem:[%s10740_s5 + $0x580] ss:$8 sps:$4 sm:$0xff]  }
  0x40   : > { %3140 = vmatpush1.bf16.msra.mxu1 %v7697_v17  ;;  %v7631_v17 = vld [vmem:[%s10740_s5 + $0x594] ss:$8 sps:$4 sm:$0xff]  }
  0x41   : > { %3273 = vmatpush1.bf16.msra.mxu0 %v7532_v23  ;;  %3141 = vmatprep.subr.bf16.mxu1 %v7698_v20  ;;  %v7598_v23 = vld [vmem:[%s10740_s5 + $0x4e4] ss:$8 sps:$4 sm:$0xff]  }
  0x42   : > { %3274 = vmatprep.subr.bf16.mxu0 %v7533_v24  ;;  %v7704_v24 = vld [vmem:[%s10740_s5 + $0x54] ss:$8 sps:$4 sm:$0xff]  }
  0x44   : > { %3142 = vmatpush1.bf16.msra.mxu1 %v7703_v21  ;;  %v7770_v21 = vld [vmem:[%s10740_s5 + $0x100] ss:$8 sps:$4 sm:$0xff]  }
  0x45   : > { %3275 = vmatpush1.bf16.msra.mxu0 %v7535_v25  ;;  %v7709_v25 = vld [vmem:[%s10740_s5 + $0x50] ss:$8 sps:$4 sm:$0xff]   ;;  %3143 = vmatprep.subr.bf16.mxu1 %v7704_v24  ;;  %v7634_v24 = vld [vmem:[%s10740_s5 + $0x5a4] ss:$8 sps:$4 sm:$0xff]  }
  0x46   : > { %3276 = vmatprep.subr.bf16.mxu0 %v7536_v26  ;;  %v7596_v26 = vld [vmem:[%s10740_s5 + $0x4e0] ss:$8 sps:$4 sm:$0xff]  }
  0x48   : > { %3144 = vmatpush1.bf16.msra.mxu1 %v7709_v25  ;;  %v7776_v25 = vld [vmem:[%s10740_s5 + $0x110] ss:$8 sps:$4 sm:$0xff]  }
  0x49   : > { %3277 = vmatpush1.bf16.msra.mxu0 %v7538_v27  ;;  %v8581_v27 = vsub.s32 0, %v8357_v10 }
  0x4a   : > { %3278 = vmatprep.subr.bf16.mxu0 %v7539_v28  ;;  %v7601_v28 = vld [vmem:[%s10740_s5 + $0x4f4] ss:$8 sps:$4 sm:$0xff]  }
  0x4d   : > { %3279 = vmatpush1.bf16.msra.mxu0 %v7541_v29  ;;  %v8587_v29 = vsub.s32 3, %v8357_v10 }
  0x4e   : > { %3280 = vmatprep.subr.bf16.mxu0 %v7542_v30  ;;  %v7710_v30 = vld [vmem:[%s10740_s5 + $0x64] ss:$8 sps:$4 sm:$0xff]  }
  0x4f   : > { %3145 = vmatprep.subr.bf16.mxu1 %v7710_v30  ;;  %v7784_v30 = vld [vmem:[%s10740_s5 + $0x124] ss:$8 sps:$4 sm:$0xff]  }
  0x51   : > { %3281 = vmatpush1.bf16.msra.mxu0 %v7544_v31  ;;  %v7715_v31 = vld [vmem:[%s10740_s5 + $0x60] ss:$8 sps:$4 sm:$0xff]  }
  0x52   : > { %3282 = vmatprep.subr.bf16.mxu0 %v7545_v32  ;;  %v606_v32 = vrot.slane %v8445_v39, %v8581_v27  ;;  %3146 = vmatpush1.bf16.msra.mxu1 %v7715_v31  ;;  %v7782_v31 = vld [vmem:[%s10740_s5 + $0x120] ss:$8 sps:$4 sm:$0xff]  }
  0x55   : > { %3283 = vmatpush1.bf16.msra.mxu0 %v7547_v33  ;;  %v7599_v33 = vld [vmem:[%s10740_s5 + $0x4f0] ss:$8 sps:$4 sm:$0xff]  }
  0x56   : > { %3284 = vmatprep.subr.bf16.mxu0 %v7548_v34  ;;  %v7604_v34 = vld [vmem:[%s10740_s5 + $0x504] ss:$8 sps:$4 sm:$0xff]  }
  0x59   : > { %3285 = vmatpush1.bf16.msra.mxu0 %v7550_v36  ;;  %v618_v36 = vrot.slane %v8445_v39, %v8587_v29 }
  0x5a   : > { %3286 = vmatprep.subr.bf16.mxu0 %v7551_v37  ;;  %v7716_v37 = vld [vmem:[%s10740_s5 + $0x74] ss:$8 sps:$4 sm:$0xff]  }
  0x5b   : > { %3147 = vmatprep.subr.bf16.mxu1 %v7716_v37  ;;  %v7638_v37 = vld [vmem:[%s10740_s5 + $0x5c0] ss:$8 sps:$4 sm:$0xff]  }
  0x5c   : > { %3148 = vmatpush1.bf16.msra.mxu1 %v7721_v40  ;;  %v7643_v40 = vld [vmem:[%s10740_s5 + $0x5d4] ss:$8 sps:$4 sm:$0xff]  }
  0x5d   : > { %3287 = vmatpush1.bf16.msra.mxu0 %v7553_v41  ;;  %v704_v41 = vpack.c.bf16 %v606_v32, %v606_v32  ;;  %v7635_v32 = vld [vmem:[%s10740_s5 + $0x5b0] ss:$8 sps:$4 sm:$0xff]  }
  0x5e   : > { %3297 = vmatprep.subr.bf16.mxu0 %v7556_v43  ;;  %v7607_v43 = vld [vmem:[%s10740_s5 + $0x514] ss:$8 sps:$4 sm:$0xff]  }
  0x60   : > { %3289 = vmatmul.mubr.bf16.vlgmr.msra.gmra.mrb[0].mxu0 %v702_v44  ;;  %v707_v44 = vpack.c.bf16 %v618_v36, %v618_v36  ;;  %v7788_v36 = vld [vmem:[%s10740_s5 + $0x130] ss:$8 sps:$4 sm:$0xff]  }
  0x61   : > { %3298 = vmatpush1.bf16.msra.mxu0 %v7554_v45  ;;  %3329 = vmatprep.mubr.bf16.mxu0 %v705_v46  ;;  %v7722_v45 = vld [vmem:[%s10740_s5 + $0x84] ss:$8 sps:$4 sm:$0xff]   ;;  %v7727_v46 = vld [vmem:[%s10740_s5 + $0x80] ss:$8 sps:$4 sm:$0xff]  }
  0x62   : > { %3299 = vmatprep.subr.bf16.mxu0 %v7559_v47  ;;  %3149 = vmatprep.subr.bf16.mxu1 %v7722_v45  ;;  %v7605_v47 = vld [vmem:[%s10740_s5 + $0x510] ss:$8 sps:$4 sm:$0xff]   ;;  %v7802_v45 = vld [vmem:[%s10740_s5 + $0x154] ss:$8 sps:$4 sm:$0xff]  }
  0x63   : > { %3150 = vmatpush1.bf16.msra.mxu1 %v7727_v46  ;;  %v7800_v46 = vld [vmem:[%s10740_s5 + $0x150] ss:$8 sps:$4 sm:$0xff]  }
  0x65   : > { %3300 = vmatpush1.bf16.msra.mxu0 %v7557_v48  ;;  %v7610_v48 = vld [vmem:[%s10740_s5 + $0x524] ss:$8 sps:$4 sm:$0xff]  }
  0x66   : > { %3301 = vmatprep.subr.bf16.mxu0 %v7562_v49  ;;  %v7728_v49 = vld [vmem:[%s10740_s5 + $0x94] ss:$8 sps:$4 sm:$0xff]  }
  0x67   : > { %3151 = vmatprep.subr.bf16.mxu1 %v7728_v49  ;;  %v7649_v49 = vld [vmem:[%s10740_s5 + $0x5f4] ss:$8 sps:$4 sm:$0xff]  }
  0x69   : > { %3302 = vmatpush1.bf16.msra.mxu0 %v7560_v50  ;;  %v7733_v50 = vld [vmem:[%s10740_s5 + $0x90] ss:$8 sps:$4 sm:$0xff]  }
  0x6a   : > { %3303 = vmatprep.subr.bf16.mxu0 %v7565_v51  ;;  %3152 = vmatpush1.bf16.msra.mxu1 %v7733_v50  ;;  %v7608_v51 = vld [vmem:[%s10740_s5 + $0x520] ss:$8 sps:$4 sm:$0xff]   ;;  %v8793_v50 = vsub.s32 5, %v8357_v10 }
  0x6d   : > { %3304 = vmatpush1.bf16.msra.mxu0 %v7563_v52  ;;  %v7613_v52 = vld [vmem:[%s10740_s5 + $0x534] ss:$8 sps:$4 sm:$0xff]  }
  0x6e   : > { %3305 = vmatprep.subr.bf16.mxu0 %v7568_v53  ;;  %v7734_v53 = vld [vmem:[%s10740_s5 + $0xa4] ss:$8 sps:$4 sm:$0xff]  }
  0x6f   : > { %3153 = vmatprep.subr.bf16.mxu1 %v7734_v53 }
  0x71   : > { %3306 = vmatpush1.bf16.msra.mxu0 %v7566_v54  ;;  %v7739_v54 = vld [vmem:[%s10740_s5 + $0xa0] ss:$8 sps:$4 sm:$0xff]  }
  0x72   : > { %3307 = vmatprep.subr.bf16.mxu0 %v7571_v55  ;;  %3154 = vmatpush1.bf16.msra.mxu1 %v7739_v54  ;;  %v7611_v55 = vld [vmem:[%s10740_s5 + $0x530] ss:$8 sps:$4 sm:$0xff]  }
  0x73   : > { %v7647_v54 = vld [vmem:[%s10740_s5 + $0x5f0] ss:$8 sps:$4 sm:$0xff]  }
  0x75   : > { %3308 = vmatpush1.bf16.msra.mxu0 %v7569_v56  ;;  %v7616_v56 = vld [vmem:[%s10740_s5 + $0x544] ss:$8 sps:$4 sm:$0xff]  }
  0x76   : > { %3309 = vmatprep.subr.bf16.mxu0 %v7574_v57  ;;  %v7740_v57 = vld [vmem:[%s10740_s5 + $0xb4] ss:$8 sps:$4 sm:$0xff]  }
  0x77   : > { %3155 = vmatprep.subr.bf16.mxu1 %v7740_v57 }
  0x79   : > { %3310 = vmatpush1.bf16.msra.mxu0 %v7572_v58  ;;  %v7745_v58 = vld [vmem:[%s10740_s5 + $0xb0] ss:$8 sps:$4 sm:$0xff]  }
  0x7a   : > { %3311 = vmatprep.subr.bf16.mxu0 %v7577_v59  ;;  %3156 = vmatpush1.bf16.msra.mxu1 %v7745_v58  ;;  %v7614_v59 = vld [vmem:[%s10740_s5 + $0x540] ss:$8 sps:$4 sm:$0xff]   ;;  %v7814_v58 = vld [vmem:[%s10740_s5 + $0x174] ss:$8 sps:$4 sm:$0xff]  }
  0x7d   : > { %3312 = vmatpush1.bf16.msra.mxu0 %v7575_v60  ;;  %v7619_v60 = vld [vmem:[%s10740_s5 + $0x554] ss:$8 sps:$4 sm:$0xff]  }
  0x7e   : > { %3313 = vmatprep.subr.bf16.mxu0 %v7580_v61  ;;  %v7746_v61 = vld [vmem:[%s10740_s5 + $0xc4] ss:$8 sps:$4 sm:$0xff]  }
  0x7f   : > { %3157 = vmatprep.subr.bf16.mxu1 %v7746_v61  ;;  %v7655_v61 = vld [vmem:[%s10740_s5 + $0x614] ss:$8 sps:$4 sm:$0xff]  }
  0x81   : > { %3314 = vmatpush1.bf16.msra.mxu0 %v7578_v62  ;;  %v7751_v62 = vld [vmem:[%s10740_s5 + $0xc0] ss:$8 sps:$4 sm:$0xff]  }
  0x82   : > { %3315 = vmatprep.subr.bf16.mxu0 %v7583_v63  ;;  %3158 = vmatpush1.bf16.msra.mxu1 %v7751_v62  ;;  %v7617_v63 = vld [vmem:[%s10740_s5 + $0x550] ss:$8 sps:$4 sm:$0xff]  }
  0x83   : > { %3159 = vmatprep.subr.bf16.mxu1 %v7752_v1  ;;  %v7653_v1 = vld [vmem:[%s10740_s5 + $0x610] ss:$8 sps:$4 sm:$0xff]  }
  0x85   : > { %3316 = vmatpush1.bf16.msra.mxu0 %v7581_v2  ;;  %v7757_v2 = vld [vmem:[%s10740_s5 + $0xd0] ss:$8 sps:$4 sm:$0xff]  }
  0x86   : > { %3317 = vmatprep.subr.bf16.mxu0 %v7586_v3  ;;  %3160 = vmatpush1.bf16.msra.mxu1 %v7757_v2  ;;  %v7620_v3 = vld [vmem:[%s10740_s5 + $0x560] ss:$8 sps:$4 sm:$0xff]   ;;  %v7658_v2 = vld [vmem:[%s10740_s5 + $0x624] ss:$8 sps:$4 sm:$0xff]  }
  0x87   : > { %3161 = vmatprep.subr.bf16.mxu1 %v7758_v5  ;;  %v7656_v5 = vld [vmem:[%s10740_s5 + $0x620] ss:$8 sps:$4 sm:$0xff]  }
  0x89   : > { %3318 = vmatpush1.bf16.msra.mxu0 %v7584_v6  ;;  %v7763_v6 = vld [vmem:[%s10740_s5 + $0xe0] ss:$8 sps:$4 sm:$0xff]  }
  0x8a   : > { %3319 = vmatprep.subr.bf16.mxu0 %v7589_v8  ;;  %3162 = vmatpush1.bf16.msra.mxu1 %v7763_v6  ;;  %v7623_v8 = vld [vmem:[%s10740_s5 + $0x570] ss:$8 sps:$4 sm:$0xff]   ;;  %v7661_v6 = vld [vmem:[%s10740_s5 + $0x634] ss:$8 sps:$4 sm:$0xff]  }
  0x8b   : > { %3163 = vmatprep.subr.bf16.mxu1 %v7764_v11  ;;  %v7659_v11 = vld [vmem:[%s10740_s5 + $0x630] ss:$8 sps:$4 sm:$0xff]  }
  0x8d   : > { %3320 = vmatpush1.bf16.msra.mxu0 %v7587_v12  ;;  %v7769_v12 = vld [vmem:[%s10740_s5 + $0xf0] ss:$8 sps:$4 sm:$0xff]  }
  0x8e   : > { %3321 = vmatprep.subr.bf16.mxu0 %v7592_v14  ;;  %3164 = vmatpush1.bf16.msra.mxu1 %v7769_v12  ;;  %v578_v14 = vrot.slane %v8380_v16, %v8442_v38  ;;  %v7664_v12 = vld [vmem:[%s10740_s5 + $0x644] ss:$8 sps:$4 sm:$0xff]  }
  0x90   : > { %v697_v20 = vpack.c.bf16 %v578_v14, %v578_v14  ;;  %v7838_v14 = vld [vmem:[%s10740_s5 + $0x1b4] ss:$8 sps:$4 sm:$0xff]  }
  0x91   : > { %3322 = vmatpush1.bf16.msra.mxu0 %v7590_v18  ;;  %v7772_v18 = vld [vmem:[%s10740_s5 + $0x104] ss:$8 sps:$4 sm:$0xff]  }
  0x92   : > { %3323 = vmatprep.subr.bf16.mxu0 %v7595_v19  ;;  %v574_v19 = vrot.slane %v8380_v16, %v8581_v27  ;;  %3174 = vmatprep.subr.bf16.mxu1 %v7772_v18  ;;  %v7778_v16 = vld [vmem:[%s10740_s5 + $0x114] ss:$8 sps:$4 sm:$0xff]  }
  0x93   : > { %3165 = vmatprep.mubr.bf16.mxu1 %v697_v20  ;;  %v7667_v18 = vld [vmem:[%s10740_s5 + $0x654] ss:$8 sps:$4 sm:$0xff]   ;;  %v7842_v20 = vld [vmem:[%s10740_s5 + $0x1c0] ss:$8 sps:$4 sm:$0xff]  }
  0x95   : > { %3324 = vmatpush1.bf16.msra.mxu0 %v7593_v22  ;;  %v696_v22 = vpack.c.bf16 %v574_v19, %v574_v19  ;;  %v7844_v19 = vld [vmem:[%s10740_s5 + $0x1c4] ss:$8 sps:$4 sm:$0xff]  }
  0x96   : > { %3325 = vmatprep.subr.bf16.mxu0 %v7598_v23  ;;  %v7629_v23 = vld [vmem:[%s10740_s5 + $0x590] ss:$8 sps:$4 sm:$0xff]  }
  0x97   : > { %3166 = vmatmul.mubr.bf16.vlgmr.msra.gmra.mrb[0].mxu1 %v696_v22  ;;  %v7670_v22 = vld [vmem:[%s10740_s5 + $0x664] ss:$8 sps:$4 sm:$0xff]  }
  0x98   : > { %3175 = vmatpush1.bf16.msra.mxu1 %v7770_v21  ;;  %v7665_v21 = vld [vmem:[%s10740_s5 + $0x650] ss:$8 sps:$4 sm:$0xff]  }
  0x99   : > { %3326 = vmatpush1.bf16.msra.mxu0 %v7596_v26  ;;  %3176 = vmatprep.subr.bf16.mxu1 %v7778_v16  ;;  %v7632_v26 = vld [vmem:[%s10740_s5 + $0x5a0] ss:$8 sps:$4 sm:$0xff]  }
  0x9a   : > { %3327 = vmatprep.subr.bf16.mxu0 %v7601_v28  ;;  %v7637_v28 = vld [vmem:[%s10740_s5 + $0x5b4] ss:$8 sps:$4 sm:$0xff]   ;;  %v7668_v16 = vld [vmem:[%s10740_s5 + $0x660] ss:$8 sps:$4 sm:$0xff]  }
  0x9c   : > { %3177 = vmatpush1.bf16.msra.mxu1 %v7776_v25  ;;  %v7673_v25 = vld [vmem:[%s10740_s5 + $0x674] ss:$8 sps:$4 sm:$0xff]  }
  0x9d   : > { %3328 = vmatpush1.bf16.msra.mxu0 %v7599_v33  ;;  %3178 = vmatprep.subr.bf16.mxu1 %v7784_v30  ;;  %v7640_v33 = vld [vmem:[%s10740_s5 + $0x5c4] ss:$8 sps:$4 sm:$0xff]   ;;  %v7671_v30 = vld [vmem:[%s10740_s5 + $0x670] ss:$8 sps:$4 sm:$0xff]  }
  0x9e   : > { %3338 = vmatprep.subr.bf16.mxu0 %v7604_v34  ;;  %v7790_v34 = vld [vmem:[%s10740_s5 + $0x134] ss:$8 sps:$4 sm:$0xff]  }
  0xa0   : > { %3330 = vmatmul.mubr.bf16.vlgmr.msra.gmra.mrb[0].mxu0 %v704_v41  ;;  %3179 = vmatpush1.bf16.msra.mxu1 %v7782_v31  ;;  %v7796_v41 = vld [vmem:[%s10740_s5 + $0x144] ss:$8 sps:$4 sm:$0xff]  }
  0xa1   : > { %3339 = vmatpush1.bf16.msra.mxu0 %v7602_v42  ;;  %3370 = vmatprep.mubr.bf16.mxu0 %v707_v44  ;;  %v7794_v42 = vld [vmem:[%s10740_s5 + $0x140] ss:$8 sps:$4 sm:$0xff]   ;;  %v7646_v44 = vld [vmem:[%s10740_s5 + $0x5e4] ss:$8 sps:$4 sm:$0xff]  }
  0xa2   : > { %3340 = vmatprep.subr.bf16.mxu0 %v7607_v43  ;;  %3180 = vmatprep.subr.bf16.mxu1 %v7790_v34  ;;  %v7641_v43 = vld [vmem:[%s10740_s5 + $0x5d0] ss:$8 sps:$4 sm:$0xff]   ;;  %v7678_v31 = vld [vmem:[%s10740_s5 + $0x684] ss:$8 sps:$4 sm:$0xff]  }
  0xa3   : > { %v8917_v34 = vld [vmem:[%s8368_s26] sm:$0xff] }
  0xa4   : > { %3181 = vmatpush1.bf16.msra.mxu1 %v7788_v36  ;;  %v586_v36 = vrot.slane %v8917_v34, %v8587_v29 }
  0xa5   : > { %3341 = vmatpush1.bf16.msra.mxu0 %v7605_v47  ;;  %3182 = vmatprep.subr.bf16.mxu1 %v7796_v41  ;;  %v7644_v47 = vld [vmem:[%s10740_s5 + $0x5e0] ss:$8 sps:$4 sm:$0xff]   ;;  %v7868_v41 = vld [vmem:[%s10740_s5 + $0x204] ss:$8 sps:$4 sm:$0xff]  }
  0xa6   : > { %3342 = vmatprep.subr.bf16.mxu0 %v7610_v48  ;;  %v8787_v48 = vsub.s32 2, %v8357_v10 }
  0xa8   : > { %3183 = vmatpush1.bf16.msra.mxu1 %v7794_v42  ;;  %v614_v53 = vrot.slane %v8445_v39, %v8787_v48  ;;  %v7812_v39 = vld [vmem:[%s10740_s5 + $0x170] ss:$8 sps:$4 sm:$0xff]   ;;  %v582_v42 = vrot.slane %v8917_v34, %v8787_v48 }
  0xa9   : > { %3343 = vmatpush1.bf16.msra.mxu0 %v7608_v51  ;;  %3184 = vmatprep.subr.bf16.mxu1 %v7802_v45  ;;  %v7808_v51 = vld [vmem:[%s10740_s5 + $0x164] ss:$8 sps:$4 sm:$0xff]  }
  0xaa   : > { %3344 = vmatprep.subr.bf16.mxu0 %v7613_v52  ;;  %v7806_v52 = vld [vmem:[%s10740_s5 + $0x160] ss:$8 sps:$4 sm:$0xff]   ;;  %v698_v45 = vpack.c.bf16 %v582_v42, %v582_v42 }
  0xab   : > { %v7748_v42 = vld [vmem:[%s10740_s5 + $0x740] ss:$8 sps:$4 sm:$0xff]  }
  0xac   : > { %3185 = vmatpush1.bf16.msra.mxu1 %v7800_v46  ;;  %v7682_v46 = vld [vmem:[%s10740_s5 + $0x690] ss:$8 sps:$4 sm:$0xff]  }
  0xad   : > { %3345 = vmatpush1.bf16.msra.mxu0 %v7611_v55  ;;  %3186 = vmatprep.subr.bf16.mxu1 %v7808_v51  ;;  %v7652_v55 = vld [vmem:[%s10740_s5 + $0x604] ss:$8 sps:$4 sm:$0xff]   ;;  %v7872_v51 = vld [vmem:[%s10740_s5 + $0x210] ss:$8 sps:$4 sm:$0xff]  }
  0xae   : > { %3346 = vmatprep.subr.bf16.mxu0 %v7616_v56  ;;  %v8810_v56 = vld [vmem:[%s8368_s26 + $0x8] sm:$0xff] }
  0xaf   : > { %v626_v57 = vrot.slane %v8810_v56, %v8793_v50 }
  0xb0   : > { %3187 = vmatpush1.bf16.msra.mxu1 %v7806_v52  ;;  %v7688_v52 = vld [vmem:[%s10740_s5 + $0x6a0] ss:$8 sps:$4 sm:$0xff]  }
  0xb1   : > { %3347 = vmatpush1.bf16.msra.mxu0 %v7614_v59  ;;  %3188 = vmatprep.subr.bf16.mxu1 %v7814_v58  ;;  %v706_v59 = vpack.c.bf16 %v614_v53, %v614_v53  ;;  %v709_v62 = vpack.c.bf16 %v626_v57, %v626_v57  ;;  %v7696_v53 = vld [vmem:[%s10740_s5 + $0x6b4] ss:$8 sps:$4 sm:$0xff]   ;;  %v7694_v57 = vld [vmem:[%s10740_s5 + $0x6b0] ss:$8 sps:$4 sm:$0xff]   ;;  %v7702_v58 = vld [vmem:[%s10740_s5 + $0x6c4] ss:$8 sps:$4 sm:$0xff]  }
  0xb2   : > { %3348 = vmatprep.subr.bf16.mxu0 %v7619_v60  ;;  %v7650_v60 = vld [vmem:[%s10740_s5 + $0x600] ss:$8 sps:$4 sm:$0xff]  }
  0xb4   : > { %3189 = vmatpush1.bf16.msra.mxu1 %v7812_v39  ;;  %v7886_v39 = vld [vmem:[%s10740_s5 + $0x234] ss:$8 sps:$4 sm:$0xff]  }
  0xb5   : > { %3349 = vmatpush1.bf16.msra.mxu0 %v7617_v63  ;;  %v7820_v63 = vld [vmem:[%s10740_s5 + $0x184] ss:$8 sps:$4 sm:$0xff]  }
  0xb6   : > { %3350 = vmatprep.subr.bf16.mxu0 %v7622_v0  ;;  %v7818_v0 = vld [vmem:[%s10740_s5 + $0x180] ss:$8 sps:$4 sm:$0xff]   ;;  %3190 = vmatprep.subr.bf16.mxu1 %v7820_v63 }
  0xb7   : > { %v7890_v63 = vld [vmem:[%s10740_s5 + $0x240] ss:$8 sps:$4 sm:$0xff]  }
  0xb8   : > { %3191 = vmatpush1.bf16.msra.mxu1 %v7818_v0  ;;  %v7706_v0 = vld [vmem:[%s10740_s5 + $0x6d0] ss:$8 sps:$4 sm:$0xff]  }
  0xb9   : > { %3351 = vmatpush1.bf16.msra.mxu0 %v7620_v3  ;;  %v7826_v3 = vld [vmem:[%s10740_s5 + $0x194] ss:$8 sps:$4 sm:$0xff]  }
  0xba   : > { %3352 = vmatprep.subr.bf16.mxu0 %v7625_v4  ;;  %v7824_v4 = vld [vmem:[%s10740_s5 + $0x190] ss:$8 sps:$4 sm:$0xff]   ;;  %3192 = vmatprep.subr.bf16.mxu1 %v7826_v3 }
  0xbb   : > { %v7896_v3 = vld [vmem:[%s10740_s5 + $0x250] ss:$8 sps:$4 sm:$0xff]  }
  0xbc   : > { %3193 = vmatpush1.bf16.msra.mxu1 %v7824_v4  ;;  %v8996_v4 = vsub.s32 4, %v8357_v10 }
  0xbd   : > { %3353 = vmatpush1.bf16.msra.mxu0 %v7623_v8  ;;  %v7832_v8 = vld [vmem:[%s10740_s5 + $0x1a4] ss:$8 sps:$4 sm:$0xff]  }
  0xbe   : > { %3354 = vmatprep.subr.bf16.mxu0 %v7628_v9  ;;  %v7830_v9 = vld [vmem:[%s10740_s5 + $0x1a0] ss:$8 sps:$4 sm:$0xff]   ;;  %3194 = vmatprep.subr.bf16.mxu1 %v7832_v8  ;;  %v7720_v8 = vld [vmem:[%s10740_s5 + $0x6f4] ss:$8 sps:$4 sm:$0xff]  }
  0xc0   : > { %3195 = vmatpush1.bf16.msra.mxu1 %v7830_v9  ;;  %v7902_v9 = vld [vmem:[%s10740_s5 + $0x260] ss:$8 sps:$4 sm:$0xff]  }
  0xc1   : > { %3355 = vmatpush1.bf16.msra.mxu0 %v7626_v15  ;;  %v7836_v15 = vld [vmem:[%s10740_s5 + $0x1b0] ss:$8 sps:$4 sm:$0xff]   ;;  %3196 = vmatprep.subr.bf16.mxu1 %v7838_v14  ;;  %v634_v14 = vrot.slane %v8810_v56, %v8371_v13 }
  0xc2   : > { %3356 = vmatprep.subr.bf16.mxu0 %v7631_v17  ;;  %v7662_v17 = vld [vmem:[%s10740_s5 + $0x640] ss:$8 sps:$4 sm:$0xff]  }
  0xc4   : > { %3197 = vmatpush1.bf16.msra.mxu1 %v7836_v15  ;;  %v7910_v15 = vld [vmem:[%s10740_s5 + $0x274] ss:$8 sps:$4 sm:$0xff]  }
  0xc5   : > { %3357 = vmatpush1.bf16.msra.mxu0 %v7629_v23  ;;  %3198 = vmatprep.subr.bf16.mxu1 %v7844_v19  ;;  %v7850_v23 = vld [vmem:[%s10740_s5 + $0x1d4] ss:$8 sps:$4 sm:$0xff]  }
  0xc6   : > { %3358 = vmatprep.subr.bf16.mxu0 %v7634_v24  ;;  %v7848_v24 = vld [vmem:[%s10740_s5 + $0x1d0] ss:$8 sps:$4 sm:$0xff]  }
  0xc8   : > { %3199 = vmatpush1.bf16.msra.mxu1 %v7842_v20  ;;  %v7724_v20 = vld [vmem:[%s10740_s5 + $0x700] ss:$8 sps:$4 sm:$0xff]  }
  0xc9   : > { %3359 = vmatpush1.bf16.msra.mxu0 %v7632_v26  ;;  %3200 = vmatprep.subr.bf16.mxu1 %v7850_v23  ;;  %v7856_v26 = vld [vmem:[%s10740_s5 + $0x1e4] ss:$8 sps:$4 sm:$0xff]   ;;  %v7732_v23 = vld [vmem:[%s10740_s5 + $0x714] ss:$8 sps:$4 sm:$0xff]  }
  0xca   : > { %3360 = vmatprep.subr.bf16.mxu0 %v7637_v28  ;;  %v7854_v28 = vld [vmem:[%s10740_s5 + $0x1e0] ss:$8 sps:$4 sm:$0xff]  }
  0xcc   : > { %3201 = vmatpush1.bf16.msra.mxu1 %v7848_v24  ;;  %v7914_v24 = vld [vmem:[%s10740_s5 + $0x280] ss:$8 sps:$4 sm:$0xff]  }
  0xcd   : > { %3361 = vmatpush1.bf16.msra.mxu0 %v7635_v32  ;;  %3202 = vmatprep.subr.bf16.mxu1 %v7856_v26  ;;  %v7862_v32 = vld [vmem:[%s10740_s5 + $0x1f4] ss:$8 sps:$4 sm:$0xff]   ;;  %v7738_v26 = vld [vmem:[%s10740_s5 + $0x724] ss:$8 sps:$4 sm:$0xff]  }
  0xce   : > { %3362 = vmatprep.subr.bf16.mxu0 %v7640_v33  ;;  %v7860_v33 = vld [vmem:[%s10740_s5 + $0x1f0] ss:$8 sps:$4 sm:$0xff]  }
  0xd0   : > { %3203 = vmatpush1.bf16.msra.mxu1 %v7854_v28  ;;  %v7920_v28 = vld [vmem:[%s10740_s5 + $0x290] ss:$8 sps:$4 sm:$0xff]  }
  0xd1   : > { %3363 = vmatpush1.bf16.msra.mxu0 %v7638_v37  ;;  %3204 = vmatprep.subr.bf16.mxu1 %v7862_v32  ;;  %v7676_v37 = vld [vmem:[%s10740_s5 + $0x680] ss:$8 sps:$4 sm:$0xff]   ;;  %v7744_v32 = vld [vmem:[%s10740_s5 + $0x734] ss:$8 sps:$4 sm:$0xff]  }
  0xd2   : > { %3364 = vmatprep.subr.bf16.mxu0 %v7643_v40  ;;  %v7684_v40 = vld [vmem:[%s10740_s5 + $0x694] ss:$8 sps:$4 sm:$0xff]  }
  0xd4   : > { %3205 = vmatpush1.bf16.msra.mxu1 %v7860_v33  ;;  %v7926_v33 = vld [vmem:[%s10740_s5 + $0x2a0] ss:$8 sps:$4 sm:$0xff]  }
  0xd5   : > { %3365 = vmatpush1.bf16.msra.mxu0 %v7641_v43  ;;  %v699_v43 = vpack.c.bf16 %v586_v36, %v586_v36  ;;  %3215 = vmatprep.subr.bf16.mxu1 %v7868_v41  ;;  %v7742_v36 = vld [vmem:[%s10740_s5 + $0x730] ss:$8 sps:$4 sm:$0xff]  }
  0xd6   : > { %3366 = vmatprep.subr.bf16.mxu0 %v7646_v44  ;;  %v7866_v44 = vld [vmem:[%s10740_s5 + $0x200] ss:$8 sps:$4 sm:$0xff]   ;;  %v7932_v41 = vld [vmem:[%s10740_s5 + $0x2b0] ss:$8 sps:$4 sm:$0xff]  }
  0xd7   : > { %3206 = vmatprep.mubr.bf16.mxu1 %v699_v43  ;;  %v7940_v43 = vld [vmem:[%s10740_s5 + $0x2c4] ss:$8 sps:$4 sm:$0xff]  }
  0xd8   : > { %3207 = vmatmul.mubr.bf16.vlgmr.msra.gmra.mrb[0].mxu1 %v698_v45  ;;  %v7938_v45 = vld [vmem:[%s10740_s5 + $0x2c0] ss:$8 sps:$4 sm:$0xff]  }
  0xd9   : > { %3367 = vmatpush1.bf16.msra.mxu0 %v7644_v47  ;;  %v7690_v47 = vld [vmem:[%s10740_s5 + $0x6a4] ss:$8 sps:$4 sm:$0xff]   ;;  %3216 = vmatpush1.bf16.msra.mxu1 %v7866_v44  ;;  %v7756_v44 = vld [vmem:[%s10740_s5 + $0x754] ss:$8 sps:$4 sm:$0xff]  }
  0xda   : > { %3368 = vmatprep.subr.bf16.mxu0 %v7649_v49  ;;  %v7874_v49 = vld [vmem:[%s10740_s5 + $0x214] ss:$8 sps:$4 sm:$0xff]  }
  0xdb   : > { %3217 = vmatprep.subr.bf16.mxu1 %v7874_v49  ;;  %v7762_v49 = vld [vmem:[%s10740_s5 + $0x764] ss:$8 sps:$4 sm:$0xff]  }
  0xdd   : > { %3369 = vmatpush1.bf16.msra.mxu0 %v7647_v54  ;;  %v7880_v54 = vld [vmem:[%s10740_s5 + $0x224] ss:$8 sps:$4 sm:$0xff]   ;;  %3218 = vmatpush1.bf16.msra.mxu1 %v7872_v51  ;;  %v7944_v51 = vld [vmem:[%s10740_s5 + $0x2d0] ss:$8 sps:$4 sm:$0xff]  }
  0xde   : > { %3379 = vmatprep.subr.bf16.mxu0 %v7652_v55  ;;  %v7878_v55 = vld [vmem:[%s10740_s5 + $0x220] ss:$8 sps:$4 sm:$0xff]   ;;  %3219 = vmatprep.subr.bf16.mxu1 %v7880_v54  ;;  %v7768_v54 = vld [vmem:[%s10740_s5 + $0x774] ss:$8 sps:$4 sm:$0xff]  }
  0xe0   : > { %3371 = vmatmul.mubr.bf16.vlgmr.msra.gmra.mrb[0].mxu0 %v706_v59  ;;  %v7884_v59 = vld [vmem:[%s10740_s5 + $0x230] ss:$8 sps:$4 sm:$0xff]  }
  0xe1   : > { %3380 = vmatpush1.bf16.msra.mxu0 %v7650_v60  ;;  %3411 = vmatprep.mubr.bf16.mxu0 %v709_v62  ;;  %v7700_v60 = vld [vmem:[%s10740_s5 + $0x6c0] ss:$8 sps:$4 sm:$0xff]   ;;  %v7892_v62 = vld [vmem:[%s10740_s5 + $0x244] ss:$8 sps:$4 sm:$0xff]  }
  0xe2   : > { %3381 = vmatprep.subr.bf16.mxu0 %v7655_v61  ;;  %3220 = vmatpush1.bf16.msra.mxu1 %v7878_v55  ;;  %v7708_v61 = vld [vmem:[%s10740_s5 + $0x6d4] ss:$8 sps:$4 sm:$0xff]   ;;  %v7950_v55 = vld [vmem:[%s10740_s5 + $0x2e0] ss:$8 sps:$4 sm:$0xff]  }
  0xe3   : > { %3221 = vmatprep.subr.bf16.mxu1 %v7886_v39  ;;  %v7775_v39 = vld [vmem:[%s10740_s5 + $0x784] ss:$8 sps:$4 sm:$0xff]  }
  0xe5   : > { %3382 = vmatpush1.bf16.msra.mxu0 %v7653_v1  ;;  %v7714_v1 = vld [vmem:[%s10740_s5 + $0x6e4] ss:$8 sps:$4 sm:$0xff]  }
  0xe6   : > { %3383 = vmatprep.subr.bf16.mxu0 %v7658_v2  ;;  %3222 = vmatpush1.bf16.msra.mxu1 %v7884_v59  ;;  %v7898_v2 = vld [vmem:[%s10740_s5 + $0x254] ss:$8 sps:$4 sm:$0xff]   ;;  %v7956_v59 = vld [vmem:[%s10740_s5 + $0x2f0] ss:$8 sps:$4 sm:$0xff]  }
  0xe7   : > { %3223 = vmatprep.subr.bf16.mxu1 %v7892_v62  ;;  %v7773_v62 = vld [vmem:[%s10740_s5 + $0x780] ss:$8 sps:$4 sm:$0xff]  }
  0xe9   : > { %3384 = vmatpush1.bf16.msra.mxu0 %v7656_v5  ;;  %v7712_v5 = vld [vmem:[%s10740_s5 + $0x6e0] ss:$8 sps:$4 sm:$0xff]  }
  0xea   : > { %3385 = vmatprep.subr.bf16.mxu0 %v7661_v6  ;;  %3224 = vmatpush1.bf16.msra.mxu1 %v7890_v63  ;;  %v7904_v6 = vld [vmem:[%s10740_s5 + $0x264] ss:$8 sps:$4 sm:$0xff]  }
  0xeb   : > { %3225 = vmatprep.subr.bf16.mxu1 %v7898_v2  ;;  %v7779_v2 = vld [vmem:[%s10740_s5 + $0x790] ss:$8 sps:$4 sm:$0xff]  }
  0xed   : > { %3386 = vmatpush1.bf16.msra.mxu0 %v7659_v11  ;;  %v622_v11 = vrot.slane %v8810_v56, %v8996_v4 }
  0xee   : > { %3387 = vmatprep.subr.bf16.mxu0 %v7664_v12  ;;  %3226 = vmatpush1.bf16.msra.mxu1 %v7896_v3  ;;  %v7718_v12 = vld [vmem:[%s10740_s5 + $0x6f0] ss:$8 sps:$4 sm:$0xff]   ;;  %v7785_v3 = vld [vmem:[%s10740_s5 + $0x7a0] ss:$8 sps:$4 sm:$0xff]  }
  0xef   : > { %3227 = vmatprep.subr.bf16.mxu1 %v7904_v6  ;;  %v708_v19 = vpack.c.bf16 %v622_v11, %v622_v11  ;;  %v7791_v6 = vld [vmem:[%s10740_s5 + $0x7b0] ss:$8 sps:$4 sm:$0xff]   ;;  %v7805_v11 = vld [vmem:[%s10740_s5 + $0x7d4] ss:$8 sps:$4 sm:$0xff]  }
  0xf1   : > { %3388 = vmatpush1.bf16.msra.mxu0 %v7662_v17  ;;  %v7726_v17 = vld [vmem:[%s10740_s5 + $0x704] ss:$8 sps:$4 sm:$0xff]  }
  0xf2   : > { %3389 = vmatprep.subr.bf16.mxu0 %v7667_v18  ;;  %3228 = vmatpush1.bf16.msra.mxu1 %v7902_v9  ;;  %v7908_v18 = vld [vmem:[%s10740_s5 + $0x270] ss:$8 sps:$4 sm:$0xff]   ;;  %v7797_v9 = vld [vmem:[%s10740_s5 + $0x7c0] ss:$8 sps:$4 sm:$0xff]  }
  0xf3   : > { %3229 = vmatprep.subr.bf16.mxu1 %v7910_v15  ;;  %v7809_v15 = vld [vmem:[%s10740_s5 + $0x7e0] ss:$8 sps:$4 sm:$0xff]  }
  0xf5   : > { %3390 = vmatpush1.bf16.msra.mxu0 %v7665_v21  ;;  %v711_v21 = vpack.c.bf16 %v634_v14, %v634_v14  ;;  %v7811_v14 = vld [vmem:[%s10740_s5 + $0x7e4] ss:$8 sps:$4 sm:$0xff]  }
  0xf6   : > { %3391 = vmatprep.subr.bf16.mxu0 %v7670_v22  ;;  %v7916_v22 = vld [vmem:[%s10740_s5 + $0x284] ss:$8 sps:$4 sm:$0xff]   ;;  %3230 = vmatpush1.bf16.msra.mxu1 %v7908_v18  ;;  %v9169_v18 = vld [vmem:[%s8368_s26 + $0x10] sm:$0xff] }
  0xf7   : > { %3231 = vmatprep.subr.bf16.mxu1 %v7916_v22  ;;  %v7823_v22 = vld [vmem:[%s10740_s5 + $0x804] ss:$8 sps:$4 sm:$0xff]  }
  0xf9   : > { %3392 = vmatpush1.bf16.msra.mxu0 %v7668_v16  ;;  %v7730_v16 = vld [vmem:[%s10740_s5 + $0x710] ss:$8 sps:$4 sm:$0xff]  }
  0xfa   : > { %3393 = vmatprep.subr.bf16.mxu0 %v7673_v25  ;;  %v7922_v25 = vld [vmem:[%s10740_s5 + $0x294] ss:$8 sps:$4 sm:$0xff]   ;;  %3232 = vmatpush1.bf16.msra.mxu1 %v7914_v24  ;;  %v7821_v24 = vld [vmem:[%s10740_s5 + $0x800] ss:$8 sps:$4 sm:$0xff]  }
  0xfb   : > { %3233 = vmatprep.subr.bf16.mxu1 %v7922_v25  ;;  %v7827_v25 = vld [vmem:[%s10740_s5 + $0x810] ss:$8 sps:$4 sm:$0xff]  }
  0xfd   : > { %3394 = vmatpush1.bf16.msra.mxu0 %v7671_v30  ;;  %v7736_v30 = vld [vmem:[%s10740_s5 + $0x720] ss:$8 sps:$4 sm:$0xff]  }
  0xfe   : > { %3395 = vmatprep.subr.bf16.mxu0 %v7678_v31  ;;  %v7928_v31 = vld [vmem:[%s10740_s5 + $0x2a4] ss:$8 sps:$4 sm:$0xff]   ;;  %3234 = vmatpush1.bf16.msra.mxu1 %v7920_v28  ;;  %v7833_v28 = vld [vmem:[%s10740_s5 + $0x820] ss:$8 sps:$4 sm:$0xff]  }
  0xff   : > { %3235 = vmatprep.subr.bf16.mxu1 %v7928_v31  ;;  %v7839_v31 = vld [vmem:[%s10740_s5 + $0x830] ss:$8 sps:$4 sm:$0xff]  }
 0x101   : > { %3396 = vmatpush1.bf16.msra.mxu0 %v7676_v37  ;;  %v7934_v37 = vld [vmem:[%s10740_s5 + $0x2b4] ss:$8 sps:$4 sm:$0xff]  }
 0x102   : > { %3397 = vmatprep.subr.bf16.mxu0 %v7684_v40  ;;  %v7750_v40 = vld [vmem:[%s10740_s5 + $0x744] ss:$8 sps:$4 sm:$0xff]   ;;  %3236 = vmatpush1.bf16.msra.mxu1 %v7926_v33  ;;  %v7845_v33 = vld [vmem:[%s10740_s5 + $0x840] ss:$8 sps:$4 sm:$0xff]  }
 0x103   : > { %3237 = vmatprep.subr.bf16.mxu1 %v7934_v37  ;;  %v7851_v37 = vld [vmem:[%s10740_s5 + $0x850] ss:$8 sps:$4 sm:$0xff]  }
 0x105   : > { %3398 = vmatpush1.bf16.msra.mxu0 %v7682_v46  ;;  %v7754_v46 = vld [vmem:[%s10740_s5 + $0x750] ss:$8 sps:$4 sm:$0xff]  }
 0x106   : > { %3399 = vmatprep.subr.bf16.mxu0 %v7690_v47  ;;  %3238 = vmatpush1.bf16.msra.mxu1 %v7932_v41  ;;  %v7946_v47 = vld [vmem:[%s10740_s5 + $0x2d4] ss:$8 sps:$4 sm:$0xff]   ;;  %v7857_v41 = vld [vmem:[%s10740_s5 + $0x860] ss:$8 sps:$4 sm:$0xff]  }
 0x107   : > { %3239 = vmatprep.subr.bf16.mxu1 %v7940_v43  ;;  %v7863_v43 = vld [vmem:[%s10740_s5 + $0x870] ss:$8 sps:$4 sm:$0xff]  }
 0x109   : > { %3400 = vmatpush1.bf16.msra.mxu0 %v7688_v52  ;;  %v7760_v52 = vld [vmem:[%s10740_s5 + $0x760] ss:$8 sps:$4 sm:$0xff]  }
 0x10a   : > { %3401 = vmatprep.subr.bf16.mxu0 %v7696_v53  ;;  %3240 = vmatpush1.bf16.msra.mxu1 %v7938_v45  ;;  %v7952_v53 = vld [vmem:[%s10740_s5 + $0x2e4] ss:$8 sps:$4 sm:$0xff]   ;;  %v7869_v45 = vld [vmem:[%s10740_s5 + $0x880] ss:$8 sps:$4 sm:$0xff]  }
 0x10b   : > { %3241 = vmatprep.subr.bf16.mxu1 %v7946_v47  ;;  %v7875_v47 = vld [vmem:[%s10740_s5 + $0x890] ss:$8 sps:$4 sm:$0xff]  }
 0x10d   : > { %3402 = vmatpush1.bf16.msra.mxu0 %v7694_v57  ;;  %v7766_v57 = vld [vmem:[%s10740_s5 + $0x770] ss:$8 sps:$4 sm:$0xff]  }
 0x10e   : > { %3403 = vmatprep.subr.bf16.mxu0 %v7702_v58  ;;  %3242 = vmatpush1.bf16.msra.mxu1 %v7944_v51  ;;  %v7958_v58 = vld [vmem:[%s10740_s5 + $0x2f4] ss:$8 sps:$4 sm:$0xff]   ;;  %v7881_v51 = vld [vmem:[%s10740_s5 + $0x8a0] ss:$8 sps:$4 sm:$0xff]  }
 0x10f   : > { %3243 = vmatprep.subr.bf16.mxu1 %v7952_v53  ;;  %v7887_v53 = vld [vmem:[%s10740_s5 + $0x8b0] ss:$8 sps:$4 sm:$0xff]  }
 0x111   : > { %3404 = vmatpush1.bf16.msra.mxu0 %v7700_v60  ;;  %v594_v60 = vrot.slane %v8917_v34, %v8793_v50 }
 0x112   : > { %3405 = vmatprep.subr.bf16.mxu0 %v7708_v61  ;;  %3244 = vmatpush1.bf16.msra.mxu1 %v7950_v55  ;;  %v590_v61 = vrot.slane %v8917_v34, %v8996_v4  ;;  %v7787_v34 = vld [vmem:[%s10740_s5 + $0x7a4] ss:$8 sps:$4 sm:$0xff]   ;;  %v7893_v55 = vld [vmem:[%s10740_s5 + $0x8c0] ss:$8 sps:$4 sm:$0xff]  }
 0x113   : > { %3245 = vmatprep.subr.bf16.mxu1 %v7958_v58  ;;  %v701_v63 = vpack.c.bf16 %v594_v60, %v594_v60  ;;  %v7899_v58 = vld [vmem:[%s10740_s5 + $0x8d0] ss:$8 sps:$4 sm:$0xff]   ;;  %v7913_v60 = vld [vmem:[%s10740_s5 + $0x8f4] ss:$8 sps:$4 sm:$0xff]  }
 0x115   : > { %3406 = vmatpush1.bf16.msra.mxu0 %v7706_v0  ;;  %v7781_v0 = vld [vmem:[%s10740_s5 + $0x794] ss:$8 sps:$4 sm:$0xff]   ;;  %3247 = vmatprep.mubr.bf16.mxu1 %v701_v63  ;;  %v650_v63 = vrot.slane %v9169_v18, %v8587_v29  ;;  %v7923_v29 = vld [vmem:[%s10740_s5 + $0x910] ss:$8 sps:$4 sm:$0xff]  }
 0x116   : > { %3407 = vmatprep.subr.bf16.mxu0 %v7714_v1  ;;  %3246 = vmatpush1.bf16.msra.mxu1 %v7956_v59  ;;  %v700_v1 = vpack.c.bf16 %v590_v61, %v590_v61  ;;  %v7905_v59 = vld [vmem:[%s10740_s5 + $0x8e0] ss:$8 sps:$4 sm:$0xff]   ;;  %v638_v61 = vrot.slane %v9169_v18, %v8581_v27 }
 0x119   : > { %3408 = vmatpush1.bf16.msra.mxu0 %v7712_v5  ;;  %3248 = vmatmul.mubr.bf16.vlgmr.msra.gmra.mrb[0].mxu1 %v700_v1  ;;  %v7793_v5 = vld [vmem:[%s10740_s5 + $0x7b4] ss:$8 sps:$4 sm:$0xff]   ;;  %v712_v1 = vpack.c.bf16 %v638_v61, %v638_v61  ;;  %v7988_v61 = vld [vmem:[%s10740_s5 + $0xa04] ss:$8 sps:$4 sm:$0xff]  }
 0x11a   : > { %3409 = vmatprep.subr.bf16.mxu0 %v7720_v8  ;;  %v7799_v8 = vld [vmem:[%s10740_s5 + $0x7c4] ss:$8 sps:$4 sm:$0xff]  }
 0x11d   : > { %3410 = vmatpush1.bf16.msra.mxu0 %v7718_v12  ;;  %v7803_v12 = vld [vmem:[%s10740_s5 + $0x7d0] ss:$8 sps:$4 sm:$0xff]  }
 0x11e   : > { %3420 = vmatprep.subr.bf16.mxu0 %v7726_v17  ;;  %v7817_v17 = vld [vmem:[%s10740_s5 + $0x7f4] ss:$8 sps:$4 sm:$0xff]  }
 0x120   : > { %3412 = vmatmul.mubr.bf16.vlgmr.msra.gmra.mrb[0].mxu0 %v708_v19  ;;  %v630_v19 = vrot.slane %v8810_v56, %v8433_v35 }
 0x121   : > { %3421 = vmatpush1.bf16.msra.mxu0 %v7724_v20  ;;  %3452 = vmatprep.mubr.bf16.mxu0 %v711_v21  ;;  %v7815_v20 = vld [vmem:[%s10740_s5 + $0x7f0] ss:$8 sps:$4 sm:$0xff]   ;;  %v642_v21 = vrot.slane %v9169_v18, %v8442_v38 }
 0x122   : > { %3422 = vmatprep.subr.bf16.mxu0 %v7732_v23  ;;  %v710_v23 = vpack.c.bf16 %v630_v19, %v630_v19  ;;  %v7953_v19 = vld [vmem:[%s10740_s5 + $0x960] ss:$8 sps:$4 sm:$0xff]  }
 0x123   : > { %v713_v56 = vpack.c.bf16 %v642_v21, %v642_v21  ;;  %v7959_v21 = vld [vmem:[%s10740_s5 + $0x970] ss:$8 sps:$4 sm:$0xff]  }
 0x125   : > { %3423 = vmatpush1.bf16.msra.mxu0 %v7730_v16  ;;  %v7829_v16 = vld [vmem:[%s10740_s5 + $0x814] ss:$8 sps:$4 sm:$0xff]  }
 0x126   : > { %3424 = vmatprep.subr.bf16.mxu0 %v7738_v26  ;;  %v7835_v26 = vld [vmem:[%s10740_s5 + $0x824] ss:$8 sps:$4 sm:$0xff]  }
 0x129   : > { %3425 = vmatpush1.bf16.msra.mxu0 %v7736_v30  ;;  %v7841_v30 = vld [vmem:[%s10740_s5 + $0x834] ss:$8 sps:$4 sm:$0xff]  }
 0x12a   : > { %3426 = vmatprep.subr.bf16.mxu0 %v7744_v32  ;;  %v7847_v32 = vld [vmem:[%s10740_s5 + $0x844] ss:$8 sps:$4 sm:$0xff]  }
 0x12d   : > { %3427 = vmatpush1.bf16.msra.mxu0 %v7742_v36  ;;  %v7853_v36 = vld [vmem:[%s10740_s5 + $0x854] ss:$8 sps:$4 sm:$0xff]  }
 0x12e   : > { %3428 = vmatprep.subr.bf16.mxu0 %v7750_v40  ;;  %v7859_v40 = vld [vmem:[%s10740_s5 + $0x864] ss:$8 sps:$4 sm:$0xff]  }
 0x131   : > { %3429 = vmatpush1.bf16.msra.mxu0 %v7748_v42  ;;  %v7865_v42 = vld [vmem:[%s10740_s5 + $0x874] ss:$8 sps:$4 sm:$0xff]  }
 0x132   : > { %3430 = vmatprep.subr.bf16.mxu0 %v7756_v44  ;;  %v7871_v44 = vld [vmem:[%s10740_s5 + $0x884] ss:$8 sps:$4 sm:$0xff]  }
 0x135   : > { %3431 = vmatpush1.bf16.msra.mxu0 %v7754_v46  ;;  %v7877_v46 = vld [vmem:[%s10740_s5 + $0x894] ss:$8 sps:$4 sm:$0xff]  }
 0x136   : > { %3432 = vmatprep.subr.bf16.mxu0 %v7762_v49  ;;  %v7883_v49 = vld [vmem:[%s10740_s5 + $0x8a4] ss:$8 sps:$4 sm:$0xff]  }
 0x139   : > { %3433 = vmatpush1.bf16.msra.mxu0 %v7760_v52  ;;  %v7889_v52 = vld [vmem:[%s10740_s5 + $0x8b4] ss:$8 sps:$4 sm:$0xff]  }
 0x13a   : > { %3434 = vmatprep.subr.bf16.mxu0 %v7768_v54  ;;  %v7895_v54 = vld [vmem:[%s10740_s5 + $0x8c4] ss:$8 sps:$4 sm:$0xff]  }
 0x13d   : > { %3435 = vmatpush1.bf16.msra.mxu0 %v7766_v57  ;;  %v7901_v57 = vld [vmem:[%s10740_s5 + $0x8d4] ss:$8 sps:$4 sm:$0xff]  }
 0x13e   : > { %3436 = vmatprep.subr.bf16.mxu0 %v7775_v39  ;;  %v7907_v39 = vld [vmem:[%s10740_s5 + $0x8e4] ss:$8 sps:$4 sm:$0xff]  }
 0x141   : > { %3437 = vmatpush1.bf16.msra.mxu0 %v7773_v62  ;;  %v7911_v62 = vld [vmem:[%s10740_s5 + $0x8f0] ss:$8 sps:$4 sm:$0xff]  }
 0x142   : > { %3438 = vmatprep.subr.bf16.mxu0 %v7781_v0  ;;  %v7919_v0 = vld [vmem:[%s10740_s5 + $0x904] ss:$8 sps:$4 sm:$0xff]  }
 0x145   : > { %3439 = vmatpush1.bf16.msra.mxu0 %v7779_v2  ;;  %v7917_v2 = vld [vmem:[%s10740_s5 + $0x900] ss:$8 sps:$4 sm:$0xff]  }
 0x146   : > { %3440 = vmatprep.subr.bf16.mxu0 %v7787_v34  ;;  %v715_v34 = vpack.c.bf16 %v650_v63, %v650_v63  ;;  %v3670_v63 = vld [vmem:[%s548_s16] sm:$0xf] }
 0x149   : > { %3441 = vmatpush1.bf16.msra.mxu0 %v7785_v3  ;;  %v7925_v3 = vld [vmem:[%s10740_s5 + $0x914] ss:$8 sps:$4 sm:$0xff]  }
 0x14a   : > { %3442 = vmatprep.subr.bf16.mxu0 %v7793_v5  ;;  %v7931_v5 = vld [vmem:[%s10740_s5 + $0x924] ss:$8 sps:$4 sm:$0xff]  }
 0x14d   : > { %3443 = vmatpush1.bf16.msra.mxu0 %v7791_v6  ;;  %v7929_v6 = vld [vmem:[%s10740_s5 + $0x920] ss:$8 sps:$4 sm:$0xff]  }
 0x14e   : > { %3444 = vmatprep.subr.bf16.mxu0 %v7799_v8  ;;  %v7937_v8 = vld [vmem:[%s10740_s5 + $0x934] ss:$8 sps:$4 sm:$0xff]  }
 0x151   : > { %3445 = vmatpush1.bf16.msra.mxu0 %v7797_v9  ;;  %v7935_v9 = vld [vmem:[%s10740_s5 + $0x930] ss:$8 sps:$4 sm:$0xff]  }
 0x152   : > { %3446 = vmatprep.subr.bf16.mxu0 %v7805_v11  ;;  %v7943_v11 = vld [vmem:[%s10740_s5 + $0x944] ss:$8 sps:$4 sm:$0xff]  }
 0x155   : > { %3447 = vmatpush1.bf16.msra.mxu0 %v7803_v12  ;;  %v7941_v12 = vld [vmem:[%s10740_s5 + $0x940] ss:$8 sps:$4 sm:$0xff]  }
 0x156   : > { %3448 = vmatprep.subr.bf16.mxu0 %v7811_v14  ;;  %v7949_v14 = vld [vmem:[%s10740_s5 + $0x954] ss:$8 sps:$4 sm:$0xff]  }
 0x159   : > { %3449 = vmatpush1.bf16.msra.mxu0 %v7809_v15  ;;  %v7947_v15 = vld [vmem:[%s10740_s5 + $0x950] ss:$8 sps:$4 sm:$0xff]  }
 0x15a   : > { %3450 = vmatprep.subr.bf16.mxu0 %v7817_v17  ;;  %v7955_v17 = vld [vmem:[%s10740_s5 + $0x964] ss:$8 sps:$4 sm:$0xff]  }
 0x15d   : > { %3451 = vmatpush1.bf16.msra.mxu0 %v7815_v20  ;;  %v7961_v20 = vld [vmem:[%s10740_s5 + $0x974] ss:$8 sps:$4 sm:$0xff]  }
 0x15e   : > { %3461 = vmatprep.subr.bf16.mxu0 %v7823_v22  ;;  %v7964_v22 = vld [vmem:[%s10740_s5 + $0x984] ss:$8 sps:$4 sm:$0xff]  }
 0x160   : > { %3453 = vmatmul.mubr.bf16.vlgmr.msra.gmra.mrb[0].mxu0 %v710_v23  ;;  %v7962_v23 = vld [vmem:[%s10740_s5 + $0x980] ss:$8 sps:$4 sm:$0xff]  }
 0x161   : > { %3462 = vmatpush1.bf16.msra.mxu0 %v7821_v24  ;;  %3493 = vmatprep.mubr.bf16.mxu0 %v713_v56  ;;  %v8058_v24 = vld [vmem:[%s10740_s5 + $0xc00] ss:$8 sps:$4 sm:$0xff]   ;;  %v8060_v56 = vld [vmem:[%s10740_s5 + $0xc04] ss:$8 sps:$4 sm:$0xff]  }
 0x162   : > { %3463 = vmatprep.subr.bf16.mxu0 %v7829_v16  ;;  %v7967_v16 = vld [vmem:[%s10740_s5 + $0x994] ss:$8 sps:$4 sm:$0xff]   ;;  %3625 = vmatprep.subr.bf16.mxu1 %v8060_v56  ;;  %v8000_v56 = vld [vmem:[%s10740_s5 + $0xa44] ss:$8 sps:$4 sm:$0xff]  }
 0x163   : > { %3626 = vmatpush1.bf16.msra.mxu1 %v8058_v24  ;;  %v7995_v24 = vld [vmem:[%s10740_s5 + $0xa30] ss:$8 sps:$4 sm:$0xff]  }
 0x165   : > { %3464 = vmatpush1.bf16.msra.mxu0 %v7827_v25  ;;  %v7965_v25 = vld [vmem:[%s10740_s5 + $0x990] ss:$8 sps:$4 sm:$0xff]  }
 0x166   : > { %3465 = vmatprep.subr.bf16.mxu0 %v7835_v26  ;;  %v8064_v26 = vld [vmem:[%s10740_s5 + $0xc10] ss:$8 sps:$4 sm:$0xff]  }
 0x169   : > { %3466 = vmatpush1.bf16.msra.mxu0 %v7833_v28  ;;  %v8066_v28 = vld [vmem:[%s10740_s5 + $0xc14] ss:$8 sps:$4 sm:$0xff]  }
 0x16a   : > { %3467 = vmatprep.subr.bf16.mxu0 %v7841_v30  ;;  %v7970_v30 = vld [vmem:[%s10740_s5 + $0x9a4] ss:$8 sps:$4 sm:$0xff]   ;;  %3627 = vmatprep.subr.bf16.mxu1 %v8066_v28 }
 0x16b   : > { %3628 = vmatpush1.bf16.msra.mxu1 %v8064_v26  ;;  %v8001_v26 = vld [vmem:[%s10740_s5 + $0xa50] ss:$8 sps:$4 sm:$0xff]   ;;  %v8006_v28 = vld [vmem:[%s10740_s5 + $0xa64] ss:$8 sps:$4 sm:$0xff]  }
 0x16d   : > { %3468 = vmatpush1.bf16.msra.mxu0 %v7839_v31  ;;  %v7968_v31 = vld [vmem:[%s10740_s5 + $0x9a0] ss:$8 sps:$4 sm:$0xff]  }
 0x16e   : > { %3469 = vmatprep.subr.bf16.mxu0 %v7847_v32  ;;  %v8070_v32 = vld [vmem:[%s10740_s5 + $0xc20] ss:$8 sps:$4 sm:$0xff]  }
 0x171   : > { %3470 = vmatpush1.bf16.msra.mxu0 %v7845_v33  ;;  %v8072_v33 = vld [vmem:[%s10740_s5 + $0xc24] ss:$8 sps:$4 sm:$0xff]  }
 0x172   : > { %3471 = vmatprep.subr.bf16.mxu0 %v7853_v36  ;;  %v7973_v36 = vld [vmem:[%s10740_s5 + $0x9b4] ss:$8 sps:$4 sm:$0xff]   ;;  %3629 = vmatprep.subr.bf16.mxu1 %v8072_v33  ;;  %v8012_v33 = vld [vmem:[%s10740_s5 + $0xa84] ss:$8 sps:$4 sm:$0xff]  }
 0x173   : > { %3630 = vmatpush1.bf16.msra.mxu1 %v8070_v32  ;;  %v8007_v32 = vld [vmem:[%s10740_s5 + $0xa70] ss:$8 sps:$4 sm:$0xff]  }
 0x175   : > { %3472 = vmatpush1.bf16.msra.mxu0 %v7851_v37  ;;  %v7971_v37 = vld [vmem:[%s10740_s5 + $0x9b0] ss:$8 sps:$4 sm:$0xff]  }
 0x176   : > { %3473 = vmatprep.subr.bf16.mxu0 %v7859_v40  ;;  %v8076_v40 = vld [vmem:[%s10740_s5 + $0xc30] ss:$8 sps:$4 sm:$0xff]  }
 0x179   : > { %3474 = vmatpush1.bf16.msra.mxu0 %v7857_v41  ;;  %v8078_v41 = vld [vmem:[%s10740_s5 + $0xc34] ss:$8 sps:$4 sm:$0xff]  }
 0x17a   : > { %3475 = vmatprep.subr.bf16.mxu0 %v7865_v42  ;;  %v7976_v42 = vld [vmem:[%s10740_s5 + $0x9c4] ss:$8 sps:$4 sm:$0xff]   ;;  %3631 = vmatprep.subr.bf16.mxu1 %v8078_v41 }
 0x17b   : > { %3632 = vmatpush1.bf16.msra.mxu1 %v8076_v40  ;;  %v8013_v40 = vld [vmem:[%s10740_s5 + $0xa90] ss:$8 sps:$4 sm:$0xff]   ;;  %v8018_v41 = vld [vmem:[%s10740_s5 + $0xaa4] ss:$8 sps:$4 sm:$0xff]  }
 0x17d   : > { %3476 = vmatpush1.bf16.msra.mxu0 %v7863_v43  ;;  %v7974_v43 = vld [vmem:[%s10740_s5 + $0x9c0] ss:$8 sps:$4 sm:$0xff]  }
 0x17e   : > { %3477 = vmatprep.subr.bf16.mxu0 %v7871_v44  ;;  %v8082_v44 = vld [vmem:[%s10740_s5 + $0xc40] ss:$8 sps:$4 sm:$0xff]  }
 0x181   : > { %3478 = vmatpush1.bf16.msra.mxu0 %v7869_v45  ;;  %v8084_v45 = vld [vmem:[%s10740_s5 + $0xc44] ss:$8 sps:$4 sm:$0xff]  }
 0x182   : > { %3479 = vmatprep.subr.bf16.mxu0 %v7877_v46  ;;  %v7979_v46 = vld [vmem:[%s10740_s5 + $0x9d4] ss:$8 sps:$4 sm:$0xff]   ;;  %3633 = vmatprep.subr.bf16.mxu1 %v8084_v45  ;;  %v8024_v45 = vld [vmem:[%s10740_s5 + $0xac4] ss:$8 sps:$4 sm:$0xff]  }
 0x183   : > { %3634 = vmatpush1.bf16.msra.mxu1 %v8082_v44  ;;  %v8019_v44 = vld [vmem:[%s10740_s5 + $0xab0] ss:$8 sps:$4 sm:$0xff]  }
 0x185   : > { %3480 = vmatpush1.bf16.msra.mxu0 %v7875_v47  ;;  %v7977_v47 = vld [vmem:[%s10740_s5 + $0x9d0] ss:$8 sps:$4 sm:$0xff]  }
 0x186   : > { %3481 = vmatprep.subr.bf16.mxu0 %v7883_v49  ;;  %v8088_v49 = vld [vmem:[%s10740_s5 + $0xc50] ss:$8 sps:$4 sm:$0xff]  }
 0x189   : > { %3482 = vmatpush1.bf16.msra.mxu0 %v7881_v51  ;;  %v8090_v51 = vld [vmem:[%s10740_s5 + $0xc54] ss:$8 sps:$4 sm:$0xff]  }
 0x18a   : > { %3483 = vmatprep.subr.bf16.mxu0 %v7889_v52  ;;  %v7982_v52 = vld [vmem:[%s10740_s5 + $0x9e4] ss:$8 sps:$4 sm:$0xff]   ;;  %3635 = vmatprep.subr.bf16.mxu1 %v8090_v51 }
 0x18b   : > { %3636 = vmatpush1.bf16.msra.mxu1 %v8088_v49  ;;  %v8025_v49 = vld [vmem:[%s10740_s5 + $0xad0] ss:$8 sps:$4 sm:$0xff]   ;;  %v8030_v51 = vld [vmem:[%s10740_s5 + $0xae4] ss:$8 sps:$4 sm:$0xff]  }
 0x18d   : > { %3484 = vmatpush1.bf16.msra.mxu0 %v7887_v53  ;;  %v7980_v53 = vld [vmem:[%s10740_s5 + $0x9e0] ss:$8 sps:$4 sm:$0xff]  }
 0x18e   : > { %3485 = vmatprep.subr.bf16.mxu0 %v7895_v54  ;;  %v8094_v54 = vld [vmem:[%s10740_s5 + $0xc60] ss:$8 sps:$4 sm:$0xff]  }
 0x191   : > { %3486 = vmatpush1.bf16.msra.mxu0 %v7893_v55  ;;  %v8096_v55 = vld [vmem:[%s10740_s5 + $0xc64] ss:$8 sps:$4 sm:$0xff]  }
 0x192   : > { %3487 = vmatprep.subr.bf16.mxu0 %v7901_v57  ;;  %v7985_v57 = vld [vmem:[%s10740_s5 + $0x9f4] ss:$8 sps:$4 sm:$0xff]   ;;  %3637 = vmatprep.subr.bf16.mxu1 %v8096_v55 }
 0x193   : > { %3638 = vmatpush1.bf16.msra.mxu1 %v8094_v54  ;;  %v8033_v55 = vld [vmem:[%s10740_s5 + $0xaf4] ss:$8 sps:$4 sm:$0xff]  }
 0x195   : > { %3488 = vmatpush1.bf16.msra.mxu0 %v7899_v58  ;;  %v646_v58 = vrot.slane %v9169_v18, %v8787_v48  ;;  %v658_v48 = vrot.slane %v9169_v18, %v8793_v50  ;;  %v6671_v50 = vld [vmem:[%s8368_s26 + $0x18] ss:$0 sm:$0xff] }
 0x196   : > { %3489 = vmatprep.subr.bf16.mxu0 %v7907_v39  ;;  %v7983_v39 = vld [vmem:[%s10740_s5 + $0x9f0] ss:$8 sps:$4 sm:$0xff]  }
 0x199   : > { %3490 = vmatpush1.bf16.msra.mxu0 %v7905_v59  ;;  %v8100_v59 = vld [vmem:[%s10740_s5 + $0xc70] ss:$8 sps:$4 sm:$0xff]  }
 0x19a   : > { %3491 = vmatprep.subr.bf16.mxu0 %v7913_v60  ;;  %v8102_v60 = vld [vmem:[%s10740_s5 + $0xc74] ss:$8 sps:$4 sm:$0xff]  }
 0x19b   : > { %3639 = vmatprep.subr.bf16.mxu1 %v8102_v60  ;;  %v8036_v60 = vld [vmem:[%s10740_s5 + $0xb04] ss:$8 sps:$4 sm:$0xff]  }
 0x19c   : > { %3640 = vmatpush1.bf16.msra.mxu1 %v8100_v59  ;;  %v666_v59 = vrot.slane %v9169_v18, %v8371_v13  ;;  %v8037_v13 = vld [vmem:[%s10740_s5 + $0xb10] ss:$8 sps:$4 sm:$0xff]  }
 0x19d   : > { %3492 = vmatpush1.bf16.msra.mxu0 %v7911_v62  ;;  %v3672_v62 = vstv %s9402_s28  ;;  %s558_s28 = scalar_lea.vmem %s10739_s4, %s7259_s19 }
 0x19e   : > { %3502 = vmatprep.subr.bf16.mxu0 %v7919_v0  ;;  %v3671_v0 = vld [vmem:[%s9427_s22] sm:$0xf] }
 0x1a0   : > { %3494 = vmatmul.mubr.bf16.vlgmr.msra.gmra.mrb[0].mxu0 %v712_v1  ;;  %v3674_v1 = vstv %s9404_s29  ;;  %s8209_s29 = smov 16  }
 0x1a1   : > { %3503 = vmatpush1.bf16.msra.mxu0 %v7917_v2  ;;  %3534 = vmatprep.mubr.bf16.mxu0 %v715_v34  ;;  %v714_v2 = vpack.c.bf16 %v646_v58, %v646_v58  ;;  %v7986_v34 = vld [vmem:[%s10740_s5 + $0xa00] ss:$8 sps:$4 sm:$0xff]  }
 0x1a2   : > { %3504 = vmatprep.subr.bf16.mxu0 %v7925_v3  ;;  %v717_v3 = vpack.c.bf16 %v658_v48, %v658_v48  ;;  %v8031_v48 = vld [vmem:[%s10740_s5 + $0xaf0] ss:$8 sps:$4 sm:$0xff]  }
 0x1a5   : > { %3505 = vmatpush1.bf16.msra.mxu0 %v7923_v29  ;;  %v720_v29 = vpack.c.bf16 %v6671_v50, %v6671_v50  ;;  %v8043_v50 = vld [vmem:[%s10740_s5 + $0xb30] ss:$8 sps:$4 sm:$0xff]  }
 0x1a6   : > { %3506 = vmatprep.subr.bf16.mxu0 %v7931_v5  ;;  %v7991_v5 = vld [vmem:[%s10740_s5 + $0xa14] ss:$8 sps:$4 sm:$0xff]  }
 0x1a9   : > { %3507 = vmatpush1.bf16.msra.mxu0 %v7929_v6  ;;  %v10757_v6 = vmov 0  }
 0x1aa   : > { %3508 = vmatprep.subr.bf16.mxu0 %v7937_v8  ;;  %3657 = vmatprep.mubr.bf16.mxu1 %v10757_v6  ;;  %v3673_v8 = vmul.f32 %v3672_v62, %v3670_v63  ;;  %v8034_v62 = vld [vmem:[%s10740_s5 + $0xb00] ss:$8 sps:$4 sm:$0xff]   ;;  %v8039_v63 = vld [vmem:[%s10740_s5 + $0xb14] ss:$8 sps:$4 sm:$0xff]  }
 0x1ab   : > { %3658 = vmatmul.mubr.bf16.vlgmr.msra.gmra.mrb[4].mxu1 %v720_v29  ;;  %7505 = vset.pattern.permute.xlu1 %v10757_v6  ;;  %v8051_v29 = vld [vmem:[%s10740_s5 + $0xb54] ss:$8 sps:$4 sm:$0xff]  }
 0x1ac   : > { %3899 = vmatprep.mubr.bf16.mxu1 %v10757_v6  ;;  %7504 = vset.pattern.permute.xlu0 %v10757_v6 }
 0x1ad   : > { %3509 = vmatpush1.bf16.msra.mxu0 %v7935_v9  ;;  %v3675_v9 = vmul.f32 %v3674_v1, %v3671_v0  ;;  %v8042_v0 = vld [vmem:[%s10740_s5 + $0xb24] ss:$8 sps:$4 sm:$0xff]   ;;  %v8040_v1 = vld [vmem:[%s10740_s5 + $0xb20] ss:$8 sps:$4 sm:$0xff]  }
 0x1ae   : > { %3510 = vmatprep.subr.bf16.mxu0 %v7943_v11  ;;  %v7989_v11 = vld [vmem:[%s10740_s5 + $0xa10] ss:$8 sps:$4 sm:$0xff]  }
 0x1b1   : > { %3511 = vmatpush1.bf16.msra.mxu0 %v7941_v12  ;;  %v8207_v12 = vmov 1983009808  }
 0x1b2   : > { %3512 = vmatprep.subr.bf16.mxu0 %v7949_v14  ;;  %v3789_v14 = vunpack.c.l.s4 %v8207_v12  ;;  %v8055_v12 = vld [vmem:[%s10740_s5 + $0xb70] ss:$8 sps:$4 sm:$0xff]  }
 0x1b5   : > { %3513 = vmatpush1.bf16.msra.mxu0 %v7947_v15  ;;  %v7994_v15 = vld [vmem:[%s10740_s5 + $0xa24] ss:$8 sps:$4 sm:$0xff]  }
 0x1b6   : > { %3514 = vmatprep.subr.bf16.mxu0 %v7955_v17  ;;  %v9463_v17 = vadd.f32 %v3675_v9, %v3673_v8  ;;  %v8054_v8 = vld [vmem:[%s10740_s5 + $0xb64] ss:$8 sps:$4 sm:$0xff]   ;;  %v8052_v9 = vld [vmem:[%s10740_s5 + $0xb60] ss:$8 sps:$4 sm:$0xff]  }
 0x1b9   : > { %3515 = vmatpush1.bf16.msra.mxu0 %v7953_v19  ;;  %v3790_v19 = vunpack.c.0.s8 %v3789_v14  ;;  %v8063_v14 = vld [vmem:[%s10740_s5 + $0xb84] ss:$8 sps:$4 sm:$0xff]  }
 0x1ba   : > { %3516 = vmatprep.subr.bf16.mxu0 %v7961_v20  ;;  %v7992_v20 = vld [vmem:[%s10740_s5 + $0xa20] ss:$8 sps:$4 sm:$0xff]  }
 0x1bd   : > { %3517 = vmatpush1.bf16.msra.mxu0 %v7959_v21  ;;  %v9469_v21 = vsub.s32 %v3790_v19, %v8357_v10  ;;  %v8069_v19 = vld [vmem:[%s10740_s5 + $0xb94] ss:$8 sps:$4 sm:$0xff]  }
 0x1be   : > { %3518 = vmatprep.subr.bf16.mxu0 %v7964_v22  ;;  %v7997_v22 = vld [vmem:[%s10740_s5 + $0xa34] ss:$8 sps:$4 sm:$0xff]  }
 0x1c1   : > { %3519 = vmatpush1.bf16.msra.mxu0 %v7962_v23  ;;  %v9476_v23 = vrot.slane %v9463_v17, %v9469_v21 }
 0x1c2   : > { %3520 = vmatprep.subr.bf16.mxu0 %v7967_v16  ;;  %v7998_v16 = vld [vmem:[%s10740_s5 + $0xa40] ss:$8 sps:$4 sm:$0xff]  }
 0x1c3   : > { %3798 = vrot.lane.b32.xlu1 %v9476_v23, %s8208_s21  ;;  %v9485_v10 = vcombine.high %v9476_v23, %v9476_v23 }
 0x1c5   : > { %3521 = vmatpush1.bf16.msra.mxu0 %v7965_v25  ;;  %v8003_v25 = vld [vmem:[%s10740_s5 + $0xa54] ss:$8 sps:$4 sm:$0xff]  }
 0x1c6   : > { %3522 = vmatprep.subr.bf16.mxu0 %v7970_v30  ;;  %v8004_v30 = vld [vmem:[%s10740_s5 + $0xa60] ss:$8 sps:$4 sm:$0xff]  }
 0x1c7   : > { %3800 = vrot.lane.b32.xlu1 %v9485_v10, %s8208_s21 }
 0x1c9   : > { %3523 = vmatpush1.bf16.msra.mxu0 %v7968_v31  ;;  %v8009_v31 = vld [vmem:[%s10740_s5 + $0xa74] ss:$8 sps:$4 sm:$0xff]  }
 0x1ca   : > { %3524 = vmatprep.subr.bf16.mxu0 %v7973_v36  ;;  %v8010_v36 = vld [vmem:[%s10740_s5 + $0xa80] ss:$8 sps:$4 sm:$0xff]  }
 0x1cb   : > { %3998 = vrot.lane.b32.xlu1 %v9485_v10, %s8209_s29 }
 0x1cd   : > { %3525 = vmatpush1.bf16.msra.mxu0 %v7971_v37  ;;  %v8015_v37 = vld [vmem:[%s10740_s5 + $0xa94] ss:$8 sps:$4 sm:$0xff]  }
 0x1ce   : > { %3526 = vmatprep.subr.bf16.mxu0 %v7976_v42  ;;  %v8016_v42 = vld [vmem:[%s10740_s5 + $0xaa0] ss:$8 sps:$4 sm:$0xff]  }
 0x1d1   : > { %3527 = vmatpush1.bf16.msra.mxu0 %v7974_v43  ;;  %v8021_v43 = vld [vmem:[%s10740_s5 + $0xab4] ss:$8 sps:$4 sm:$0xff]  }
 0x1d2   : > { %3528 = vmatprep.subr.bf16.mxu0 %v7979_v46  ;;  %v8022_v46 = vld [vmem:[%s10740_s5 + $0xac0] ss:$8 sps:$4 sm:$0xff]  }
 0x1d5   : > { %3529 = vmatpush1.bf16.msra.mxu0 %v7977_v47  ;;  %v8027_v47 = vld [vmem:[%s10740_s5 + $0xad4] ss:$8 sps:$4 sm:$0xff]  }
 0x1d6   : > { %3530 = vmatprep.subr.bf16.mxu0 %v7982_v52 }
 0x1d9   : > { %3531 = vmatpush1.bf16.msra.mxu0 %v7980_v53  ;;  %v8028_v53 = vld [vmem:[%s10740_s5 + $0xae0] ss:$8 sps:$4 sm:$0xff]  }
 0x1da   : > { %3532 = vmatprep.subr.bf16.mxu0 %v7985_v57 }
 0x1dd   : > { %3533 = vmatpush1.bf16.msra.mxu0 %v7983_v39  ;;  %v654_v39 = vrot.slane %v9169_v18, %v8996_v4  ;;  %v719_v4 = vpack.c.bf16 %v666_v59, %v666_v59 }
 0x1de   : > { %3543 = vmatprep.subr.bf16.mxu0 %v7988_v61 }
 0x1df   : > { %v716_v61 = vpack.c.bf16 %v654_v39, %v654_v39 }
 0x1e0   : > { %3535 = vmatmul.mubr.bf16.vlgmr.msra.gmra.mrb[0].mxu0 %v714_v2  ;;  %v8045_v2 = vld [vmem:[%s10740_s5 + $0xb34] ss:$8 sps:$4 sm:$0xff]  }
 0x1e1   : > { %3544 = vmatpush1.bf16.msra.mxu0 %v7986_v34  ;;  %3575 = vmatprep.mubr.bf16.mxu0 %v717_v3  ;;  %v8048_v34 = vld [vmem:[%s10740_s5 + $0xb44] ss:$8 sps:$4 sm:$0xff]   ;;  %v8046_v3 = vld [vmem:[%s10740_s5 + $0xb40] ss:$8 sps:$4 sm:$0xff]  }
 0x1e2   : > { %3545 = vmatprep.subr.bf16.mxu0 %v7991_v5  ;;  %v8049_v5 = vld [vmem:[%s10740_s5 + $0xb50] ss:$8 sps:$4 sm:$0xff]  }
 0x1e5   : > { %3546 = vmatpush1.bf16.msra.mxu0 %v7989_v11  ;;  %v8057_v11 = vld [vmem:[%s10740_s5 + $0xb74] ss:$8 sps:$4 sm:$0xff]  }
 0x1e6   : > { %3547 = vmatprep.subr.bf16.mxu0 %v7994_v15  ;;  %v8061_v15 = vld [vmem:[%s10740_s5 + $0xb80] ss:$8 sps:$4 sm:$0xff]  }
 0x1e9   : > { %3548 = vmatpush1.bf16.msra.mxu0 %v7992_v20  ;;  %v8067_v20 = vld [vmem:[%s10740_s5 + $0xb90] ss:$8 sps:$4 sm:$0xff]  }
 0x1ea   : > { %3549 = vmatprep.subr.bf16.mxu0 %v7997_v22  ;;  %v8075_v22 = vld [vmem:[%s10740_s5 + $0xba4] ss:$8 sps:$4 sm:$0xff]  }
 0x1ec   : > { %v9552_v52 = vpop.f32.mrb[0].mxu1 }
 0x1ed   : > { %3550 = vmatpush1.bf16.msra.mxu0 %v7995_v24  ;;  %v9557_v54 = vpop.f32.mrb[1].mxu1  ;;  %v8073_v24 = vld [vmem:[%s10740_s5 + $0xba0] ss:$8 sps:$4 sm:$0xff]  }
 0x1ee   : > { %3551 = vmatprep.subr.bf16.mxu0 %v8000_v56  ;;  %v3253_v57 = vpop.f32.mrb[2].mxu1  ;;  %v8081_v56 = vld [vmem:[%s10740_s5 + $0xbb4] ss:$8 sps:$4 sm:$0xff]  }
 0x1ef   : > { %v3254_v58 = vpop.f32.mrb[3].mxu1 }
 0x1f1   : > { %3552 = vmatpush1.bf16.msra.mxu0 %v7998_v16  ;;  %v8079_v16 = vld [vmem:[%s10740_s5 + $0xbb0] ss:$8 sps:$4 sm:$0xff]  }
 0x1f2   : > { %3553 = vmatprep.subr.bf16.mxu0 %v8003_v25  ;;  %v8087_v25 = vld [vmem:[%s10740_s5 + $0xbc4] ss:$8 sps:$4 sm:$0xff]  }
 0x1f5   : > { %3554 = vmatpush1.bf16.msra.mxu0 %v8001_v26  ;;  %v8085_v26 = vld [vmem:[%s10740_s5 + $0xbc0] ss:$8 sps:$4 sm:$0xff]  }
 0x1f6   : > { %3555 = vmatprep.subr.bf16.mxu0 %v8006_v28  ;;  %v8093_v28 = vld [vmem:[%s10740_s5 + $0xbd4] ss:$8 sps:$4 sm:$0xff]  }
 0x1f9   : > { %3556 = vmatpush1.bf16.msra.mxu0 %v8004_v30  ;;  %v8091_v30 = vld [vmem:[%s10740_s5 + $0xbd0] ss:$8 sps:$4 sm:$0xff]  }
 0x1fa   : > { %3557 = vmatprep.subr.bf16.mxu0 %v8009_v31  ;;  %v8099_v31 = vld [vmem:[%s10740_s5 + $0xbe4] ss:$8 sps:$4 sm:$0xff]  }
 0x1fd   : > { %3558 = vmatpush1.bf16.msra.mxu0 %v8007_v32  ;;  %v8097_v32 = vld [vmem:[%s10740_s5 + $0xbe0] ss:$8 sps:$4 sm:$0xff]  }
 0x1fe   : > { %3559 = vmatprep.subr.bf16.mxu0 %v8012_v33  ;;  %v8105_v33 = vld [vmem:[%s10740_s5 + $0xbf4] ss:$8 sps:$4 sm:$0xff]  }
 0x201   : > { %3560 = vmatpush1.bf16.msra.mxu0 %v8010_v36  ;;  %v662_v36 = vrot.slane %v9169_v18, %v8433_v35  ;;  %v1121_v35 = vld [vmem:[%s10741_s6] sm:$0x3] }
 0x202   : > { %3561 = vmatprep.subr.bf16.mxu0 %v8015_v37  ;;  %v8103_v37 = vld [vmem:[%s10740_s5 + $0xbf0] ss:$8 sps:$4 sm:$0xff]   ;;  %v3126_v18 = vrot.slane %v1121_v35, %v8581_v27 }
 0x205   : > { %3562 = vmatpush1.bf16.msra.mxu0 %v8013_v40  ;;  %v718_v40 = vpack.c.bf16 %v662_v36, %v662_v36 }
 0x206   : > { %3563 = vmatprep.subr.bf16.mxu0 %v8018_v41 }
 0x209   : > { %3564 = vmatpush1.bf16.msra.mxu0 %v8016_v42 }
 0x20a   : > { %3565 = vmatprep.subr.bf16.mxu0 %v8021_v43 }
 0x20d   : > { %3566 = vmatpush1.bf16.msra.mxu0 %v8019_v44 }
 0x20e   : > { %3567 = vmatprep.subr.bf16.mxu0 %v8024_v45  ;;  %v3130_v45 = vrot.slane %v1121_v35, %v8442_v38  ;;  %v3679_v35 = vld [vmem:[%s10742_s7 + $0x10] sm:$0xff] }
 0x211   : > { %3568 = vmatpush1.bf16.msra.mxu0 %v8022_v46  ;;  %v7290_v46 = vadd.f32 %v9552_v52, %v3126_v18 }
 0x212   : > { %3569 = vmatprep.subr.bf16.mxu0 %v8027_v47  ;;  %v7293_v47 = vadd.f32 %v9557_v54, %v3130_v45  ;;  %v9739_v54 = vand.u32 127, %v571_v7 }
 0x214   : > { %vm3804_vm0 = vcmp.lt.s32.totalorder %v9739_v54, 17  ;;  %vm4000_vm2 = vcmp.lt.s32.totalorder %v9739_v54, 16  ;;  %vm4210_vm6 = vcmp.lt.s32.totalorder %v9739_v54, 15  ;;  %vm4420_vm7 = vcmp.lt.s32.totalorder %v9739_v54, 1 }
 0x215   : > { %3570 = vmatpush1.bf16.msra.mxu0 %v8025_v49  ;;  %vm4846_vm8 = vcmp.lt.s32.totalorder %v9739_v54, 127  ;;  %vm5056_vm9 = vcmp.lt.s32.totalorder %v9739_v54, 113  ;;  %vm5266_vm10 = vcmp.lt.s32.totalorder %v9739_v54, 112  ;;  %vm5476_vm11 = vcmp.lt.s32.totalorder %v9739_v54, 111  ;;  %v7253_v54 = vld [vmem:[%s10747_s12 + $0x8] sm:$0x1] }
 0x216   : > { %3571 = vmatprep.subr.bf16.mxu0 %v8030_v51 }
 0x219   : > { %3572 = vmatpush1.bf16.msra.mxu0 %v8028_v53 }
 0x21a   : > { %3573 = vmatprep.subr.bf16.mxu0 %v8033_v55 }
 0x21d   : > { %3574 = vmatpush1.bf16.msra.mxu0 %v8031_v48 }
 0x21e   : > { %3584 = vmatprep.subr.bf16.mxu0 %v8036_v60 }
 0x220   : > { %3576 = vmatmul.mubr.bf16.vlgmr.msra.gmra.mrb[0].mxu0 %v716_v61 }
 0x221   : > { %3585 = vmatpush1.bf16.msra.mxu0 %v8034_v62  ;;  %3616 = vmatprep.mubr.bf16.mxu0 %v719_v4 }
 0x222   : > { %3586 = vmatprep.subr.bf16.mxu0 %v8039_v63 }
 0x225   : > { %3587 = vmatpush1.bf16.msra.mxu0 %v8037_v13 }
 0x226   : > { %3588 = vmatprep.subr.bf16.mxu0 %v8042_v0 }
 0x229   : > { %3589 = vmatpush1.bf16.msra.mxu0 %v8040_v1  ;;  %v7086_v1 = vld [vmem:[%s10749_s14 + $0x2] sm:$0x3] }
 0x22a   : > { %3590 = vmatprep.subr.bf16.mxu0 %v8045_v2 }
 0x22d   : > { %3591 = vmatpush1.bf16.msra.mxu0 %v8043_v50 }
 0x22e   : > { %3592 = vmatprep.subr.bf16.mxu0 %v8048_v34 }
 0x231   : > { %3593 = vmatpush1.bf16.msra.mxu0 %v8046_v3 }
 0x232   : > { %3594 = vmatprep.subr.bf16.mxu0 %v8051_v29 }
 0x235   : > { %3595 = vmatpush1.bf16.msra.mxu0 %v8049_v5  ;;  %v3799_v52 = vpop.permute.xlu1 %3798 }
 0x236   : > { %3596 = vmatprep.subr.bf16.mxu0 %v8054_v8  ;;  %v9768_v8 = vrot.slane %v7086_v1, %v8442_v38 }
 0x239   : > { %3597 = vmatpush1.bf16.msra.mxu0 %v8052_v9  ;;  %v3801_v60 = vpop.permute.xlu1 %3800 }
 0x23a   : > { %3598 = vmatprep.subr.bf16.mxu0 %v8057_v11  ;;  %v3806_v62 = vsel %vm3804_vm0, %v3801_v60, %v3799_v52  ;;  %v3805_v7 = vsel %vm3804_vm0, %v3799_v52, %v3801_v60  ;;  %v7104_v52 = vld [vmem:[%s10749_s14 + $0x4] sm:$0x3] }
 0x23d   : > { %3599 = vmatpush1.bf16.msra.mxu0 %v8055_v12  ;;  %v3999_v3 = vpop.permute.xlu1 %3998  ;;  %v9773_v12 = vsel %vm3858_vm1, 65535, %v10757_v6 }
 0x23e   : > { %3600 = vmatprep.subr.bf16.mxu0 %v8063_v14 }
 0x241   : > { %3601 = vmatpush1.bf16.msra.mxu0 %v8061_v15 }
 0x242   : > { %3602 = vmatprep.subr.bf16.mxu0 %v8069_v19 }
 0x245   : > { %3603 = vmatpush1.bf16.msra.mxu0 %v8067_v20 }
 0x246   : > { %3604 = vmatprep.subr.bf16.mxu0 %v8075_v22 }
 0x249   : > { %3605 = vmatpush1.bf16.msra.mxu0 %v8073_v24  ;;  %v3681_v24 = vld [vmem:[%s558_s28] sm:$0xff] }
 0x24a   : > { %3606 = vmatprep.subr.bf16.mxu0 %v8081_v56  ;;  %v3682_v56 = vld [vmem:[%s558_s28 + $0x8] sm:$0xff] }
 0x24d   : > { %3607 = vmatpush1.bf16.msra.mxu0 %v8079_v16  ;;  %v7282_v16 = vpack.c.bf16 %v3682_v56, %v3681_v24  ;;  %v8113_v56 = vld [vmem:[%s10745_s10 + $0x18] sm:$0xff]  }
 0x24e   : > { %3608 = vmatprep.subr.bf16.mxu0 %v8087_v25  ;;  %v8106_v25 = vld [vmem:[%s10745_s10] sm:$0xff]  }
 0x251   : > { %3609 = vmatpush1.bf16.msra.mxu0 %v8085_v26 }
 0x252   : > { %3610 = vmatprep.subr.bf16.mxu0 %v8093_v28 }
 0x255   : > { %3611 = vmatpush1.bf16.msra.mxu0 %v8091_v30  ;;  %v3683_v30 = vld [vmem:[%s558_s28 + $0x10] sm:$0xff] }
 0x256   : > { %3612 = vmatprep.subr.bf16.mxu0 %v8099_v31  ;;  %v3684_v31 = vld [vmem:[%s558_s28 + $0x18] sm:$0xff]  ;;  %s10777_s28 = smov 113  }
 0x259   : > { %3613 = vmatpush1.bf16.msra.mxu0 %v8097_v32  ;;  %v7286_v32 = vpack.c.bf16 %v3684_v31, %v3683_v30 }
 0x25a   : > { %3614 = vmatprep.subr.bf16.mxu0 %v8105_v33  ;;  %v3677_v33 = vld [vmem:[%s10742_s7] sm:$0xff] }
 0x25d   : > { %3615 = vmatpush1.bf16.msra.mxu0 %v8103_v37 }
 0x25e   : > { %7283 = vmatprep.subr.bf16.mxu0 %v7282_v16 }
 0x260   : > { %3617 = vmatmul.mubr.bf16.vlgmr.msra.gmra.mrb[0].mxu0 %v718_v40 }
 0x261   : > { %7285 = vmatpush3.bf16.msra.mxu0 %v7282_v16  ;;  %7276 = vmatprep.mubr.msk.f32.mxu0 %vm3689_vm4, %v3677_v33  ;;  %v7122_v16 = vld [vmem:[%s10749_s14 + $0x6] sm:$0x3] }
 0x262   : > { %7287 = vmatprep.subr.bf16.mxu0 %v7286_v32  ;;  %v9887_v31 = vrot.slane %v7122_v16, %v8442_v38 }
 0x265   : > { %7289 = vmatpush3.bf16.msra.mxu0 %v7286_v32 }
 0x27e   : > { %v3659_v41 = vpop.f32.mrb[4].mxu1 }
 0x27f   : > { %v3661_v42 = vpop.f32.mrb[5].mxu1 }
 0x280   : > { %v3663_v43 = vpop.f32.mrb[6].mxu1 }
 0x281   : > { %v3664_v44 = vpop.f32.mrb[7].mxu1  ;;  %v3678_v43 = vld [vmem:[%s10742_s7 + $0x8] sm:$0xff] }
 0x282   : > { %7277 = vmatmul.mubr.msk.f32.vlgmr.msra.gmra.mrb[4].mxu0 %vm3689_vm4, %v3678_v43 }
 0x283   : > { %7279 = vmatprep.mubr.msk.f32.mxu0 %vm3689_vm4, %v3679_v35  ;;  %v9902_v35 = vrot.slane %v7122_v16, %v8581_v27 }
 0x333   : > { %v3618_v49 = vpop.f32.mrb[0].mxu0 }
 0x334   : > { %v7291_v51 = vadd.f32 %v7290_v46, %v3618_v49  ;;  %v3620_v53 = vpop.f32.mrb[1].mxu0  ;;  %v3680_v46 = vld [vmem:[%s10742_s7 + $0x18] sm:$0xff] }
 0x335   : > { %v7294_v55 = vadd.f32 %v7293_v47, %v3620_v53  ;;  %v3622_v57 = vpop.f32.mrb[2].mxu0  ;;  %7280 = vmatmul.mubr.msk.f32.gmra.mrb[6].mxu0 %vm3689_vm4, %v3680_v46  ;;  %v7140_v46 = vld [vmem:[%s10749_s14 + $0x8] sm:$0x3] }
 0x336   : > { %v9676_v58 = vadd.f32 %v7291_v51, %v3659_v41  ;;  %v3623_v39 = vpop.f32.mrb[3].mxu0  ;;  %v9798_v41 = vrot.slane %v7086_v1, %v8581_v27  ;;  %v8108_v51 = vld [vmem:[%s10744_s9] sm:$0xff]  }
 0x337   : > { %v9678_v48 = vadd.f32 %v7294_v55, %v3661_v42  ;;  %v8107_v42 = vld [vmem:[%s10745_s10 + $0x8] sm:$0xff]  }
 0x338   : > { %3823 = vrot.lane.b32.xlu0 %v9676_v58, %s8208_s21  ;;  %v8109_v39 = vld [vmem:[%s10744_s9 + $0x8] sm:$0xff]  }
 0x339   : > { %4022 = vrot.lane.b32.xlu1 %v9678_v48, %s8209_s29 }
 0x33c   : > { %3825 = vrot.lane.b32.xlu0 %v9678_v48, %s8208_s21 }
 0x33d   : > { %4208 = vrot.lane.b32.xlu1 %v9485_v10, %s8210_s25 }
 0x340   : > { %3996 = vrot.lane.b32.xlu0 %v9476_v23, %s8209_s29 }
 0x341   : > { %4232 = vrot.lane.b32.xlu1 %v9678_v48, %s8210_s25 }
 0x344   : > { %4020 = vrot.lane.b32.xlu0 %v9676_v58, %s8209_s29 }
 0x345   : > { %4418 = vrot.lane.b32.xlu1 %v9485_v10, %s8211_s30 }
 0x348   : > { %4206 = vrot.lane.b32.xlu0 %v9476_v23, %s8210_s25 }
 0x349   : > { %4442 = vrot.lane.b32.xlu1 %v9678_v48, %s8211_s30 }
 0x34c   : > { %4230 = vrot.lane.b32.xlu0 %v9676_v58, %s8210_s25 }
 0x34d   : > { %4844 = vrot.lane.b32.xlu1 %v9485_v10, %s8212_s17 }
 0x350   : > { %4416 = vrot.lane.b32.xlu0 %v9476_v23, %s8211_s30 }
 0x351   : > { %4868 = vrot.lane.b32.xlu1 %v9678_v48, %s8212_s17 }
 0x354   : > { %4440 = vrot.lane.b32.xlu0 %v9676_v58, %s8211_s30 }
 0x355   : > { %5054 = vrot.lane.b32.xlu1 %v9485_v10, %s10755_s20 }
 0x358   : > { %4842 = vrot.lane.b32.xlu0 %v9476_v23, %s8212_s17 }
 0x359   : > { %5078 = vrot.lane.b32.xlu1 %v9678_v48, %s10755_s20 }
 0x35c   : > { %4866 = vrot.lane.b32.xlu0 %v9676_v58, %s8212_s17 }
 0x35d   : > { %5264 = vrot.lane.b32.xlu1 %v9485_v10, %s10753_s0 }
 0x360   : > { %5052 = vrot.lane.b32.xlu0 %v9476_v23, %s10755_s20 }
 0x361   : > { %5288 = vrot.lane.b32.xlu1 %v9678_v48, %s10753_s0 }
 0x364   : > { %5076 = vrot.lane.b32.xlu0 %v9676_v58, %s10755_s20  ;;  %s561_s20 = scalar_lea.vmem %s10750_s15, %s8347_s27 }
 0x365   : > { %5474 = vrot.lane.b32.xlu1 %v9485_v10, %s10751_s23  ;;  %v3807_v10 = vld [vmem:[%s10749_s14] sm:$0x3] }
 0x366   : > { %v9746_v61 = vrot.slane %v3807_v10, %v8581_v27 }
 0x368   : > { %5262 = vrot.lane.b32.xlu0 %v9476_v23, %s10753_s0  ;;  %v3819_v63 = vmul.f32 %v9746_v61, %v3806_v62 }
 0x369   : > { %5498 = vrot.lane.b32.xlu1 %v9678_v48, %s10751_s23 }
 0x36a   : > { %v3821_v11 = vpack.c.bf16 %v3819_v63, %v3819_v63 }
 0x36c   : > { %5286 = vrot.lane.b32.xlu0 %v9676_v58, %s10753_s0  ;;  %v3938_v28 = vsel %vm3858_vm1, %v3821_v11, 0 }
 0x370   : > { %5472 = vrot.lane.b32.xlu0 %v9476_v23, %s10751_s23  ;;  %v9749_v23 = vrot.slane %v3807_v10, %v8442_v38 }
 0x372   : > { %v3820_v2 = vmul.f32 %v9749_v23, %v3805_v7  ;;  %v9841_v7 = vrot.slane %v7104_v52, %v8442_v38 }
 0x374   : > { %5496 = vrot.lane.b32.xlu0 %v9676_v58, %s10751_s23  ;;  %v3822_v15 = vpack.c.bf16 %v3820_v2, %v3820_v2 }
 0x3aa   : > { %v3824_v59 = vpop.permute.xlu0 %3823 }
 0x3ab   : > { %v4023_v40 = vpop.permute.xlu1 %4022 }
 0x3ae   : > { %v3826_v4 = vpop.permute.xlu0 %3825 }
 0x3af   : > { %v3827_v13 = vsel %vm3804_vm0, %v3824_v59, %v3826_v4  ;;  %v3828_v0 = vsel %vm3804_vm0, %v3826_v4, %v3824_v59  ;;  %v4209_v10 = vpop.permute.xlu1 %4208 }
 0x3b0   : > { %v3829_v50 = vmul.f32 %v3828_v0, %v9746_v61  ;;  %v3830_v34 = vmul.f32 %v3827_v13, %v9749_v23  ;;  %v8110_v13 = vld [vmem:[%s10744_s9 + $0x10] sm:$0xff]  }
 0x3b2   : > { %v3831_v29 = vpack.c.bf16 %v3829_v50, %v3829_v50  ;;  %v3832_v5 = vpack.c.bf16 %v3830_v34, %v3830_v34  ;;  %v3997_v9 = vpop.permute.xlu0 %3996 }
 0x3b3   : > { %v4001_v14 = vsel %vm4000_vm2, %v3997_v9, %v3999_v3  ;;  %v4002_v37 = vsel %vm4000_vm2, %v3999_v3, %v3997_v9  ;;  %v4233_v34 = vpop.permute.xlu1 %4232  ;;  %v9856_v3 = vrot.slane %v7104_v52, %v8581_v27  ;;  %v8116_v52 = vld [vmem:[%s10745_s10 + $0x20] sm:$0xff]  }
 0x3b4   : > { %v3862_v19 = vand.u32 %v9773_v12, %v3831_v29  ;;  %v4017_v20 = vmul.f32 %v9768_v8, %v4001_v14  ;;  %v3865_v22 = vand.u32 %v9773_v12, %v3832_v5  ;;  %v4016_v18 = vmul.f32 %v9798_v41, %v4002_v37  ;;  %v8111_v29 = vld [vmem:[%s10744_s9 + $0x18] sm:$0xff]  }
 0x3b6   : > { %3867 = vmatprep.subr.bf16.mxu1 %v3865_v22  ;;  %v4019_v26 = vpack.c.bf16 %v4017_v20, %v4017_v20  ;;  %v4021_v36 = vpop.permute.xlu0 %4020  ;;  %v4018_v47 = vpack.c.bf16 %v4016_v18, %v4016_v18  ;;  %v8115_v18 = vld [vmem:[%s10744_s9 + $0x28] sm:$0xff]  }
 0x3b7   : > { %3868 = vmatpush1.bf16.msra.mxu1 %v3862_v19  ;;  %v4024_v44 = vsel %vm4000_vm2, %v4021_v36, %v4023_v40  ;;  %v4025_v57 = vsel %vm4000_vm2, %v4023_v40, %v4021_v36  ;;  %v8112_v19 = vld [vmem:[%s10745_s10 + $0x10] sm:$0xff]   ;;  %v8114_v36 = vld [vmem:[%s10744_s9 + $0x20] sm:$0xff]  }
 0x3b8   : > { %7083 = vmatprep.subr.msk.bf16.mxu1 %vm3858_vm1, %v3822_v15  ;;  %v4027_v45 = vmul.f32 %v4024_v44, %v9768_v8  ;;  %v4052_v53 = vsel %vm3858_vm1, %v4018_v47, 0  ;;  %v4026_v60 = vmul.f32 %v4025_v57, %v9798_v41 }
 0x3ba   : > { %7079 = vmatmul.mubr.msk.bf16.vlgmr.msra.gmra.mrb[8].mxu1 %vm3851_vm3, %v8106_v25  ;;  %v4029_v49 = vpack.c.bf16 %v4027_v45, %v4027_v45  ;;  %v4207_v59 = vpop.permute.xlu0 %4206  ;;  %v4028_v63 = vpack.c.bf16 %v4026_v60, %v4026_v60  ;;  %v4419_v25 = vpop.permute.xlu1 %4418 }
 0x3bb   : > { %3944 = vmatpush1.bf16.msra.mxu1 %v3938_v28  ;;  %3909 = vmatprep.mubr.bf16.mxu1 %v10757_v6  ;;  %v4211_v62 = vsel %vm4210_vm6, %v4207_v59, %v4209_v10  ;;  %v4212_v50 = vsel %vm4210_vm6, %v4209_v10, %v4207_v59 }
 0x3bc   : > { %7093 = vmatprep.subr.msk.bf16.mxu1 %vm3858_vm1, %v4019_v26  ;;  %v4143_v55 = vand.u32 %v4029_v49, %v9773_v12  ;;  %v4227_v4 = vmul.f32 %v9841_v7, %v4211_v62  ;;  %v4140_v1 = vand.u32 %v4028_v63, %v9773_v12  ;;  %v4226_v9 = vmul.f32 %v9856_v3, %v4212_v50  ;;  %v8117_v63 = vld [vmem:[%s10745_s10 + $0x28] sm:$0xff]  }
 0x3be   : > { %v4229_v0 = vpack.c.bf16 %v4227_v4, %v4227_v4  ;;  %v4231_v2 = vpop.permute.xlu0 %4230  ;;  %v4228_v14 = vpack.c.bf16 %v4226_v9, %v4226_v9  ;;  %v4443_v44 = vpop.permute.xlu1 %4442  ;;  %v8120_v9 = vld [vmem:[%s10745_s10 + $0x30] sm:$0xff]  }
 0x3bf   : > { %v4234_v5 = vsel %vm4210_vm6, %v4231_v2, %v4233_v34  ;;  %v4235_v24 = vsel %vm4210_vm6, %v4233_v34, %v4231_v2 }
 0x3c0   : > { %v4237_v11 = vmul.f32 %v4234_v5, %v9841_v7  ;;  %v4262_v20 = vsel %vm3858_vm1, %v4228_v14, 0  ;;  %v4236_v28 = vmul.f32 %v4235_v24, %v9856_v3 }
 0x3c2   : > { %7080 = vmatmul.mubr.msk.bf16.gmra.mrb[12].mxu1 %vm3851_vm3, %v8107_v42  ;;  %v4239_v15 = vpack.c.bf16 %v4237_v11, %v4237_v11  ;;  %v4417_v26 = vpop.permute.xlu0 %4416  ;;  %v4238_v33 = vpack.c.bf16 %v4236_v28, %v4236_v28  ;;  %v8122_v28 = vld [vmem:[%s10744_s9 + $0x40] sm:$0xff]  }
 0x3c3   : > { %3975 = vmatprep.mubr.bf16.mxu1 %v10757_v6  ;;  %v4421_v30 = vsel %vm4420_vm7, %v4417_v26, %v4419_v25  ;;  %v4422_v43 = vsel %vm4420_vm7, %v4419_v25, %v4417_v26 }
 0x3c4   : > { %v4353_v22 = vand.u32 %v4239_v15, %v9773_v12  ;;  %v4437_v32 = vmul.f32 %v9887_v31, %v4421_v30  ;;  %v4350_v40 = vand.u32 %v4238_v33, %v9773_v12  ;;  %v4436_v47 = vmul.f32 %v9902_v35, %v4422_v43 }
 0x3c6   : > { %v4439_v37 = vpack.c.bf16 %v4437_v32, %v4437_v32  ;;  %v4441_v42 = vpop.permute.xlu0 %4440 }
 0x3c7   : > { %v4444_v45 = vsel %vm4420_vm7, %v4441_v42, %v4443_v44  ;;  %v4445_v4 = vsel %vm4420_vm7, %v4443_v44, %v4441_v42 }
 0x3c8   : > { %v4447_v49 = vmul.f32 %v4444_v45, %v9887_v31 }
 0x3ca   : > { %7084 = vmatmul.mubr.msk.bf16.vlgmr.msra.gmra.mrb[8].mxu1 %vm3930_vm5, %v8108_v51  ;;  %v9916_v51 = vrot.slane %v7140_v46, %v8581_v27 }
 0x3cb   : > { %4058 = vmatpush1.bf16.msra.mxu1 %v4052_v53  ;;  %3985 = vmatprep.mubr.bf16.mxu1 %v10757_v6  ;;  %v9919_v53 = vrot.slane %v7140_v46, %v8442_v38  ;;  %v8124_v46 = vld [vmem:[%s10745_s10 + $0x40] sm:$0xff]  }
 0x3cc   : > { %4145 = vmatprep.subr.bf16.mxu1 %v4143_v55  ;;  %v4438_v55 = vpack.c.bf16 %v4436_v47, %v4436_v47 }
 0x3cd   : > { %v4637_v57 = vcombine.low %v9916_v51, %v9919_v53 }
 0x3ce   : > { %v4472_v10 = vsel %vm3858_vm1, %v4438_v55, 0 }
 0x3cf   : > { %v4644_v59 = vrot.slane %v4637_v57, %v9469_v21  ;;  %v8125_v57 = vld [vmem:[%s10745_s10 + $0x48] sm:$0xff]  }
 0x3d1   : > { %v4646_v62 = vmul.f32 %v4644_v59, %v9463_v17  ;;  %v8118_v17 = vld [vmem:[%s10744_s9 + $0x30] sm:$0xff]  }
 0x3d2   : > { %7085 = vmatmul.mubr.msk.bf16.gmra.mrb[12].mxu1 %vm3930_vm5, %v8109_v39  ;;  %v4449_v39 = vpack.c.bf16 %v4447_v49, %v4447_v49 }
 0x3d3   : > { %4089 = vmatprep.mubr.bf16.mxu1 %v10757_v6 }
 0x3d4   : > { %v4563_v60 = vand.u32 %v4449_v39, %v9773_v12  ;;  %v7176_v39 = vld [vmem:[%s10749_s14 + $0xc] sm:$0x3] }
 0x3da   : > { %7094 = vmatmul.mubr.msk.bf16.vlgmr.msra.gmra.mrb[8].mxu1 %vm3930_vm5, %v8110_v13  ;;  %v4654_v13 = vrot.slane %v4646_v62, %v9469_v21  ;;  %v8119_v21 = vld [vmem:[%s10744_s9 + $0x38] sm:$0xff]   ;;  %v10021_v62 = vrot.slane %v7176_v39, %v8442_v38 }
 0x3db   : > { %4146 = vmatpush1.bf16.msra.mxu1 %v4140_v1  ;;  %4099 = vmatprep.mubr.bf16.mxu1 %v10757_v6 }
 0x3dc   : > { %7111 = vmatprep.subr.msk.bf16.mxu1 %vm3858_vm1, %v4229_v0  ;;  %v4446_v0 = vmul.f32 %v4445_v4, %v9902_v35  ;;  %v4655_v1 = vcombine.high %v4654_v13, %v4654_v13  ;;  %v4658_v5 = vpack.c.bf16 %v4654_v13, %v4654_v13  ;;  %v5683_v4 = vld [vmem:[%s10746_s11 + $0x8] sm:$0xff] }
 0x3dd   : > { %5693 = vperm.xlu1 %7505, %v5683_v4  }
 0x3de   : > { %v4448_v2 = vpack.c.bf16 %v4446_v0, %v4446_v0  ;;  %v4659_v50 = vpack.c.bf16 %v4655_v1, %v4655_v1  ;;  %v4688_v14 = vsel %vm3858_vm1, %v4658_v5, 0  ;;  %v5684_v0 = vld [vmem:[%s10746_s11 + $0x10] sm:$0xff] }
 0x3e0   : > { %v4560_v34 = vand.u32 %v4448_v2, %v9773_v12  ;;  %v5685_v2 = vld [vmem:[%s10746_s11 + $0x18] sm:$0xff] }
 0x3e1   : > { %5698 = vperm.xlu1 %7505, %v5684_v0   ;;  %v8133_v0 = vld [vmem:[%s10745_s10 + $0x68] sm:$0xff]  }
 0x3e2   : > { %7095 = vmatmul.mubr.msk.bf16.gmra.mrb[12].mxu1 %vm3930_vm5, %v8111_v29  ;;  %v4663_v29 = vmul.f32 %v9678_v48, %v9919_v53  ;;  %v8121_v48 = vld [vmem:[%s10745_s10 + $0x38] sm:$0xff]  }
 0x3e3   : > { %4177 = vmatprep.mubr.bf16.mxu1 %v10757_v6 }
 0x3e4   : > { %v4665_v11 = vpack.c.bf16 %v4663_v29, %v4663_v29 }
 0x3e6   : > { %v4779_v15 = vand.u32 %v4665_v11, %v9773_v12  ;;  %v8127_v11 = vld [vmem:[%s10744_s9 + $0x58] sm:$0xff]  }
 0x3ea   : > { %7102 = vmatmul.mubr.msk.bf16.vlgmr.msra.gmra.mrb[8].mxu1 %vm3851_vm3, %v8112_v19  ;;  %v7158_v19 = vld [vmem:[%s10749_s14 + $0xa] sm:$0x3] }
 0x3eb   : > { %4268 = vmatpush1.bf16.msra.mxu1 %v4262_v20  ;;  %4187 = vmatprep.mubr.bf16.mxu1 %v10757_v6  ;;  %v4845_v20 = vpop.permute.xlu1 %4844  ;;  %v9975_v16 = vrot.slane %v7158_v19, %v8442_v38 }
 0x3ec   : > { %4355 = vmatprep.subr.bf16.mxu1 %v4353_v22  ;;  %v4843_v22 = vpop.permute.xlu0 %4842 }
 0x3ed   : > { %v4848_v24 = vsel %vm4846_vm8, %v4845_v20, %v4843_v22  ;;  %v4847_v33 = vsel %vm4846_vm8, %v4843_v22, %v4845_v20  ;;  %v8128_v22 = vld [vmem:[%s10745_s10 + $0x50] sm:$0xff]  }
 0x3ee   : > { %v4863_v25 = vmul.f32 %v9975_v16, %v4848_v24 }
 0x3f0   : > { %v4865_v30 = vpack.c.bf16 %v4863_v25, %v4863_v25 }
 0x3f2   : > { %7103 = vmatmul.mubr.msk.bf16.gmra.mrb[12].mxu1 %vm3851_vm3, %v8113_v56  ;;  %v4662_v56 = vmul.f32 %v9676_v58, %v9916_v51  ;;  %v4867_v58 = vpop.permute.xlu0 %4866 }
 0x3f3   : > { %4299 = vmatprep.mubr.bf16.mxu1 %v10757_v6 }
 0x3f4   : > { %v4664_v26 = vpack.c.bf16 %v4662_v56, %v4662_v56 }
 0x3f6   : > { %v4776_v32 = vand.u32 %v4664_v26, %v9773_v12  ;;  %v8129_v26 = vld [vmem:[%s10745_s10 + $0x58] sm:$0xff]  }
 0x3fa   : > { %7112 = vmatmul.mubr.msk.bf16.vlgmr.msra.gmra.mrb[8].mxu1 %vm3930_vm5, %v8114_v36  ;;  %v4869_v36 = vpop.permute.xlu1 %4868 }
 0x3fb   : > { %4356 = vmatpush1.bf16.msra.mxu1 %v4350_v40  ;;  %4309 = vmatprep.mubr.bf16.mxu1 %v10757_v6  ;;  %v8123_v40 = vld [vmem:[%s10744_s9 + $0x48] sm:$0xff]   ;;  %v4871_v42 = vsel %vm4846_vm8, %v4869_v36, %v4867_v58  ;;  %v4870_v55 = vsel %vm4846_vm8, %v4867_v58, %v4869_v36 }
 0x3fc   : > { %7129 = vmatprep.subr.msk.bf16.mxu1 %vm3858_vm1, %v4439_v37  ;;  %v9990_v37 = vrot.slane %v7158_v19, %v8581_v27  ;;  %v4873_v44 = vmul.f32 %v4871_v42, %v9975_v16 }
 0x3fe   : > { %v4862_v43 = vmul.f32 %v9990_v37, %v4847_v33  ;;  %v4875_v45 = vpack.c.bf16 %v4873_v44, %v4873_v44  ;;  %v4872_v59 = vmul.f32 %v4870_v55, %v9990_v37  ;;  %v8131_v55 = vld [vmem:[%s10744_s9 + $0x68] sm:$0xff]  }
 0x400   : > { %v4989_v49 = vand.u32 %v4875_v45, %v9773_v12  ;;  %v4874_v1 = vpack.c.bf16 %v4872_v59, %v4872_v59 }
 0x402   : > { %7113 = vmatmul.mubr.msk.bf16.gmra.mrb[12].mxu1 %vm3930_vm5, %v8115_v18  ;;  %v4864_v18 = vpack.c.bf16 %v4862_v43, %v4862_v43  ;;  %v8130_v43 = vld [vmem:[%s10744_s9 + $0x60] sm:$0xff]  }
 0x403   : > { %4387 = vmatprep.mubr.bf16.mxu1 %v10757_v6 }
 0x404   : > { %v4898_v47 = vsel %vm3858_vm1, %v4864_v18, 0 }
 0x40a   : > { %7120 = vmatmul.mubr.msk.bf16.vlgmr.msra.gmra.mrb[8].mxu1 %vm3851_vm3, %v8116_v52  ;;  %v5055_v52 = vpop.permute.xlu1 %5054 }
 0x40b   : > { %4478 = vmatpush1.bf16.msra.mxu1 %v4472_v10  ;;  %4397 = vmatprep.mubr.bf16.mxu1 %v10757_v6  ;;  %v5053_v10 = vpop.permute.xlu0 %5052 }
 0x40c   : > { %4565 = vmatprep.subr.bf16.mxu1 %v4563_v60  ;;  %v5058_v60 = vsel %vm5056_vm9, %v5055_v52, %v5053_v10  ;;  %v5057_v29 = vsel %vm5056_vm9, %v5053_v10, %v5055_v52 }
 0x40d   : > { %v5073_v13 = vmul.f32 %v10021_v62, %v5058_v60  ;;  %v8132_v60 = vld [vmem:[%s10745_s10 + $0x60] sm:$0xff]  }
 0x40e   : > { %v5079_v5 = vpop.permute.xlu1 %5078 }
 0x412   : > { %7121 = vmatmul.mubr.msk.bf16.gmra.mrb[12].mxu1 %vm3851_vm3, %v8117_v63  ;;  %v5682_v63 = vld [vmem:[%s10746_s11] sm:$0xff] }
 0x413   : > { %4509 = vmatprep.mubr.bf16.mxu1 %v10757_v6  ;;  %5688 = vperm.xlu0 %7504, %v5682_v63  }
 0x417   : > { %5703 = vperm.xlu0 %7504, %v5685_v2  }
 0x41a   : > { %7130 = vmatmul.mubr.msk.bf16.vlgmr.msra.gmra.mrb[8].mxu1 %vm3930_vm5, %v8118_v17  ;;  %v8126_v17 = vld [vmem:[%s10744_s9 + $0x50] sm:$0xff]  }
 0x41b   : > { %4566 = vmatpush1.bf16.msra.mxu1 %v4560_v34  ;;  %4519 = vmatprep.mubr.bf16.mxu1 %v10757_v6  ;;  %v4986_v34 = vand.u32 %v4874_v1, %v9773_v12  ;;  %v7212_v1 = vld [vmem:[%s10749_s14 + $0x10] sm:$0x3] }
 0x41c   : > { %7147 = vmatprep.subr.msk.bf16.mxu1 %vm3858_vm1, %v4659_v50  ;;  %v5075_v50 = vpack.c.bf16 %v5073_v13, %v5073_v13 }
 0x422   : > { %7131 = vmatmul.mubr.msk.bf16.gmra.mrb[12].mxu1 %vm3930_vm5, %v8119_v21  ;;  %v5077_v21 = vpop.permute.xlu0 %5076 }
 0x423   : > { %4597 = vmatprep.mubr.bf16.mxu1 %v10757_v6  ;;  %v5080_v25 = vsel %vm5056_vm9, %v5077_v21, %v5079_v5 }
 0x42a   : > { %7138 = vmatmul.mubr.msk.bf16.vlgmr.msra.gmra.mrb[8].mxu1 %vm3851_vm3, %v8120_v9  ;;  %v10048_v9 = vrot.slane %v7176_v39, %v8581_v27 }
 0x42b   : > { %4694 = vmatpush1.bf16.msra.mxu1 %v4688_v14  ;;  %4607 = vmatprep.mubr.bf16.mxu1 %v10757_v6  ;;  %v5081_v14 = vsel %vm5056_vm9, %v5079_v5, %v5077_v21  ;;  %v10125_v21 = vrot.slane %v7212_v1, %v8442_v38  ;;  %v3685_v5 = vld [vmem:[%s10743_s8] sm:$0xff] }
 0x42c   : > { %4781 = vmatprep.subr.bf16.mxu1 %v4779_v15  ;;  %10772 = vst [vmem:[#allocation5_spill] sm:$0xff] %v10048_v9  ;;  %v5072_v15 = vmul.f32 %v10048_v9, %v5057_v29  ;;  %v5082_v58 = vmul.f32 %v5080_v25, %v10048_v9  ;;  %v3686_v29 = vld [vmem:[%s10743_s8 + $0x8] sm:$0xff] }
 0x42d   : > { %10775 = vst [vmem:[#allocation8_spill] sm:$0xff] %v10125_v21 }
 0x42e   : > { %v5074_v19 = vpack.c.bf16 %v5072_v15, %v5072_v15  ;;  %v5084_v42 = vpack.c.bf16 %v5082_v58, %v5082_v58 }
 0x430   : > { %v5108_v24 = vsel %vm3858_vm1, %v5074_v19, 0  ;;  %v5196_v18 = vand.u32 %v5084_v42, %v9773_v12  ;;  %v10152_v42 = vrot.slane %v7212_v1, %v8581_v27 }
 0x432   : > { %7139 = vmatmul.mubr.msk.bf16.gmra.mrb[12].mxu1 %vm3851_vm3, %v8121_v48  ;;  %v5083_v48 = vmul.f32 %v5081_v14, %v10021_v62  ;;  %v7278_v14 = vpop.f32.mrb[4].mxu0  ;;  %10776 = vst [vmem:[#allocation9_spill] sm:$0xff] %v10152_v42 }
 0x433   : > { %4725 = vmatprep.mubr.bf16.mxu1 %v10757_v6  ;;  %v3768_v19 = vpop.f32.mrb[5].mxu0 }
 0x434   : > { %v5085_v20 = vpack.c.bf16 %v5083_v48, %v5083_v48  ;;  %v3774_v48 = vadd.f32 %v7278_v14, %v3686_v29  ;;  %v7281_v25 = vpop.f32.mrb[6].mxu0 }
 0x436   : > { %v5199_v56 = vand.u32 %v5085_v20, %v9773_v12  ;;  %v3769_v20 = vadd.f32 %v3768_v19, %v3685_v5  ;;  %5721 = vperm.xlu0 %7504, %v3774_v48  }
 0x438   : > { %5716 = vperm.xlu1 %7505, %v3769_v20  }
 0x43a   : > { %7148 = vmatmul.mubr.msk.bf16.vlgmr.msra.gmra.mrb[8].mxu1 %vm3930_vm5, %v8122_v28  ;;  %v7194_v28 = vld [vmem:[%s10749_s14 + $0xe] sm:$0x3] }
 0x43b   : > { %4782 = vmatpush1.bf16.msra.mxu1 %v4776_v32  ;;  %4735 = vmatprep.mubr.bf16.mxu1 %v10757_v6  ;;  %v5263_v32 = vpop.permute.xlu0 %5262  ;;  %v10079_v36 = vrot.slane %v7194_v28, %v8442_v38  ;;  %v8134_v38 = vld [vmem:[%s10744_s9 + $0x70] sm:$0xff]  }
 0x43c   : > { %7165 = vmatprep.subr.msk.bf16.mxu1 %vm3858_vm1, %v4865_v30  ;;  %v5265_v30 = vpop.permute.xlu1 %5264 }
 0x43d   : > { %v5268_v33 = vsel %vm5266_vm10, %v5265_v30, %v5263_v32  ;;  %10773 = vst [vmem:[#allocation6_spill] sm:$0xff] %v10079_v36 }
 0x43f   : > { %v5287_v45 = vpop.permute.xlu0 %5286 }
 0x442   : > { %7149 = vmatmul.mubr.msk.bf16.gmra.mrb[12].mxu1 %vm3930_vm5, %v8123_v40  ;;  %v5283_v40 = vmul.f32 %v10079_v36, %v5268_v33 }
 0x443   : > { %4813 = vmatprep.mubr.bf16.mxu1 %v10757_v6 }
 0x444   : > { %v5285_v44 = vpack.c.bf16 %v5283_v40, %v5283_v40 }
 0x44a   : > { %7156 = vmatmul.mubr.msk.bf16.vlgmr.msra.gmra.mrb[8].mxu1 %vm3851_vm3, %v8124_v46  ;;  %v5267_v46 = vsel %vm5266_vm10, %v5263_v32, %v5265_v30  ;;  %v3778_v30 = vpop.f32.mrb[7].mxu0 }
 0x44b   : > { %4904 = vmatpush1.bf16.msra.mxu1 %v4898_v47  ;;  %4823 = vmatprep.mubr.bf16.mxu1 %v10757_v6  ;;  %v5289_v47 = vpop.permute.xlu1 %5288 }
 0x44c   : > { %4991 = vmatprep.subr.bf16.mxu1 %v4989_v49  ;;  %v10094_v49 = vrot.slane %v7194_v28, %v8581_v27  ;;  %v5290_v13 = vsel %vm5266_vm10, %v5287_v45, %v5289_v47  ;;  %v8136_v27 = vld [vmem:[%s10745_s10 + $0x70] sm:$0xff]  }
 0x44e   : > { %10774 = vst [vmem:[#allocation7_spill] sm:$0xff] %v10094_v49  ;;  %v5282_v39 = vmul.f32 %v10094_v49, %v5267_v46 }
 0x44f   : > { %v5475_v2 = vpop.permute.xlu1 %5474 }
 0x450   : > { %v5284_v10 = vpack.c.bf16 %v5282_v39, %v5282_v39 }
 0x452   : > { %7157 = vmatmul.mubr.msk.bf16.gmra.mrb[12].mxu1 %vm3851_vm3, %v8125_v57  ;;  %v5291_v57 = vsel %vm5266_vm10, %v5289_v47, %v5287_v45  ;;  %v5318_v4 = vsel %vm3858_vm1, %v5284_v10, 0 }
 0x453   : > { %4935 = vmatprep.mubr.bf16.mxu1 %v10757_v6  ;;  %v5293_v52 = vmul.f32 %v5291_v57, %v10079_v36  ;;  %v5499_v40 = vpop.permute.xlu1 %5498 }
 0x455   : > { %v5295_v59 = vpack.c.bf16 %v5293_v52, %v5293_v52  ;;  %v8137_v52 = vld [vmem:[%s10745_s10 + $0x78] sm:$0xff]  }
 0x457   : > { %v5409_v63 = vand.u32 %v5295_v59, %v9773_v12 }
 0x45a   : > { %7166 = vmatmul.mubr.msk.bf16.vlgmr.msra.gmra.mrb[8].mxu1 %vm3930_vm5, %v8126_v17  ;;  %v5473_v17 = vpop.permute.xlu0 %5472 }
 0x45b   : > { %4992 = vmatpush1.bf16.msra.mxu1 %v4986_v34  ;;  %4945 = vmatprep.mubr.bf16.mxu1 %v10757_v6  ;;  %v5478_v34 = vsel %vm5476_vm11, %v5475_v2, %v5473_v17  ;;  %v5477_v33 = vsel %vm5476_vm11, %v5473_v17, %v5475_v2 }
 0x45c   : > { %7183 = vmatprep.subr.msk.bf16.mxu1 %vm3858_vm1, %v5075_v50  ;;  %v5292_v50 = vmul.f32 %v5290_v13, %v10094_v49  ;;  %v8140_v13 = vld [vmem:[%s10745_s10 + $0x80] sm:$0xff]  }
 0x45e   : > { %v5294_v15 = vpack.c.bf16 %v5292_v50, %v5292_v50  ;;  %v5497_v58 = vpop.permute.xlu0 %5496 }
 0x45f   : > { %v5500_v39 = vsel %vm5476_vm11, %v5497_v58, %v5499_v40 }
 0x460   : > { %v5502_v10 = vmul.f32 %v5500_v39, %v10152_v42 }
 0x462   : > { %7167 = vmatmul.mubr.msk.bf16.gmra.mrb[12].mxu1 %vm3930_vm5, %v8127_v11  ;;  %v5493_v11 = vmul.f32 %v10125_v21, %v5478_v34  ;;  %v5504_v59 = vpack.c.bf16 %v5502_v10, %v5502_v10 }
 0x463   : > { %5023 = vmatprep.mubr.bf16.mxu1 %v10757_v6 }
 0x46a   : > { %7174 = vmatmul.mubr.msk.bf16.vlgmr.msra.gmra.mrb[8].mxu1 %vm3851_vm3, %v8128_v22  ;;  %v3688_v22 = vld [vmem:[%s10743_s8 + $0x18] sm:$0xff] }
 0x46b   : > { %5114 = vmatpush1.bf16.msra.mxu1 %v5108_v24  ;;  %5033 = vmatprep.mubr.bf16.mxu1 %v10757_v6  ;;  %v3687_v24 = vld [vmem:[%s10743_s8 + $0x10] sm:$0xff]  ;;  %v3784_v28 = vadd.f32 %v7281_v25, %v3688_v22 }
 0x46c   : > { %5201 = vmatprep.subr.bf16.mxu1 %v5199_v56  ;;  %v5495_v56 = vpack.c.bf16 %v5493_v11, %v5493_v11  ;;  %v3779_v32 = vadd.f32 %v3778_v30, %v3687_v24 }
 0x46d   : > { %5731 = vperm.xlu0 %7504, %v3784_v28  }
 0x46e   : > { %5726 = vperm.xlu1 %7505, %v3779_v32  }
 0x472   : > { %7175 = vmatmul.mubr.msk.bf16.gmra.mrb[12].mxu1 %vm3851_vm3, %v8129_v26  ;;  %v5406_v26 = vand.u32 %v5294_v15, %v9773_v12 }
 0x473   : > { %5145 = vmatprep.mubr.bf16.mxu1 %v10757_v6 }
 0x47a   : > { %7184 = vmatmul.mubr.msk.bf16.vlgmr.msra.gmra.mrb[8].mxu1 %vm3930_vm5, %v8130_v43  ;;  %v8135_v43 = vld [vmem:[%s10744_s9 + $0x78] sm:$0xff]  }
 0x47b   : > { %5202 = vmatpush1.bf16.msra.mxu1 %v5196_v18  ;;  %5155 = vmatprep.mubr.bf16.mxu1 %v10757_v6  ;;  %v5492_v18 = vmul.f32 %v10152_v42, %v5477_v33 }
 0x47c   : > { %7201 = vmatprep.subr.msk.bf16.mxu1 %vm3858_vm1, %v5285_v44  ;;  %v5501_v44 = vsel %vm5476_vm11, %v5499_v40, %v5497_v58 }
 0x47d   : > { %v5503_v45 = vmul.f32 %v5501_v44, %v10125_v21  ;;  %v5494_v46 = vpack.c.bf16 %v5492_v18, %v5492_v18 }
 0x47f   : > { %v5505_v47 = vpack.c.bf16 %v5503_v45, %v5503_v45 }
 0x481   : > { %v5619_v57 = vand.u32 %v5505_v47, %v9773_v12 }
 0x482   : > { %7185 = vmatmul.mubr.msk.bf16.gmra.mrb[12].mxu1 %vm3930_vm5, %v8131_v55  ;;  %v5528_v55 = vsel %vm3858_vm1, %v5494_v46, 0 }
 0x483   : > { %5233 = vmatprep.mubr.bf16.mxu1 %v10757_v6 }
 0x48a   : > { %7192 = vmatmul.mubr.msk.bf16.vlgmr.msra.gmra.mrb[8].mxu1 %vm3851_vm3, %v8132_v60  ;;  %v8138_v60 = vld [vmem:[%s10744_s9 + $0x80] sm:$0xff]  }
 0x48b   : > { %5324 = vmatpush1.bf16.msra.mxu1 %v5318_v4  ;;  %5243 = vmatprep.mubr.bf16.mxu1 %v10757_v6  ;;  %v5616_v4 = vand.u32 %v5504_v59, %v9773_v12  ;;  %v8141_v12 = vld [vmem:[%s10745_s10 + $0x88] sm:$0xff]  }
 0x48c   : > { %5411 = vmatprep.subr.bf16.mxu1 %v5409_v63  ;;  %v8139_v63 = vld [vmem:[%s10744_s9 + $0x88] sm:$0xff]  }
 0x492   : > { %7193 = vmatmul.mubr.msk.bf16.gmra.mrb[12].mxu1 %vm3851_vm3, %v8133_v0  ;;  %v5694_v0 = vpop.permute.xlu1 %5693  ;;  %v5689_v1 = vpop.permute.xlu0 %5688 }
 0x493   : > { %5355 = vmatprep.mubr.bf16.mxu1 %v10757_v6 }
 0x496   : > { %v10199_v2 = vpop.permute.xlu1 %5698  ;;  %v10201_v17 = vpop.permute.xlu0 %5703 }
 0x49a   : > { %7202 = vmatmul.mubr.msk.bf16.vlgmr.msra.gmra.mrb[8].mxu1 %vm3930_vm5, %v8134_v38 }
 0x49b   : > { %5412 = vmatpush1.bf16.msra.mxu1 %v5406_v26  ;;  %5365 = vmatprep.mubr.bf16.mxu1 %v10757_v6 }
 0x49c   : > { %7219 = vmatprep.subr.msk.bf16.mxu1 %vm3858_vm1, %v5495_v56 }
 0x4a2   : > { %7203 = vmatmul.mubr.msk.bf16.gmra.mrb[12].mxu1 %vm3930_vm5, %v8135_v43 }
 0x4a3   : > { %5443 = vmatprep.mubr.bf16.mxu1 %v10757_v6 }
 0x4aa   : > { %7210 = vmatmul.mubr.msk.bf16.vlgmr.msra.gmra.mrb[8].mxu1 %vm3851_vm3, %v8136_v27 }
 0x4ab   : > { %5534 = vmatpush1.bf16.msra.mxu1 %v5528_v55  ;;  %5453 = vmatprep.mubr.bf16.mxu1 %v10757_v6 }
 0x4ac   : > { %5621 = vmatprep.subr.bf16.mxu1 %v5619_v57 }
 0x4b2   : > { %7211 = vmatmul.mubr.msk.bf16.gmra.mrb[12].mxu1 %vm3851_vm3, %v8137_v52 }
 0x4b3   : > { %5565 = vmatprep.mubr.bf16.mxu1 %v10757_v6 }
 0x4b5   : > { %v5722_v19 = vpop.permute.xlu0 %5721 }
 0x4b7   : > { %v5717_v5 = vpop.permute.xlu1 %5716 }
 0x4ba   : > { %7220 = vmatmul.mubr.msk.bf16.vlgmr.msra.gmra.mrb[8].mxu1 %vm3930_vm5, %v8138_v60 }
 0x4bb   : > { %5622 = vmatpush1.bf16.msra.mxu1 %v5616_v4  ;;  %5575 = vmatprep.mubr.bf16.mxu1 %v10757_v6 }
 0x4c2   : > { %7221 = vmatmul.mubr.msk.bf16.gmra.mrb[12].mxu1 %vm3930_vm5, %v8139_v63 }
 0x4c3   : > { %5653 = vmatprep.mubr.bf16.mxu1 %v10757_v6 }
 0x4ca   : > { %7228 = vmatmul.mubr.msk.bf16.vlgmr.msra.gmra.mrb[8].mxu1 %vm3851_vm3, %v8140_v13 }
 0x4cb   : > { %5663 = vmatprep.mubr.bf16.mxu1 %v10757_v6 }
 0x4d2   : > { %7229 = vmatmul.mubr.msk.bf16.gmra.mrb[12].mxu1 %vm3851_vm3, %v8141_v12 }
 0x4d3   : > { %5908 = vmatprep.mubr.bf16.mxu1 %v10757_v6 }
 0x4ec   : > { %v5732_v4 = vpop.permute.xlu0 %5731 }
 0x4ed   : > { %v5727_v52 = vpop.permute.xlu1 %5726 }
 0x59d   : > { %v5655_v50 = vpop.f32.mrb[8].mxu1 }
 0x59e   : > { %v5706_v34 = vadd.f32 %v5689_v1, %v5655_v50  ;;  %v5657_v29 = vpop.f32.mrb[9].mxu1 }
 0x59f   : > { %v5659_v11 = vpop.f32.mrb[10].mxu1  ;;  %v5707_v56 = vadd.f32 %v5689_v1, %v5657_v29 }
 0x5a0   : > { %v5734_v14 = vadd.f32 %v5717_v5, %v5706_v34  ;;  %v5708_v15 = vadd.f32 %v5694_v0, %v5659_v11  ;;  %v5661_v48 = vpop.f32.mrb[11].mxu1 }
 0x5a1   : > { %v5709_v28 = vadd.f32 %v5694_v0, %v5661_v48  ;;  %v5735_v32 = vadd.f32 %v5717_v5, %v5707_v56 }
 0x5a2   : > { %v7230_v38 = vmul.f32 -1.442695, %v5734_v14  ;;  %v5736_v20 = vadd.f32 %v5722_v19, %v5708_v15 }
 0x5a3   : > { %v5737_v58 = vadd.f32 %v5722_v19, %v5709_v28  ;;  %v7231_v40 = vmul.f32 -1.442695, %v5735_v32 }
 0x5a4   : > { %8142 = vpow2.f32 %v7230_v38  ;;  %v7232_v22 = vmul.f32 -1.442695, %v5736_v20 }
 0x5a5   : > { %v5665_v24 = vpop.f32.mrb[12].mxu1  ;;  %v7233_v18 = vmul.f32 -1.442695, %v5737_v58 }
 0x5a6   : > { %8144 = vpow2.f32 %v7232_v22  ;;  %v5667_v25 = vpop.f32.mrb[13].mxu1  ;;  %v5710_v46 = vadd.f32 %v10199_v2, %v5665_v24 }
 0x5a7   : > { %v5669_v26 = vpop.f32.mrb[14].mxu1  ;;  %v5711_v34 = vadd.f32 %v10199_v2, %v5667_v25 }
 0x5a8   : > { %v5671_v30 = vpop.f32.mrb[15].mxu1  ;;  %v5712_v57 = vadd.f32 %v10201_v17, %v5669_v26  ;;  %v5738_v60 = vadd.f32 %v5727_v52, %v5710_v46 }
 0x5a9   : > { %v5739_v19 = vadd.f32 %v5727_v52, %v5711_v34 }
 0x5aa   : > { %v5740_v13 = vadd.f32 %v5732_v4, %v5712_v57  ;;  %v7234_v0 = vmul.f32 -1.442695, %v5738_v60 }
 0x5ab   : > { %v7235_v22 = vmul.f32 -1.442695, %v5739_v19 }
 0x5ac   : > { %v7236_v1 = vmul.f32 -1.442695, %v5740_v13 }
 0x5ae   : > { %v8143_v33 = vpop.eup %8142 }
 0x5af   : > { %v5766_v43 = vadd.f32 1.0, %v8143_v33 }
 0x5b0   : > { %v8145_v44 = vpop.eup %8144 }
 0x5b1   : > { %8146 = vrcp.f32 %v5766_v43  ;;  %v5768_v45 = vadd.f32 1.0, %v8145_v44 }
 0x5b2   : > { %8148 = vpow2.f32 %v7231_v40 }
 0x5b3   : > { %8150 = vrcp.f32 %v5768_v45 }
 0x5b4   : > { %8152 = vpow2.f32 %v7233_v18 }
 0x5bb   : > { %v8147_v47 = vpop.eup %8146 }
 0x5bc   : > { %v8149_v27 = vpop.eup %8148  ;;  %v10204_v55 = vmul.f32 %v8147_v47, %v5734_v14  ;;  %v5713_v14 = vadd.f32 %v10201_v17, %v5671_v30 }
 0x5bd   : > { %v8151_v39 = vpop.eup %8150  ;;  %v5767_v63 = vadd.f32 1.0, %v8149_v27 }
 0x5be   : > { %v8153_v10 = vpop.eup %8152  ;;  %v10207_v59 = vmul.f32 %v8151_v39, %v5736_v20  ;;  %5835 = vrot.lane.b32.xlu1 %v10204_v55, %s8209_s29  ;;  %v5741_v38 = vadd.f32 %v5732_v4, %v5713_v14  ;;  %v6525_v39 = vld [vmem:[%s10748_s13] sm:$0x3] }
 0x5bf   : > { %v5769_v12 = vadd.f32 1.0, %v8153_v10  ;;  %8154 = vrcp.f32 %v5767_v63 }
 0x5c0   : > { %5837 = vrot.lane.b32.xlu0 %v10207_v59, %s8209_s29  ;;  %v7237_v17 = vmul.f32 -1.442695, %v5741_v38 }
 0x5c1   : > { %8156 = vrcp.f32 %v5769_v12 }
 0x5c2   : > { %5798 = vrot.lane.b32.xlu1 %v10204_v55, %s8208_s21  ;;  %8158 = vpow2.f32 %v7234_v0 }
 0x5c3   : > { %8160 = vpow2.f32 %v7236_v1 }
 0x5c4   : > { %5800 = vrot.lane.b32.xlu0 %v10207_v59, %s8208_s21 }
 0x5c6   : > { %5961 = vrot.lane.b32.xlu1 %v10204_v55, %s8210_s25 }
 0x5c8   : > { %5963 = vrot.lane.b32.xlu0 %v10207_v59, %s8210_s25 }
 0x5c9   : > { %v8155_v50 = vpop.eup %8154 }
 0x5ca   : > { %6045 = vrot.lane.b32.xlu1 %v10204_v55, %s8211_s30  ;;  %v10228_v11 = vmul.f32 %v8155_v50, %v5735_v32 }
 0x5cb   : > { %v8157_v29 = vpop.eup %8156 }
 0x5cc   : > { %6047 = vrot.lane.b32.xlu0 %v10207_v59, %s8211_s30  ;;  %v8159_v5 = vpop.eup %8158  ;;  %v10233_v48 = vmul.f32 %v8157_v29, %v5737_v58 }
 0x5cd   : > { %v8161_v15 = vpop.eup %8160  ;;  %v5770_v2 = vadd.f32 1.0, %v8159_v5 }
 0x5ce   : > { %6189 = vrot.lane.b32.xlu1 %v10204_v55, %s8212_s17  ;;  %v5772_v20 = vadd.f32 1.0, %v8161_v15 }
 0x5cf   : > { %8162 = vrcp.f32 %v5770_v2 }
 0x5d0   : > { %6191 = vrot.lane.b32.xlu0 %v10207_v59, %s8212_s17  ;;  %8164 = vrcp.f32 %v5772_v20 }
 0x5d1   : > { %8166 = vpow2.f32 %v7235_v22 }
 0x5d2   : > { %5843 = vrot.lane.b32.xlu1 %v10228_v11, %s8209_s29  ;;  %8168 = vpow2.f32 %v7237_v17 }
 0x5d4   : > { %5845 = vrot.lane.b32.xlu0 %v10233_v48, %s8209_s29 }
 0x5d6   : > { %5806 = vrot.lane.b32.xlu1 %v10228_v11, %s8208_s21 }
 0x5d8   : > { %5808 = vrot.lane.b32.xlu0 %v10233_v48, %s8208_s21 }
 0x5d9   : > { %v8163_v24 = vpop.eup %8162 }
 0x5da   : > { %5969 = vrot.lane.b32.xlu1 %v10228_v11, %s8210_s25  ;;  %v8165_v56 = vpop.eup %8164  ;;  %v10253_v26 = vmul.f32 %v8163_v24, %v5738_v60 }
 0x5db   : > { %v8167_v25 = vpop.eup %8166  ;;  %v10257_v30 = vmul.f32 %v8165_v56, %v5740_v13 }
 0x5dc   : > { %5971 = vrot.lane.b32.xlu0 %v10233_v48, %s8210_s25  ;;  %v8169_v28 = vpop.eup %8168  ;;  %v5771_v32 = vadd.f32 1.0, %v8167_v25 }
 0x5dd   : > { %v5773_v58 = vadd.f32 1.0, %v8169_v28 }
 0x5de   : > { %6053 = vrot.lane.b32.xlu1 %v10228_v11, %s8211_s30  ;;  %8170 = vrcp.f32 %v5771_v32 }
 0x5df   : > { %8172 = vrcp.f32 %v5773_v58 }
 0x5e0   : > { %6055 = vrot.lane.b32.xlu0 %v10233_v48, %s8211_s30 }
 0x5e2   : > { %6197 = vrot.lane.b32.xlu1 %v10228_v11, %s8212_s17 }
 0x5e4   : > { %6199 = vrot.lane.b32.xlu0 %v10233_v48, %s8212_s17 }
 0x5e6   : > { %5839 = vrot.lane.b32.xlu1 %v10253_v26, %s8209_s29 }
 0x5e8   : > { %5841 = vrot.lane.b32.xlu0 %v10257_v30, %s8209_s29  ;;  %v8171_v33 = vpop.eup %8170 }
 0x5e9   : > { %v8173_v40 = vpop.eup %8172  ;;  %v10277_v43 = vmul.f32 %v8171_v33, %v5739_v19 }
 0x5ea   : > { %5802 = vrot.lane.b32.xlu1 %v10253_v26, %s8208_s21  ;;  %v10281_v44 = vmul.f32 %v8173_v40, %v5741_v38 }
 0x5ec   : > { %5804 = vrot.lane.b32.xlu0 %v10257_v30, %s8208_s21 }
 0x5ee   : > { %5965 = vrot.lane.b32.xlu1 %v10253_v26, %s8210_s25 }
 0x5f0   : > { %5967 = vrot.lane.b32.xlu0 %v10257_v30, %s8210_s25 }
 0x5f2   : > { %6049 = vrot.lane.b32.xlu1 %v10253_v26, %s8211_s30 }
 0x5f4   : > { %6051 = vrot.lane.b32.xlu0 %v10257_v30, %s8211_s30 }
 0x5f6   : > { %6193 = vrot.lane.b32.xlu1 %v10253_v26, %s8212_s17 }
 0x5f8   : > { %6195 = vrot.lane.b32.xlu0 %v10257_v30, %s8212_s17 }
 0x5fa   : > { %5847 = vrot.lane.b32.xlu1 %v10277_v43, %s8209_s29 }
 0x5fc   : > { %5849 = vrot.lane.b32.xlu0 %v10281_v44, %s8209_s29  ;;  %s10779_s29 = smov 111  }
 0x5fe   : > { %6273 = vrot.lane.b32.xlu1 %v10204_v55, %s10777_s28 }
 0x600   : > { %6275 = vrot.lane.b32.xlu0 %v10207_v59, %s10777_s28 }
 0x602   : > { %5810 = vrot.lane.b32.xlu1 %v10277_v43, %s8208_s21 }
 0x604   : > { %5812 = vrot.lane.b32.xlu0 %v10281_v44, %s8208_s21  ;;  %s10778_s21 = smov 112  }
 0x606   : > { %5973 = vrot.lane.b32.xlu1 %v10277_v43, %s8210_s25 }
 0x608   : > { %6283 = vrot.lane.b32.xlu0 %v10233_v48, %s10777_s28 }
 0x60a   : > { %6057 = vrot.lane.b32.xlu1 %v10277_v43, %s8211_s30 }
 0x60c   : > { %5975 = vrot.lane.b32.xlu0 %v10281_v44, %s8210_s25 }
 0x60e   : > { %6201 = vrot.lane.b32.xlu1 %v10277_v43, %s8212_s17 }
 0x610   : > { %6279 = vrot.lane.b32.xlu0 %v10257_v30, %s10777_s28 }
 0x612   : > { %6281 = vrot.lane.b32.xlu1 %v10228_v11, %s10777_s28 }
 0x614   : > { %6059 = vrot.lane.b32.xlu0 %v10281_v44, %s8211_s30 }
 0x616   : > { %6277 = vrot.lane.b32.xlu1 %v10253_v26, %s10777_s28 }
 0x618   : > { %6359 = vrot.lane.b32.xlu0 %v10207_v59, %s10778_s21 }
 0x61a   : > { %6285 = vrot.lane.b32.xlu1 %v10277_v43, %s10777_s28 }
 0x61c   : > { %6367 = vrot.lane.b32.xlu0 %v10233_v48, %s10778_s21 }
 0x61e   : > { %6357 = vrot.lane.b32.xlu1 %v10204_v55, %s10778_s21 }
 0x620   : > { %6363 = vrot.lane.b32.xlu0 %v10257_v30, %s10778_s21 }
 0x622   : > { %6365 = vrot.lane.b32.xlu1 %v10228_v11, %s10778_s21 }
 0x624   : > { %6203 = vrot.lane.b32.xlu0 %v10281_v44, %s8212_s17 }
 0x626   : > { %6361 = vrot.lane.b32.xlu1 %v10253_v26, %s10778_s21 }
 0x628   : > { %6443 = vrot.lane.b32.xlu0 %v10207_v59, %s10779_s29 }
 0x62a   : > { %6369 = vrot.lane.b32.xlu1 %v10277_v43, %s10778_s21 }
 0x62c   : > { %6287 = vrot.lane.b32.xlu0 %v10281_v44, %s10777_s28 }
 0x62e   : > { %6441 = vrot.lane.b32.xlu1 %v10204_v55, %s10779_s29 }
 0x630   : > { %v5836_v18 = vpop.permute.xlu1 %5835  ;;  %6451 = vrot.lane.b32.xlu0 %v10233_v48, %s10779_s29 }
 0x632   : > { %v5838_v45 = vpop.permute.xlu0 %5837  ;;  %6449 = vrot.lane.b32.xlu1 %v10228_v11, %s10779_s29 }
 0x634   : > { %v10341_v46 = vpop.permute.xlu1 %5798  ;;  %6371 = vrot.lane.b32.xlu0 %v10281_v44, %s10778_s21 }
 0x636   : > { %v10345_v47 = vpop.permute.xlu0 %5800  ;;  %6445 = vrot.lane.b32.xlu1 %v10253_v26, %s10779_s29 }
 0x638   : > { %v10349_v27 = vpop.permute.xlu1 %5961  ;;  %6447 = vrot.lane.b32.xlu0 %v10257_v30, %s10779_s29 }
 0x63a   : > { %v10353_v57 = vpop.permute.xlu0 %5963  ;;  %6453 = vrot.lane.b32.xlu1 %v10277_v43, %s10779_s29 }
 0x63c   : > { %v6046_v52 = vpop.permute.xlu1 %6045  ;;  %6455 = vrot.lane.b32.xlu0 %v10281_v44, %s10779_s29 }
 0x63e   : > { %v6048_v10 = vpop.permute.xlu0 %6047  ;;  %6528 = vperm.xlu1 %7505, %v6525_v39  }
 0x640   : > { %v6190_v60 = vpop.permute.xlu1 %6189 }
 0x642   : > { %v6192_v4 = vpop.permute.xlu0 %6191 }
 0x644   : > { %v5844_v63 = vpop.permute.xlu1 %5843 }
 0x645   : > { %v5851_v13 = vsel %vm4000_vm2, %v5836_v18, %v5844_v63  ;;  %v5855_v12 = vsel %vm4000_vm2, %v5844_v63, %v5836_v18 }
 0x646   : > { %v5846_v0 = vpop.permute.xlu0 %5845  ;;  %v5859_v34 = vmul.f32 %v5855_v12, %v9798_v41  ;;  %v5860_v29 = vmul.f32 %v5851_v13, %v9768_v8 }
 0x647   : > { %v5852_v1 = vsel %vm4000_vm2, %v5838_v45, %v5846_v0  ;;  %v5856_v50 = vsel %vm4000_vm2, %v5846_v0, %v5838_v45 }
 0x648   : > { %v5861_v5 = vmul.f32 %v5856_v50, %v9798_v41  ;;  %v5862_v14 = vmul.f32 %v5852_v1, %v9768_v8  ;;  %v10374_v15 = vpop.permute.xlu1 %5806 }
 0x64a   : > { %v5867_v19 = vpack.c.bf16 %v5861_v5, %v5859_v34  ;;  %v5809_v2 = vpop.permute.xlu0 %5808  ;;  %v5868_v38 = vpack.c.bf16 %v5862_v14, %v5860_v29 }
 0x64b   : > { %v5819_v34 = vsel %vm3804_vm0, %v5809_v2, %v10345_v47 }
 0x64c   : > { %v10376_v20 = vpop.permute.xlu1 %5969  ;;  %5876 = vmatprep.subr.bf16.mxu1 %v5868_v38 }
 0x64d   : > { %v5981_v22 = vsel %vm4210_vm6, %v10376_v20, %v10349_v27  ;;  %5877 = vmatpush1.bf16.msra.mxu1 %v5867_v19 }
 0x64e   : > { %v5972_v17 = vpop.permute.xlu0 %5971  ;;  %v10386_v56 = vmul.f32 %v5981_v22, %v9856_v3 }
 0x64f   : > { %v5982_v24 = vsel %vm4210_vm6, %v5972_v17, %v10353_v57 }
 0x650   : > { %v10389_v25 = vmul.f32 %v5982_v24, %v9856_v3  ;;  %v6054_v28 = vpop.permute.xlu1 %6053 }
 0x651   : > { %v6061_v32 = vsel %vm4420_vm7, %v6046_v52, %v6054_v28  ;;  %v6065_v58 = vsel %vm4420_vm7, %v6054_v28, %v6046_v52 }
 0x652   : > { %v6056_v40 = vpop.permute.xlu0 %6055  ;;  %v10402_v39 = vmul.f32 %v6065_v58, %v9902_v35  ;;  %v10405_v63 = vmul.f32 %v6061_v32, %v9887_v31 }
 0x653   : > { %v6062_v18 = vsel %vm4420_vm7, %v6048_v10, %v6056_v40  ;;  %v6066_v45 = vsel %vm4420_vm7, %v6056_v40, %v6048_v10 }
 0x654   : > { %v10408_v13 = vmul.f32 %v6066_v45, %v9902_v35  ;;  %v10411_v52 = vmul.f32 %v6062_v18, %v9887_v31  ;;  %v6198_v12 = vpop.permute.xlu1 %6197 }
 0x655   : > { %v6205_v0 = vsel %vm4846_vm8, %v6190_v60, %v6198_v12  ;;  %v6209_v1 = vsel %vm4846_vm8, %v6198_v12, %v6190_v60 }
 0x656   : > { %v6200_v50 = vpop.permute.xlu0 %6199  ;;  %v10426_v14 = vmul.f32 %v6205_v0, %v9990_v37  ;;  %v10429_v19 = vmul.f32 %v6209_v1, %v9975_v16 }
 0x657   : > { %v6206_v29 = vsel %vm4846_vm8, %v6192_v4, %v6200_v50  ;;  %v6210_v5 = vsel %vm4846_vm8, %v6200_v50, %v6192_v4  ;;  %v5815_v50 = vsel %vm3804_vm0, %v10345_v47, %v5809_v2  ;;  %v5814_v4 = vsel %vm3804_vm0, %v10341_v46, %v10374_v15 }
 0x658   : > { %v10432_v60 = vmul.f32 %v6206_v29, %v9990_v37  ;;  %v10435_v38 = vmul.f32 %v6210_v5, %v9975_v16  ;;  %v5840_v22 = vpop.permute.xlu1 %5839  ;;  %v5825_v33 = vmul.f32 %v5815_v50, %v9749_v23  ;;  %v5818_v47 = vsel %vm3804_vm0, %v10374_v15, %v10341_v46 }
 0x659   : > { %v5823_v2 = vmul.f32 %v5814_v4, %v9749_v23 }
 0x65a   : > { %v5842_v28 = vpop.permute.xlu0 %5841 }
 0x65c   : > { %v5803_v32 = vpop.permute.xlu1 %5802 }
 0x65e   : > { %v5805_v58 = vpop.permute.xlu0 %5804 }
 0x660   : > { %v5966_v40 = vpop.permute.xlu1 %5965 }
 0x662   : > { %v10441_v18 = vpop.permute.xlu0 %5967 }
 0x664   : > { %v10443_v45 = vpop.permute.xlu1 %6049 }
 0x666   : > { %v10445_v12 = vpop.permute.xlu0 %6051 }
 0x668   : > { %v10447_v0 = vpop.permute.xlu1 %6193 }
 0x66a   : > { %v10449_v1 = vpop.permute.xlu0 %6195 }
 0x66c   : > { %v5848_v29 = vpop.permute.xlu1 %5847 }
 0x66d   : > { %v5853_v5 = vsel %vm4000_vm2, %v5840_v22, %v5848_v29  ;;  %v5857_v24 = vsel %vm4000_vm2, %v5848_v29, %v5840_v22 }
 0x66e   : > { %v5850_v10 = vpop.permute.xlu0 %5849  ;;  %v5863_v22 = vmul.f32 %v5857_v24, %v9798_v41  ;;  %v5864_v29 = vmul.f32 %v5853_v5, %v9768_v8  ;;  %v5824_v24 = vmul.f32 %v5819_v34, %v9746_v61 }
 0x66f   : > { %v5854_v6 = vsel %vm4000_vm2, %v5842_v28, %v5850_v10  ;;  %v5858_v42 = vsel %vm4000_vm2, %v5850_v10, %v5842_v28 }
 0x670   : > { %v5865_v21 = vmul.f32 %v5858_v42, %v9798_v41  ;;  %v5866_v49 = vmul.f32 %v5854_v6, %v9768_v8  ;;  %v10474_v36 = vpop.permute.xlu1 %6273  ;;  %v5978_v41 = vsel %vm4210_vm6, %v10353_v57, %v5972_v17  ;;  %v5831_v8 = vpack.c.bf16 %v5825_v33, %v5823_v2 }
 0x671   : > { %v5822_v42 = vmul.f32 %v5818_v47, %v9746_v61  ;;  %v5977_v57 = vsel %vm4210_vm6, %v10349_v27, %v10376_v20  ;;  %v5988_v33 = vmul.f32 %v5978_v41, %v9841_v7  ;;  %v10780_v20 = vmov 0  }
 0x672   : > { %v5869_v50 = vpack.c.bf16 %v5865_v21, %v5863_v22  ;;  %v10481_v9 = vpop.permute.xlu0 %6275  ;;  %v5870_v10 = vpack.c.bf16 %v5866_v49, %v5864_v29  ;;  %v7238_v49 = vld [vmem:[%s10747_s12 + $0x1] sm:$0x1]  ;;  %v5986_v29 = vmul.f32 %v5977_v57, %v9841_v7  ;;  %v10781_v57 = vpack.c.bf16 %v10389_v25, %v10386_v56  ;;  %v7241_v56 = vld [vmem:[%s10747_s12 + $0x2] sm:$0x1] }
 0x673   : > { %v5830_v17 = vpack.c.bf16 %v5824_v24, %v5822_v42  ;;  %v5834_v24 = vld [vmem:[%s10747_s12] sm:$0x1]  ;;  %v10782_v25 = vpack.c.bf16 %v10411_v52, %v10405_v63 }
 0x674   : > { %v5811_v6 = vpop.permute.xlu1 %5810  ;;  %5878 = vmatprep.subr.bf16.mxu1 %v5870_v10  ;;  %v5994_v10 = vpack.c.bf16 %v5988_v33, %v5986_v29 }
 0x675   : > { %v5816_v46 = vsel %vm3804_vm0, %v5803_v32, %v5811_v6  ;;  %v5820_v21 = vsel %vm3804_vm0, %v5811_v6, %v5803_v32  ;;  %5879 = vmatpush1.bf16.msra.mxu1 %v5869_v50 }
 0x676   : > { %5920 = vmatprep.subr.bf16.mxu1 %v5831_v8  ;;  %v5813_v15 = vpop.permute.xlu0 %5812  ;;  %v5826_v4 = vmul.f32 %v5820_v21, %v9746_v61  ;;  %v5827_v32 = vmul.f32 %v5816_v46, %v9749_v23 }
 0x677   : > { %v5817_v34 = vsel %vm3804_vm0, %v5805_v58, %v5813_v15  ;;  %v5821_v28 = vsel %vm3804_vm0, %v5813_v15, %v5805_v58 }
 0x678   : > { %v5828_v5 = vmul.f32 %v5821_v28, %v9746_v61  ;;  %v5829_v22 = vmul.f32 %v5817_v34, %v9749_v23  ;;  %v5974_v27 = vpop.permute.xlu1 %5973  ;;  %7239 = vmatmul.mubr.msk.bf16.vlgmr.msra.gmra.mrb[16].mxu1 %vm3689_vm4, %v7238_v49 }
 0x679   : > { %5921 = vmatpush1.bf16.msra.mxu1 %v5830_v17  ;;  %5952 = vmatprep.mubr.bf16.mxu1 %v10780_v20  ;;  %v5979_v61 = vsel %vm4210_vm6, %v5966_v40, %v5974_v27  ;;  %v5983_v23 = vsel %vm4210_vm6, %v5974_v27, %v5966_v40  ;;  %v10783_v27 = vpack.c.bf16 %v10408_v13, %v10402_v39  ;;  %v7243_v39 = vld [vmem:[%s10747_s12 + $0x3] sm:$0x1] }
 0x67a   : > { %v5832_v47 = vpack.c.bf16 %v5828_v5, %v5826_v4  ;;  %v10511_v2 = vpop.permute.xlu0 %6283  ;;  %v5833_v58 = vpack.c.bf16 %v5829_v22, %v5827_v32  ;;  %v5989_v42 = vmul.f32 %v5983_v23, %v9856_v3  ;;  %v5990_v46 = vmul.f32 %v5979_v61, %v9841_v7 }
 0x67b   : > { %v6129_v13 = vmul.f32 %v10204_v55, %v9916_v51  ;;  %v6135_v61 = vmul.f32 %v10257_v30, %v9916_v51 }
 0x67c   : > { %v6058_v50 = vpop.permute.xlu1 %6057  ;;  %5922 = vmatprep.subr.bf16.mxu1 %v5833_v58 }
 0x67d   : > { %5923 = vmatpush1.bf16.msra.mxu1 %v5832_v47  ;;  %v6130_v47 = vmul.f32 %v10228_v11, %v9919_v53 }
 0x67e   : > { %6002 = vmatprep.subr.bf16.mxu1 %v5994_v10  ;;  %v5976_v41 = vpop.permute.xlu0 %5975 }
 0x67f   : > { %v5980_v6 = vsel %vm4210_vm6, %v10441_v18, %v5976_v41  ;;  %v5984_v8 = vsel %vm4210_vm6, %v5976_v41, %v10441_v18 }
 0x680   : > { %v5991_v40 = vmul.f32 %v5984_v8, %v9856_v3  ;;  %v5992_v21 = vmul.f32 %v5980_v6, %v9841_v7  ;;  %v6202_v49 = vpop.permute.xlu1 %6201  ;;  %7240 = vmatmul.mubr.msk.bf16.vlgmr.msra.gmra.mrb[20].mxu1 %vm3689_vm4, %v5834_v24  ;;  %v6063_v3 = vsel %vm4420_vm7, %v10443_v45, %v6058_v50  ;;  %v6067_v7 = vsel %vm4420_vm7, %v6058_v50, %v10443_v45 }
 0x681   : > { %6003 = vmatpush1.bf16.msra.mxu1 %v10781_v57  ;;  %6034 = vmatprep.mubr.bf16.mxu1 %v10780_v20  ;;  %v6132_v45 = vmul.f32 %v10233_v48, %v9919_v53  ;;  %v6073_v32 = vmul.f32 %v6067_v7, %v9902_v35  ;;  %v6074_v5 = vmul.f32 %v6063_v3, %v9887_v31 }
 0x682   : > { %v5995_v15 = vpack.c.bf16 %v5991_v40, %v5989_v42  ;;  %v10535_v17 = vpop.permute.xlu0 %6279  ;;  %v5996_v18 = vpack.c.bf16 %v5992_v21, %v5990_v46  ;;  %v6136_v50 = vmul.f32 %v10281_v44, %v9919_v53  ;;  %v6133_v24 = vmul.f32 %v10253_v26, %v9916_v51 }
 0x683   : > { %v6138_v58 = vpack.c.bf16 %v6132_v45, %v6130_v47  ;;  %v6211_v30 = vsel %vm4846_vm8, %v6202_v49, %v10447_v0  ;;  %v6294_v26 = vsel %vm5056_vm9, %v10511_v2, %v10481_v9  ;;  %v10784_v42 = vpack.c.bf16 %v10435_v38, %v10429_v19 }
 0x684   : > { %v6282_v33 = vpop.permute.xlu1 %6281  ;;  %6004 = vmatprep.subr.bf16.mxu1 %v5996_v18  ;;  %v6139_v41 = vpack.c.bf16 %v6135_v61, %v6133_v24  ;;  %v10785_v18 = vpack.c.bf16 %v10432_v60, %v10426_v14 }
 0x685   : > { %6005 = vmatpush1.bf16.msra.mxu1 %v5995_v15  ;;  %v6293_v6 = vsel %vm5056_vm9, %v6282_v33, %v10474_v36  ;;  %v6289_v46 = vsel %vm5056_vm9, %v10474_v36, %v6282_v33  ;;  %v6290_v36 = vsel %vm5056_vm9, %v10481_v9, %v10511_v2  ;;  %v10786_v33 = vld [vmem:[#allocation5_spill] sm:$0xff] }
 0x686   : > { %6086 = vmatprep.subr.bf16.mxu1 %v10782_v25  ;;  %v6060_v34 = vpop.permute.xlu0 %6059  ;;  %v6298_v57 = vmul.f32 %v6293_v6, %v10021_v62  ;;  %v6299_v25 = vmul.f32 %v6290_v36, %v10786_v33 }
 0x687   : > { %v6064_v28 = vsel %vm4420_vm7, %v10445_v12, %v6060_v34  ;;  %v6068_v4 = vsel %vm4420_vm7, %v6060_v34, %v10445_v12  ;;  %v7247_v34 = vld [vmem:[%s10747_s12 + $0x5] sm:$0x1] }
 0x688   : > { %v6075_v22 = vmul.f32 %v6068_v4, %v9902_v35  ;;  %v6076_v63 = vmul.f32 %v6064_v28, %v9887_v31  ;;  %v10561_v52 = vpop.permute.xlu1 %6277  ;;  %7242 = vmatmul.mubr.msk.bf16.vlgmr.msra.gmra.mrb[24].mxu1 %vm3689_vm4, %v7241_v56  ;;  %v6131_v31 = vmul.f32 %v10207_v59, %v9916_v51  ;;  %v6134_v59 = vmul.f32 %v10277_v43, %v9919_v53  ;;  %v7245_v51 = vld [vmem:[%s10747_s12 + $0x4] sm:$0x1] }
 0x689   : > { %6087 = vmatpush1.bf16.msra.mxu1 %v10783_v27  ;;  %6118 = vmatprep.mubr.bf16.mxu1 %v10780_v20  ;;  %v6207_v53 = vsel %vm4846_vm8, %v10447_v0, %v6202_v49  ;;  %v6218_v49 = vmul.f32 %v6211_v30, %v9975_v16  ;;  %v10787_v27 = vld [vmem:[#allocation6_spill] sm:$0xff] }
 0x68a   : > { %v6079_v12 = vpack.c.bf16 %v6075_v22, %v6073_v32  ;;  %v10568_v48 = vpop.permute.xlu0 %6359  ;;  %v6080_v29 = vpack.c.bf16 %v6076_v63, %v6074_v5  ;;  %v6137_v11 = vpack.c.bf16 %v6131_v31, %v6129_v13  ;;  %v6140_v44 = vpack.c.bf16 %v6136_v50, %v6134_v59 }
 0x68b   : > { %v6217_v0 = vmul.f32 %v6207_v53, %v9990_v37 }
 0x68c   : > { %v6286_v35 = vpop.permute.xlu1 %6285  ;;  %6088 = vmatprep.subr.bf16.mxu1 %v6080_v29 }
 0x68d   : > { %6089 = vmatpush1.bf16.msra.mxu1 %v6079_v12  ;;  %v6291_v56 = vsel %vm5056_vm9, %v10561_v52, %v6286_v35  ;;  %v6295_v14 = vsel %vm5056_vm9, %v6286_v35, %v10561_v52 }
 0x68e   : > { %6146 = vmatprep.subr.bf16.mxu1 %v6138_v58  ;;  %v10581_v10 = vpop.permute.xlu0 %6367  ;;  %v6301_v4 = vmul.f32 %v6291_v56, %v10786_v33  ;;  %v6302_v52 = vmul.f32 %v6295_v14, %v10021_v62  ;;  %v10788_v58 = vld [vmem:[#allocation7_spill] sm:$0xff] }
 0x68f   : > { %v6378_v32 = vsel %vm5266_vm10, %v10581_v10, %v10568_v48  ;;  %v6374_v35 = vsel %vm5266_vm10, %v10568_v48, %v10581_v10 }
 0x690   : > { %v6358_v23 = vpop.permute.xlu1 %6357  ;;  %7244 = vmatmul.mubr.msk.bf16.vlgmr.msra.gmra.mrb[28].mxu1 %vm3689_vm4, %v7243_v39 }
 0x691   : > { %6147 = vmatpush1.bf16.msra.mxu1 %v6137_v11  ;;  %6178 = vmatprep.mubr.bf16.mxu1 %v10780_v20  ;;  %v6383_v11 = vmul.f32 %v6374_v35, %v10788_v58 }
 0x692   : > { %v10591_v55 = vpop.permute.xlu0 %6363  ;;  %6148 = vmatprep.subr.bf16.mxu1 %v6140_v44  ;;  %v7249_v44 = vld [vmem:[%s10747_s12 + $0x6] sm:$0x1] }
 0x694   : > { %v6366_v43 = vpop.permute.xlu1 %6365 }
 0x695   : > { %6149 = vmatpush1.bf16.msra.mxu1 %v6139_v41  ;;  %v6377_v60 = vsel %vm5266_vm10, %v6366_v43, %v6358_v23  ;;  %v6373_v5 = vsel %vm5266_vm10, %v6358_v23, %v6366_v43 }
 0x696   : > { %v6204_v8 = vpop.permute.xlu0 %6203  ;;  %6230 = vmatprep.subr.bf16.mxu1 %v10784_v42  ;;  %v6382_v12 = vmul.f32 %v6377_v60, %v10787_v27  ;;  %v6381_v50 = vmul.f32 %v6373_v5, %v10788_v58 }
 0x697   : > { %v6208_v40 = vsel %vm4846_vm8, %v10449_v1, %v6204_v8  ;;  %v6212_v21 = vsel %vm4846_vm8, %v6204_v8, %v10449_v1  ;;  %v6300_v1 = vmul.f32 %v6294_v26, %v10021_v62  ;;  %v10789_v8 = vld [vmem:[#allocation8_spill] sm:$0xff] }
 0x698   : > { %v6219_v19 = vmul.f32 %v6208_v40, %v9990_v37  ;;  %v6220_v38 = vmul.f32 %v6212_v21, %v9975_v16  ;;  %v6362_v15 = vpop.permute.xlu1 %6361  ;;  %7246 = vmatmul.mubr.msk.bf16.vlgmr.msra.gmra.mrb[32].mxu1 %vm3689_vm4, %v7245_v51  ;;  %v6297_v37 = vmul.f32 %v6289_v46, %v10786_v33  ;;  %v6389_v24 = vpack.c.bf16 %v6383_v11, %v6381_v50 }
 0x699   : > { %6231 = vmatpush1.bf16.msra.mxu1 %v10785_v18  ;;  %6262 = vmatprep.mubr.bf16.mxu1 %v10780_v20  ;;  %v6306_v2 = vpack.c.bf16 %v6300_v1, %v6298_v57 }
 0x69a   : > { %v6223_v3 = vpack.c.bf16 %v6219_v19, %v6217_v0  ;;  %v6444_v16 = vpop.permute.xlu0 %6443  ;;  %v6224_v7 = vpack.c.bf16 %v6220_v38, %v6218_v49  ;;  %v6305_v28 = vpack.c.bf16 %v6299_v25, %v6297_v37  ;;  %v10790_v38 = vld [vmem:[#allocation9_spill] sm:$0xff] }
 0x69c   : > { %v6370_v9 = vpop.permute.xlu1 %6369  ;;  %6232 = vmatprep.subr.bf16.mxu1 %v6224_v7 }
 0x69d   : > { %6233 = vmatpush1.bf16.msra.mxu1 %v6223_v3  ;;  %v6379_v61 = vsel %vm5266_vm10, %v6370_v9, %v6362_v15  ;;  %v7251_v3 = vld [vmem:[%s10747_s12 + $0x7] sm:$0x1] }
 0x69e   : > { %v6288_v45 = vpop.permute.xlu0 %6287  ;;  %6314 = vmatprep.subr.bf16.mxu1 %v6306_v2  ;;  %v6386_v43 = vmul.f32 %v6379_v61, %v10787_v27 }
 0x69f   : > { %v6292_v22 = vsel %vm5056_vm9, %v10535_v17, %v6288_v45  ;;  %v6296_v63 = vsel %vm5056_vm9, %v6288_v45, %v10535_v17  ;;  %v6384_v17 = vmul.f32 %v6378_v32, %v10787_v27 }
 0x6a0   : > { %v6303_v29 = vmul.f32 %v6292_v22, %v10786_v33  ;;  %v6304_v47 = vmul.f32 %v6296_v63, %v10021_v62  ;;  %v6442_v31 = vpop.permute.xlu1 %6441  ;;  %7248 = vmatmul.mubr.msk.bf16.vlgmr.msra.gmra.mrb[36].mxu1 %vm3689_vm4, %v7247_v34  ;;  %v6375_v62 = vsel %vm5266_vm10, %v6362_v15, %v6370_v9 }
 0x6a1   : > { %6315 = vmatpush1.bf16.msra.mxu1 %v6305_v28  ;;  %6346 = vmatprep.mubr.bf16.mxu1 %v10780_v20  ;;  %v6390_v48 = vpack.c.bf16 %v6384_v17, %v6382_v12  ;;  %v6385_v41 = vmul.f32 %v6375_v62, %v10788_v58 }
 0x6a2   : > { %v6307_v39 = vpack.c.bf16 %v6303_v29, %v6301_v4  ;;  %v6452_v13 = vpop.permute.xlu0 %6451  ;;  %v6308_v59 = vpack.c.bf16 %v6304_v47, %v6302_v52 }
 0x6a3   : > { %v6462_v30 = vsel %vm5476_vm11, %v6452_v13, %v6444_v16  ;;  %v6458_v21 = vsel %vm5476_vm11, %v6444_v16, %v6452_v13 }
 0x6a4   : > { %v6450_v23 = vpop.permute.xlu1 %6449  ;;  %6316 = vmatprep.subr.bf16.mxu1 %v6308_v59  ;;  %v6467_v1 = vmul.f32 %v6458_v21, %v10790_v38 }
 0x6a5   : > { %v6461_v10 = vsel %vm5476_vm11, %v6450_v23, %v6442_v31  ;;  %6317 = vmatpush1.bf16.msra.mxu1 %v6307_v39  ;;  %v6457_v26 = vsel %vm5476_vm11, %v6442_v31, %v6450_v23 }
 0x6a6   : > { %v6372_v53 = vpop.permute.xlu0 %6371  ;;  %6398 = vmatprep.subr.bf16.mxu1 %v6390_v48  ;;  %v6466_v42 = vmul.f32 %v6461_v10, %v10789_v8  ;;  %v6465_v15 = vmul.f32 %v6457_v26, %v10790_v38 }
 0x6a7   : > { %v6376_v6 = vsel %vm5266_vm10, %v10591_v55, %v6372_v53  ;;  %v6380_v51 = vsel %vm5266_vm10, %v6372_v53, %v10591_v55  ;;  %v6468_v55 = vmul.f32 %v6462_v30, %v10789_v8 }
 0x6a8   : > { %v6387_v0 = vmul.f32 %v6376_v6, %v10788_v58  ;;  %v6388_v46 = vmul.f32 %v6380_v51, %v10787_v27  ;;  %v6446_v40 = vpop.permute.xlu1 %6445  ;;  %7250 = vmatmul.mubr.msk.bf16.vlgmr.msra.gmra.mrb[40].mxu1 %vm3689_vm4, %v7249_v44  ;;  %v6473_v7 = vpack.c.bf16 %v6467_v1, %v6465_v15  ;;  %v8177_v15 = vld.sshfl [vmem:[%s9427_s22] sm:$0x33 pattern:$0x76325410] }
 0x6a9   : > { %6399 = vmatpush1.bf16.msra.mxu1 %v6389_v24  ;;  %6430 = vmatprep.mubr.bf16.mxu1 %v10780_v20  ;;  %v6474_v18 = vpack.c.bf16 %v6468_v55, %v6466_v42 }
 0x6aa   : > { %v6391_v49 = vpack.c.bf16 %v6387_v0, %v6385_v41  ;;  %v6448_v57 = vpop.permute.xlu0 %6447  ;;  %v6392_v19 = vpack.c.bf16 %v6388_v46, %v6386_v43 }
 0x6ac   : > { %v6454_v36 = vpop.permute.xlu1 %6453  ;;  %6400 = vmatprep.subr.bf16.mxu1 %v6392_v19 }
 0x6ad   : > { %v6459_v33 = vsel %vm5476_vm11, %v6446_v40, %v6454_v36  ;;  %v6463_v37 = vsel %vm5476_vm11, %v6454_v36, %v6446_v40  ;;  %6401 = vmatpush1.bf16.msra.mxu1 %v6391_v49 }
 0x6ae   : > { %v6456_v16 = vpop.permute.xlu0 %6455  ;;  %6482 = vmatprep.subr.bf16.mxu1 %v6474_v18  ;;  %v6469_v9 = vmul.f32 %v6459_v33, %v10790_v38  ;;  %v6470_v2 = vmul.f32 %v6463_v37, %v10789_v8 }
 0x6af   : > { %v6460_v56 = vsel %vm5476_vm11, %v6448_v57, %v6456_v16  ;;  %v6464_v25 = vsel %vm5476_vm11, %v6456_v16, %v6448_v57 }
 0x6b0   : > { %v6471_v14 = vmul.f32 %v6460_v56, %v10790_v38  ;;  %v6472_v60 = vmul.f32 %v6464_v25, %v10789_v8  ;;  %7252 = vmatmul.mubr.msk.bf16.vlgmr.msra.gmra.mrb[44].mxu1 %vm3689_vm4, %v7251_v3  ;;  %v6541_v3 = vcombine.high %v8177_v15, %v8177_v15 }
 0x6b1   : > { %6483 = vmatpush1.bf16.msra.mxu1 %v6473_v7  ;;  %6514 = vmatprep.mubr.bf16.mxu1 %v10780_v20 }
 0x6b2   : > { %v6475_v34 = vpack.c.bf16 %v6471_v14, %v6469_v9  ;;  %v6476_v28 = vpack.c.bf16 %v6472_v60, %v6470_v2 }
 0x6b4   : > { %6484 = vmatprep.subr.bf16.mxu1 %v6476_v28 }
 0x6b5   : > { %6485 = vmatpush1.bf16.msra.mxu1 %v6475_v34 }
 0x6b8   : > { %7254 = vmatmul.mubr.msk.bf16.vlgmr.msra.gmra.mrb[48].mxu1 %vm3689_vm4, %v7253_v54 }
 0x6bd   : > { %v6529_v33 = vpop.permute.xlu1 %6528 }
 0x74b   : > { %v5910_v4 = vpop.f32.mrb[16].mxu1 }
 0x74c   : > { %v5912_v45 = vpop.f32.mrb[17].mxu1 }
 0x74d   : > { %v5914_v32 = vpop.f32.mrb[18].mxu1 }
 0x74e   : > { %v5915_v5 = vpop.f32.mrb[19].mxu1 }
 0x753   : > { %v5954_v22 = vpop.f32.mrb[20].mxu1 }
 0x754   : > { %v5955_v63 = vadd.f32 %v5954_v22, %v5910_v4  ;;  %v5956_v52 = vpop.f32.mrb[21].mxu1 }
 0x755   : > { %v5957_v27 = vadd.f32 %v5956_v52, %v5912_v45  ;;  %v5958_v12 = vpop.f32.mrb[22].mxu1 }
 0x756   : > { %v5959_v20 = vpop.f32.mrb[23].mxu1 }
 0x75b   : > { %v6036_v29 = vpop.f32.mrb[24].mxu1 }
 0x75c   : > { %v6043_v47 = vadd.f32 %v6036_v29, %v5955_v63  ;;  %v6038_v31 = vpop.f32.mrb[25].mxu1 }
 0x75d   : > { %v6044_v35 = vadd.f32 %v6038_v31, %v5957_v27  ;;  %v6040_v17 = vpop.f32.mrb[26].mxu1 }
 0x75e   : > { %v6041_v58 = vpop.f32.mrb[27].mxu1 }
 0x763   : > { %v6120_v50 = vpop.f32.mrb[28].mxu1 }
 0x764   : > { %v6127_v39 = vadd.f32 %v6120_v50, %v6043_v47  ;;  %v6122_v13 = vpop.f32.mrb[29].mxu1 }
 0x765   : > { %v6128_v59 = vadd.f32 %v6122_v13, %v6044_v35  ;;  %v6124_v62 = vpop.f32.mrb[30].mxu1 }
 0x766   : > { %v6125_v11 = vpop.f32.mrb[31].mxu1 }
 0x76b   : > { %v6180_v61 = vpop.f32.mrb[32].mxu1 }
 0x76c   : > { %v6187_v23 = vadd.f32 %v6180_v61, %v6127_v39  ;;  %v6182_v48 = vpop.f32.mrb[33].mxu1 }
 0x76d   : > { %v6188_v10 = vadd.f32 %v6182_v48, %v6128_v59  ;;  %v6184_v44 = vpop.f32.mrb[34].mxu1 }
 0x76e   : > { %v6185_v24 = vpop.f32.mrb[35].mxu1 }
 0x773   : > { %v6264_v41 = vpop.f32.mrb[36].mxu1 }
 0x774   : > { %v6271_v53 = vadd.f32 %v6264_v41, %v6187_v23  ;;  %v6266_v43 = vpop.f32.mrb[37].mxu1 }
 0x775   : > { %v6272_v30 = vadd.f32 %v6266_v43, %v6188_v10  ;;  %v6268_v6 = vpop.f32.mrb[38].mxu1 }
 0x776   : > { %v6269_v51 = vpop.f32.mrb[39].mxu1 }
 0x77b   : > { %v6348_v26 = vpop.f32.mrb[40].mxu1 }
 0x77c   : > { %v6355_v8 = vadd.f32 %v6348_v26, %v6271_v53  ;;  %v6350_v42 = vpop.f32.mrb[41].mxu1 }
 0x77d   : > { %v6356_v0 = vadd.f32 %v6350_v42, %v6272_v30  ;;  %v6352_v46 = vpop.f32.mrb[42].mxu1 }
 0x77e   : > { %v6353_v40 = vpop.f32.mrb[43].mxu1 }
 0x783   : > { %v6432_v21 = vpop.f32.mrb[44].mxu1 }
 0x784   : > { %v6439_v55 = vadd.f32 %v6432_v21, %v6355_v8  ;;  %v6434_v49 = vpop.f32.mrb[45].mxu1 }
 0x785   : > { %v6440_v57 = vadd.f32 %v6434_v49, %v6356_v0  ;;  %v6436_v19 = vpop.f32.mrb[46].mxu1 }
 0x786   : > { %v6437_v38 = vpop.f32.mrb[47].mxu1 }
 0x78b   : > { %v6516_v36 = vpop.f32.mrb[48].mxu1 }
 0x78c   : > { %v6523_v18 = vadd.f32 %v6516_v36, %v6439_v55  ;;  %v6518_v1 = vpop.f32.mrb[49].mxu1 }
 0x78d   : > { %v6524_v37 = vadd.f32 %v6518_v1, %v6440_v57  ;;  %v6520_v16 = vpop.f32.mrb[50].mxu1 }
 0x78e   : > { %v6531_v7 = vadd.f32 %v6529_v33, %v6523_v18  ;;  %v6521_v56 = vpop.f32.mrb[51].mxu1 }
 0x78f   : > { %v6532_v25 = vadd.f32 %v6529_v33, %v6524_v37 }
 0x790   : > { %v6544_v9 = vsub.f32 %v6531_v7, %v8177_v15 }
 0x791   : > { %v6545_v2 = vsub.f32 %v6532_v25, %v6541_v3 }
 0x792   : > { %v6546_v14 = vmul.f32 %v6544_v9, %v6544_v9 }
 0x793   : > { %v6547_v60 = vmul.f32 %v6545_v2, %v6545_v2 }
 0x794   : > { %v6549_v34 = vsel %vm6548_vm12, %v6546_v14, 0.0 }
 0x795   : > { %v6550_v28 = vsel %vm6548_vm12, %v6547_v60, 0.0 }
 0x796   : > { %v6551_v54 = vadd.f32 %v6550_v28, %v6549_v34 }
 0x798   : > { %6552 = vadd.xlane.f32.xlu0 %v6551_v54 }
 0x825   : > { %v6553_v4 = vpop.xlane.xlu0 %6552 }
 0x826   : > { %v6554_v45 = vrot.slane %v6553_v4, 4 }
 0x828   : > { %v6555_v32 = vadd.f32 %v6554_v45, %v6553_v4 }
 0x82a   : > { %v6556_v5 = vrot.slane %v6555_v32, 2 }
 0x82c   : > { %v6557_v22 = vadd.f32 %v6556_v5, %v6555_v32 }
 0x82e   : > { %v6558_v63 = vrot.slane %v6557_v22, 1 }
 0x830   : > { %v6559_v52 = vadd.f32 %v6558_v63, %v6557_v22 }
 0x832   : > { %7473 = vpush %v6559_v52 }
 0x863   : > { %s7474_s0 = spop %7473 }
 0x864   : > { %v6561_v27 = vstv %s7474_s0 }
 0x865   : > { %6562 = vst [vmem:[%s561_s20] sm:$0x1] %v6561_v27 }
 0x866 PF: > { %s26_s18 = sadd.s32 1, %s8203_s18  }
 0x867   : > { %p23_p1 = scmp.ge.s32.totalorder %s26_s18, 4  }
 0x869   :  { %25 = sbr.rel (!%p23_p1) target bundleno = 3 (0x3), region = 156 }
 0x870   :  { %6580 = vsyncpa [#allocation3], 1 }
 0x871   :  { %6582 = vsyncpa [#allocation3 + $0x1], 1 }

</bundles_post_ra>
